<compile_context>
chip_gen: v7x
topology: tpu7x:2x2x1
jax: 0.10.0
libtpu: 0.0.40
codegen_flags: <defaults>
</compile_context>

<pallas_src>
import functools

import jax
import jax.numpy as jnp
from jax.experimental import pallas as pl
from jax.experimental.pallas import tpu as pltpu


# ----------------------------- Pallas kernel --------------------------------
def gcn_layer_kernel(*refs, rescale, apply_relu, apply_dropout):
    """One GCNConv layer tile-step: acc += A_tile @ P_tile, fused finalize.

    grid = (row tiles i, reduction tiles k).
      a_ref : (tm, tk)  bf16 normalized adjacency tile A2
      p_ref : (tk, F)   bf16 projection tile (= X@W, pre-scaled by rr for conv1)
      b_ref : (1, F)    f32 bias (resident)
      [rescale]       rr_ref (tm, 1) f32 row factor, d_ref (tm, F) f32 diag fix
      [apply_dropout] m_ref (tm, F) f32 keep/scale mask (0 or 2)
      o_ref : (tm, F)   f32 output tile
      acc   : (tm, F)   f32 VMEM accumulator scratch
    """
    it = iter(refs)
    a_ref = next(it)
    p_ref = next(it)
    b_ref = next(it)
    rr_ref = next(it) if rescale else None
    d_ref = next(it) if rescale else None
    m_ref = next(it) if apply_dropout else None
    o_ref = next(it)
    acc_ref = next(it)

    k = pl.program_id(1)

    @pl.when(k == 0)
    def _init():
        acc_ref[...] = jnp.zeros_like(acc_ref)

    # bf16 MXU matmul with f32 accumulation; the adjacency tile is the only
    # large HBM stream per grid step.
    acc_ref[...] += jnp.dot(a_ref[...], p_ref[...],
                            preferred_element_type=jnp.float32)

    @pl.when(k == pl.num_programs(1) - 1)
    def _finalize():
        h = acc_ref[...]
        if rescale:
            # improved (fill=2) normalization:  A1@P = rr_i*(A2@(rr*P)) + cd_i*P
            h = h * rr_ref[...] + d_ref[...]
        h = h + b_ref[...]
        if apply_relu:
            h = jnp.maximum(h, 0.0)
        if apply_dropout:
            h = h * m_ref[...]
        o_ref[...] = h.astype(o_ref.dtype)


# --------------------------- pallas_call builder ------------------------------
def _gcn_conv(a2, p, b, *, rr=None, d=None, mask=None, apply_relu, tm, tk):
    n_pad = a2.shape[0]
    fout = p.shape[1]
    rescale = rr is not None
    apply_dropout = mask is not None
    grid = (n_pad // tm, n_pad // tk)

    in_specs = [
        pl.BlockSpec((tm, tk), lambda i, k: (i, k)),        # A2 tile (bf16)
        pl.BlockSpec((tk, fout), lambda i, k: (k, 0)),      # P tile  (bf16)
        pl.BlockSpec((1, fout), lambda i, k: (0, 0)),       # bias (resident)
    ]
    operands = [a2, p, b]
    if rescale:
        in_specs += [
            pl.BlockSpec((tm, 1), lambda i, k: (i, 0)),     # rr row factor
            pl.BlockSpec((tm, fout), lambda i, k: (i, 0)),  # cd_i * P_i diag fix
        ]
        operands += [rr, d]
    if apply_dropout:
        in_specs.append(pl.BlockSpec((tm, fout), lambda i, k: (i, 0)))
        operands.append(mask)

    # Footprint-based VMEM budget (double-buffered inputs + acc + out),
    # clamped under v7x's 64 MiB physical VMEM.
    foot = (2 * tm * tk * 2            # A tile, bf16, double-buffered
            + 2 * tk * fout * 2        # P tile, bf16
            + tm * fout * 4            # f32 accumulator
            + 2 * tm * fout * 4        # output tile
            + 2 * fout * 4)            # bias
    if rescale:
        foot += 2 * (tm * 4 + tm * fout * 4)
    if apply_dropout:
        foot += 2 * tm * fout * 4
    vmem_bytes = int(min(56 * 1024 * 1024, max(16 * 1024 * 1024, 2 * foot)))

    kernel = functools.partial(gcn_layer_kernel, rescale=rescale,
                               apply_relu=apply_relu,
                               apply_dropout=apply_dropout)

    return pl.pallas_call(
        kernel,
        out_shape=jax.ShapeDtypeStruct((n_pad, fout), jnp.float32),
        grid=grid,
        in_specs=in_specs,
        out_specs=pl.BlockSpec((tm, fout), lambda i, k: (i, 0)),
        scratch_shapes=[pltpu.VMEM((tm, fout), jnp.float32)],
        compiler_params=pltpu.CompilerParams(
            # row tiles shard across both v7x TensorCores; k is a reduction
            dimension_semantics=("parallel", "arbitrary"),
            vmem_limit_bytes=vmem_bytes,
        ),
    )(*operands)


# ------------------------------ JAX wrapper ----------------------------------
def _round_up(v, m):
    return (v + m - 1) // m * m


def _pick_tiles(n_pad):
    """Largest {512,256,128} tiles dividing n_pad; keep >=2 row tiles (v7x)."""
    def biggest():
        for t in (512, 256, 128):
            if n_pad % t == 0:
                return t
        return 128

    tk = biggest()
    tm = biggest()
    while tm > 128 and n_pad // tm < 2:
        tm //= 2
    return tm, tk


def build_norm_adj(edge_index, edge_weight, num_nodes, fill_value):
    """Dense D^-1/2 (A_w + fill*I) D^-1/2 (f32, used only by the reference)."""
    src, dst = edge_index[0], edge_index[1]
    adj = jnp.zeros((num_nodes, num_nodes), jnp.float32)
    adj = adj.at[dst, src].add(edge_weight.astype(jnp.float32))   # A[i,j]=w(j->i)
    adj = adj + fill_value * jnp.eye(num_nodes, dtype=jnp.float32)
    deg = adj.sum(axis=1)
    dinv = jax.lax.rsqrt(deg)
    return dinv[:, None] * adj * dinv[None, :]


def build_gcn_norm_single(edge_index, edge_weight, num_nodes):
    """One dense normalized adjacency (fill=1) + per-node rescale vectors with
    which conv1's improved (fill=2) normalization is reconstructed:
        A1[i,j] = rr_i * rr_j * A2[i,j]   (i != j),   A1[i,i] = rr_i^2*A2[i,i] + cd_i
    """
    src, dst = edge_index[0], edge_index[1]
    adj = jnp.zeros((num_nodes, num_nodes), jnp.float32)
    adj = adj.at[dst, src].add(edge_weight.astype(jnp.float32))
    deg_w = adj.sum(axis=1)
    d1 = deg_w + 2.0                       # conv1 (improved=True): A + 2I
    d2 = deg_w + 1.0                       # conv2/conv3:           A + I
    dinv2 = jax.lax.rsqrt(d2)
    a2 = dinv2[:, None] * (adj + jnp.eye(num_nodes, dtype=jnp.float32)) * dinv2[None, :]
    rr = jnp.sqrt(d2 / d1)
    cd = 1.0 / d1
    return a2, rr, cd


@functools.partial(jax.jit, static_argnames=("training",))
def gcn_weight_forward(x, edge_index, edge_attr, params, dropout_seed,
                       training=True):
    n = x.shape[0]
    hidden = params["w1"].shape[1]
    num_classes = params["w3"].shape[1]

    n_pad = _round_up(max(n, 128), 128)
    hp = _round_up(hidden, 128)            # lane-dense hidden width
    cp = _round_up(num_classes, 128)       # lane-dense output width
    pn = n_pad - n
    tm, tk = _pick_tiles(n_pad)

    # glue (XLA): ONE dense normalized adjacency + rescale vectors, zero-padded.
    a2, rr, cd = build_gcn_norm_single(edge_index, edge_attr, n)
    a2 = jnp.pad(a2, ((0, pn), (0, pn))).astype(jnp.bfloat16)
    rr_col = jnp.pad(rr, (0, pn)).reshape(n_pad, 1)
    cd_col = jnp.pad(cd, (0, pn)).reshape(n_pad, 1)
    xp = jnp.pad(x.astype(jnp.float32), ((0, pn), (0, 0)))

    # zero-pad weights/biases to 128-wide lanes (padded channels stay exactly 0)
    w1 = jnp.pad(params["w1"], ((0, 0), (0, hp - hidden)))
    b1 = jnp.pad(params["b1"], ((0, 0), (0, hp - hidden)))
    w2 = jnp.pad(params["w2"], ((0, hp - hidden), (0, hp - hidden)))
    b2 = jnp.pad(params["b2"], ((0, 0), (0, hp - hidden)))
    w3 = jnp.pad(params["w3"], ((0, hp - hidden), (0, cp - num_classes)))
    b3 = jnp.pad(params["b3"], ((0, 0), (0, cp - num_classes)))

    # ---- conv1 (improved=True) + ReLU --------------------------------------
    p1 = xp @ w1                                            # projection, once
    h = _gcn_conv(a2, (rr_col * p1).astype(jnp.bfloat16), b1,
                  rr=rr_col, d=cd_col * p1,
                  apply_relu=True, tm=tm, tk=tk)

    # ---- conv2 + ReLU + dropout(p=0.5) --------------------------------------
    mask = None
    if training:
        # XLA-side mask (0 or 2.0); pltpu.prng_* is unavailable on the
        # interpret path, and this [N, hidden] stream is negligible vs [N, N].
        key = jax.random.fold_in(jax.random.PRNGKey(0x6C2), dropout_seed)
        keep = jax.random.bernoulli(key, 0.5, (n_pad, hp))
        mask = keep.astype(jnp.float32) * 2.0
    p2 = (h @ w2).astype(jnp.bfloat16)
    h = _gcn_conv(a2, p2, b2, mask=mask, apply_relu=True, tm=tm, tk=tk)

    # ---- conv3 ---------------------------------------------------------------
    p3 = (h @ w3).astype(jnp.bfloat16)
    out = _gcn_conv(a2, p3, b3, apply_relu=False, tm=tm, tk=tk)
    return out[:n, :num_classes]


def reference_forward(x, edge_index, edge_attr, params):
    """Pure f32 dense XLA reference (eval mode, no dropout)."""
    n = x.shape[0]
    a1 = build_norm_adj(edge_index, edge_attr, n, 2.0)
    a2 = build_norm_adj(edge_index, edge_attr, n, 1.0)
    h = jnp.maximum(a1 @ (x @ params["w1"]) + params["b1"], 0.0)
    h = jnp.maximum(a2 @ (h @ params["w2"]) + params["b2"], 0.0)
    return a2 @ (h @ params["w3"]) + params["b3"]


def init_params(key, num_features, hidden_channels, num_classes):
    """Glorot-uniform weights; small random biases (PyG zero-inits the bias, but
    forward semantics do not depend on init — nonzero bias exercises that path)."""
    def glorot(k, fan_in, fan_out):
        limit = jnp.sqrt(6.0 / (fan_in + fan_out))
        return jax.random.uniform(k, (fan_in, fan_out), jnp.float32, -limit, limit)

    k1, k2, k3, k4, k5, k6 = jax.random.split(key, 6)
    return {
        "w1": glorot(k1, num_features, hidden_channels),
        "b1": jax.random.uniform(k4, (1, hidden_channels), jnp.float32, -0.1, 0.1),
        "w2": glorot(k2, hidden_channels, hidden_channels),
        "b2": jax.random.uniform(k5, (1, hidden_channels), jnp.float32, -0.1, 0.1),
        "w3": glorot(k3, hidden_channels, num_classes),
        "b3": jax.random.uniform(k6, (1, num_classes), jnp.float32, -0.1, 0.1),
    }


if __name__ == "__main__":
    num_nodes = 500            # padded to 512 inside the wrapper
    num_features = 16
    hidden_channels = 32
    num_classes = 4
    num_edges = 4000

    root = jax.random.PRNGKey(0)
    k_x, k_src, k_dst, k_w, k_par = jax.random.split(root, 5)

    x = jax.random.normal(k_x, (num_nodes, num_features), jnp.float32)
    src = jax.random.randint(k_src, (num_edges,), 0, num_nodes, jnp.int32)
    dst = jax.random.randint(k_dst, (num_edges,), 0, num_nodes, jnp.int32)
    dst = jnp.where(dst == src, (dst + 1) % num_nodes, dst)   # no self loops
    edge_index = jnp.stack([src, dst], axis=0)
    edge_attr = jax.random.uniform(k_w, (num_edges,), jnp.float32, 0.1, 1.0)

    params = init_params(k_par, num_features, hidden_channels, num_classes)

    # Eval mode: deterministic -> check against the dense f32 XLA reference.
    # The adjacency / projections are intentionally bf16 in the kernel (perf),
    # so allow ~1e-1 absolute slack; measured error is typically ~1e-2.
    out_eval = gcn_weight_forward(x, edge_index, edge_attr, params, 0,
                                  training=False)
    jax.block_until_ready(out_eval)
    ref = reference_forward(x, edge_index, edge_attr, params)
    assert out_eval.shape == (num_nodes, num_classes)
    assert out_eval.dtype == jnp.float32
    max_err = float(jnp.max(jnp.abs(out_eval - ref)))
    assert max_err < 1e-1, f"kernel vs f32 reference: max abs err {max_err}"

    # Training mode: dropout(p=0.5) mask built XLA-side, applied in-kernel.
    out_train = gcn_weight_forward(x, edge_index, edge_attr, params, 1234,
                                   training=True)
    jax.block_until_ready(out_train)
    assert out_train.shape == (num_nodes, num_classes)
    assert bool(jnp.all(jnp.isfinite(out_train)))

    print("KERNEL_OK")
</pallas_src>

<mosaic_0001>
module attributes {stable_mosaic.version = 11 : i64} {
  func.func private @main(%arg0: i32) attributes {dimension_semantics = [#tpu.dimension_semantics<core_parallel>], iteration_bounds = array<i64: 2>, tpu.core_type = #tpu.core_type<sc_scalar_subcore>, window_params = []} {
    return
  }
}

module attributes {stable_mosaic.version = 11 : i64} {
  func.func private @main(%arg0: i32) attributes {dimension_semantics = [#tpu.dimension_semantics<core_parallel>], iteration_bounds = array<i64: 2>, tpu.core_type = #tpu.core_type<sc_scalar_subcore>, window_params = []} {
    return
  }
}

module attributes {stable_mosaic.version = 11 : i64} {
  func.func @gcn_layer_kernel(%arg0: i32, %arg1: i32, %arg2: memref<256x512xbf16, #tpu.memory_space<vmem>>, %arg3: memref<512x128xbf16, #tpu.memory_space<vmem>>, %arg4: memref<1x128xf32, #tpu.memory_space<vmem>>, %arg5: memref<256x1xf32, #tpu.memory_space<vmem>>, %arg6: memref<256x128xf32, #tpu.memory_space<vmem>>, %arg7: memref<256x128xf32, #tpu.memory_space<vmem>>, %arg8: memref<256x128xf32, #tpu.memory_space<vmem>>) attributes {dimension_semantics = [#tpu.dimension_semantics<parallel>, #tpu.dimension_semantics<arbitrary>], iteration_bounds = array<i64: 2, 1>, scalar_prefetch = 0 : i64, scratch_operands = 1 : i64, tpu.core_type = #tpu.core_type<tc>, window_params = [{transform_indices = @transform_0, window_bounds = array<i64: 256, 512>}, {transform_indices = @transform_1, window_bounds = array<i64: 512, 128>}, {pipeline_mode = #tpu.pipeline_mode<synchronous>, transform_indices = @transform_2, window_bounds = array<i64: 1, 128>}, {transform_indices = @transform_3, window_bounds = array<i64: 256, 1>}, {transform_indices = @transform_4, window_bounds = array<i64: 256, 128>}, {transform_indices = @transform_5, window_bounds = array<i64: 256, 128>}]} {
    %c0_i32 = arith.constant 0 : i32
    %0 = arith.cmpi eq, %arg1, %c0_i32 : i32
    %1 = arith.extui %0 : i1 to i32
    %c0_i32_0 = arith.constant 0 : i32
    %2 = arith.cmpi ne, %1, %c0_i32_0 : i32
    scf.if %2 {
      %cst_10 = arith.constant 0.000000e+00 : f32
      %12 = vector.broadcast %cst_10 : f32 to vector<256x128xf32>
      %c0_11 = arith.constant 0 : index
      %c0_12 = arith.constant 0 : index
      %13 = vector.load %arg8[%c0_11, %c0_12] : memref<256x128xf32, #tpu.memory_space<vmem>>, vector<256x128xf32>
      tpu.vector_store %arg8[%c0_11, %c0_12], %12 {strides = array<i32>} : memref<256x128xf32, #tpu.memory_space<vmem>>, vector<256x128xf32>,
    } else {
    }
    %c0 = arith.constant 0 : index
    %c0_1 = arith.constant 0 : index
    %3 = vector.load %arg8[%c0, %c0_1] : memref<256x128xf32, #tpu.memory_space<vmem>>, vector<256x128xf32>
    %c0_2 = arith.constant 0 : index
    %c0_3 = arith.constant 0 : index
    %4 = vector.load %arg2[%c0_2, %c0_3] : memref<256x512xbf16, #tpu.memory_space<vmem>>, vector<256x512xbf16>
    %c0_4 = arith.constant 0 : index
    %c0_5 = arith.constant 0 : index
    %5 = vector.load %arg3[%c0_4, %c0_5] : memref<512x128xbf16, #tpu.memory_space<vmem>>, vector<512x128xbf16>
    %cst = arith.constant dense<0.000000e+00> : vector<256x128xf32>
    %6 = tpu.matmul %4, %5, %cst {dimension_numbers = #tpu.dot_dimension_numbers<[1], [0], [0], [1], [0, 0, 1, 1], [], []>} : vector<256x512xbf16>, vector<512x128xbf16>, vector<256x128xf32> -> vector<256x128xf32>
    %7 = arith.addf %3, %6 : vector<256x128xf32>
    %c0_6 = arith.constant 0 : index
    %c0_7 = arith.constant 0 : index
    %8 = vector.load %arg8[%c0_6, %c0_7] : memref<256x128xf32, #tpu.memory_space<vmem>>, vector<256x128xf32>
    tpu.vector_store %arg8[%c0_6, %c0_7], %7 {strides = array<i32>} : memref<256x128xf32, #tpu.memory_space<vmem>>, vector<256x128xf32>,
    %c0_i32_8 = arith.constant 0 : i32
    %9 = arith.cmpi eq, %arg1, %c0_i32_8 : i32
    %10 = arith.extui %9 : i1 to i32
    %c0_i32_9 = arith.constant 0 : i32
    %11 = arith.cmpi ne, %10, %c0_i32_9 : i32
    scf.if %11 {
      %c0_10 = arith.constant 0 : index
      %c0_11 = arith.constant 0 : index
      %12 = vector.load %arg8[%c0_10, %c0_11] : memref<256x128xf32, #tpu.memory_space<vmem>>, vector<256x128xf32>
      %c0_12 = arith.constant 0 : index
      %c0_13 = arith.constant 0 : index
      %13 = vector.load %arg5[%c0_12, %c0_13] : memref<256x1xf32, #tpu.memory_space<vmem>>, vector<256x1xf32>
      %14 = vector.broadcast %13 : vector<256x1xf32> to vector<256x128xf32>
      %15 = arith.mulf %12, %14 : vector<256x128xf32>
      %c0_14 = arith.constant 0 : index
      %c0_15 = arith.constant 0 : index
      %16 = vector.load %arg6[%c0_14, %c0_15] : memref<256x128xf32, #tpu.memory_space<vmem>>, vector<256x128xf32>
      %17 = arith.addf %15, %16 : vector<256x128xf32>
      %c0_16 = arith.constant 0 : index
      %c0_17 = arith.constant 0 : index
      %18 = vector.load %arg4[%c0_16, %c0_17] : memref<1x128xf32, #tpu.memory_space<vmem>>, vector<1x128xf32>
      %19 = vector.broadcast %18 : vector<1x128xf32> to vector<256x128xf32>
      %20 = arith.addf %17, %19 : vector<256x128xf32>
      %cst_18 = arith.constant 0.000000e+00 : f32
      %21 = vector.broadcast %cst_18 : f32 to vector<256x128xf32>
      %22 = arith.maximumf %20, %21 : vector<256x128xf32>
      %c0_19 = arith.constant 0 : index
      %c0_20 = arith.constant 0 : index
      %23 = vector.load %arg7[%c0_19, %c0_20] : memref<256x128xf32, #tpu.memory_space<vmem>>, vector<256x128xf32>
      tpu.vector_store %arg7[%c0_19, %c0_20], %22 {strides = array<i32>} : memref<256x128xf32, #tpu.memory_space<vmem>>, vector<256x128xf32>,
    } else {
    }
    return
  }
  func.func @transform_0(%arg0: i32, %arg1: i32) -> (i32, i32) {
    %c0_i32 = arith.constant 0 : i32
    return %arg0, %arg1 : i32, i32
  }
  func.func @transform_1(%arg0: i32, %arg1: i32) -> (i32, i32) {
    %c0_i32 = arith.constant 0 : i32
    %c0_i32_0 = arith.constant 0 : i32
    return %arg1, %c0_i32 : i32, i32
  }
  func.func @transform_2(%arg0: i32, %arg1: i32) -> (i32, i32) {
    %c0_i32 = arith.constant 0 : i32
    %c0_i32_0 = arith.constant 0 : i32
    %c0_i32_1 = arith.constant 0 : i32
    return %c0_i32, %c0_i32_0 : i32, i32
  }
  func.func @transform_3(%arg0: i32, %arg1: i32) -> (i32, i32) {
    %c0_i32 = arith.constant 0 : i32
    %c0_i32_0 = arith.constant 0 : i32
    return %arg0, %c0_i32 : i32, i32
  }
  func.func @transform_4(%arg0: i32, %arg1: i32) -> (i32, i32) {
    %c0_i32 = arith.constant 0 : i32
    %c0_i32_0 = arith.constant 0 : i32
    return %arg0, %c0_i32 : i32, i32
  }
  func.func @transform_5(%arg0: i32, %arg1: i32) -> (i32, i32) {
    %c0_i32 = arith.constant 0 : i32
    %c0_i32_0 = arith.constant 0 : i32
    return %arg0, %c0_i32 : i32, i32
  }
}

module attributes {stable_mosaic.version = 11 : i64} {
  func.func @gcn_layer_kernel(%arg0: i32, %arg1: i32, %arg2: memref<256x512xbf16, #tpu.memory_space<vmem>>, %arg3: memref<512x128xbf16, #tpu.memory_space<vmem>>, %arg4: memref<1x128xf32, #tpu.memory_space<vmem>>, %arg5: memref<256x128xf32, #tpu.memory_space<vmem>>, %arg6: memref<256x128xf32, #tpu.memory_space<vmem>>) attributes {dimension_semantics = [#tpu.dimension_semantics<parallel>, #tpu.dimension_semantics<arbitrary>], iteration_bounds = array<i64: 2, 1>, scalar_prefetch = 0 : i64, scratch_operands = 1 : i64, tpu.core_type = #tpu.core_type<tc>, window_params = [{transform_indices = @transform_0, window_bounds = array<i64: 256, 512>}, {transform_indices = @transform_1, window_bounds = array<i64: 512, 128>}, {pipeline_mode = #tpu.pipeline_mode<synchronous>, transform_indices = @transform_2, window_bounds = array<i64: 1, 128>}, {transform_indices = @transform_3, window_bounds = array<i64: 256, 128>}]} {
    %c0_i32 = arith.constant 0 : i32
    %0 = arith.cmpi eq, %arg1, %c0_i32 : i32
    %1 = arith.extui %0 : i1 to i32
    %c0_i32_0 = arith.constant 0 : i32
    %2 = arith.cmpi ne, %1, %c0_i32_0 : i32
    scf.if %2 {
      %cst_10 = arith.constant 0.000000e+00 : f32
      %12 = vector.broadcast %cst_10 : f32 to vector<256x128xf32>
      %c0_11 = arith.constant 0 : index
      %c0_12 = arith.constant 0 : index
      %13 = vector.load %arg6[%c0_11, %c0_12] : memref<256x128xf32, #tpu.memory_space<vmem>>, vector<256x128xf32>
      tpu.vector_store %arg6[%c0_11, %c0_12], %12 {strides = array<i32>} : memref<256x128xf32, #tpu.memory_space<vmem>>, vector<256x128xf32>,
    } else {
    }
    %c0 = arith.constant 0 : index
    %c0_1 = arith.constant 0 : index
    %3 = vector.load %arg6[%c0, %c0_1] : memref<256x128xf32, #tpu.memory_space<vmem>>, vector<256x128xf32>
    %c0_2 = arith.constant 0 : index
    %c0_3 = arith.constant 0 : index
    %4 = vector.load %arg2[%c0_2, %c0_3] : memref<256x512xbf16, #tpu.memory_space<vmem>>, vector<256x512xbf16>
    %c0_4 = arith.constant 0 : index
    %c0_5 = arith.constant 0 : index
    %5 = vector.load %arg3[%c0_4, %c0_5] : memref<512x128xbf16, #tpu.memory_space<vmem>>, vector<512x128xbf16>
    %cst = arith.constant dense<0.000000e+00> : vector<256x128xf32>
    %6 = tpu.matmul %4, %5, %cst {dimension_numbers = #tpu.dot_dimension_numbers<[1], [0], [0], [1], [0, 0, 1, 1], [], []>} : vector<256x512xbf16>, vector<512x128xbf16>, vector<256x128xf32> -> vector<256x128xf32>
    %7 = arith.addf %3, %6 : vector<256x128xf32>
    %c0_6 = arith.constant 0 : index
    %c0_7 = arith.constant 0 : index
    %8 = vector.load %arg6[%c0_6, %c0_7] : memref<256x128xf32, #tpu.memory_space<vmem>>, vector<256x128xf32>
    tpu.vector_store %arg6[%c0_6, %c0_7], %7 {strides = array<i32>} : memref<256x128xf32, #tpu.memory_space<vmem>>, vector<256x128xf32>,
    %c0_i32_8 = arith.constant 0 : i32
    %9 = arith.cmpi eq, %arg1, %c0_i32_8 : i32
    %10 = arith.extui %9 : i1 to i32
    %c0_i32_9 = arith.constant 0 : i32
    %11 = arith.cmpi ne, %10, %c0_i32_9 : i32
    scf.if %11 {
      %c0_10 = arith.constant 0 : index
      %c0_11 = arith.constant 0 : index
      %12 = vector.load %arg6[%c0_10, %c0_11] : memref<256x128xf32, #tpu.memory_space<vmem>>, vector<256x128xf32>
      %c0_12 = arith.constant 0 : index
      %c0_13 = arith.constant 0 : index
      %13 = vector.load %arg4[%c0_12, %c0_13] : memref<1x128xf32, #tpu.memory_space<vmem>>, vector<1x128xf32>
      %14 = vector.broadcast %13 : vector<1x128xf32> to vector<256x128xf32>
      %15 = arith.addf %12, %14 : vector<256x128xf32>
      %cst_14 = arith.constant 0.000000e+00 : f32
      %16 = vector.broadcast %cst_14 : f32 to vector<256x128xf32>
      %17 = arith.maximumf %15, %16 : vector<256x128xf32>
      %c0_15 = arith.constant 0 : index
      %c0_16 = arith.constant 0 : index
      %18 = vector.load %arg5[%c0_15, %c0_16] : memref<256x128xf32, #tpu.memory_space<vmem>>, vector<256x128xf32>
      tpu.vector_store %arg5[%c0_15, %c0_16], %17 {strides = array<i32>} : memref<256x128xf32, #tpu.memory_space<vmem>>, vector<256x128xf32>,
    } else {
    }
    return
  }
  func.func @transform_0(%arg0: i32, %arg1: i32) -> (i32, i32) {
    %c0_i32 = arith.constant 0 : i32
    return %arg0, %arg1 : i32, i32
  }
  func.func @transform_1(%arg0: i32, %arg1: i32) -> (i32, i32) {
    %c0_i32 = arith.constant 0 : i32
    %c0_i32_0 = arith.constant 0 : i32
    return %arg1, %c0_i32 : i32, i32
  }
  func.func @transform_2(%arg0: i32, %arg1: i32) -> (i32, i32) {
    %c0_i32 = arith.constant 0 : i32
    %c0_i32_0 = arith.constant 0 : i32
    %c0_i32_1 = arith.constant 0 : i32
    return %c0_i32, %c0_i32_0 : i32, i32
  }
  func.func @transform_3(%arg0: i32, %arg1: i32) -> (i32, i32) {
    %c0_i32 = arith.constant 0 : i32
    %c0_i32_0 = arith.constant 0 : i32
    return %arg0, %c0_i32 : i32, i32
  }
}

module attributes {stable_mosaic.version = 11 : i64} {
  func.func @gcn_layer_kernel(%arg0: i32, %arg1: i32, %arg2: memref<256x512xbf16, #tpu.memory_space<vmem>>, %arg3: memref<512x128xbf16, #tpu.memory_space<vmem>>, %arg4: memref<1x128xf32, #tpu.memory_space<vmem>>, %arg5: memref<256x128xf32, #tpu.memory_space<vmem>>, %arg6: memref<256x128xf32, #tpu.memory_space<vmem>>) attributes {dimension_semantics = [#tpu.dimension_semantics<parallel>, #tpu.dimension_semantics<arbitrary>], iteration_bounds = array<i64: 2, 1>, scalar_prefetch = 0 : i64, scratch_operands = 1 : i64, tpu.core_type = #tpu.core_type<tc>, window_params = [{transform_indices = @transform_0, window_bounds = array<i64: 256, 512>}, {transform_indices = @transform_1, window_bounds = array<i64: 512, 128>}, {pipeline_mode = #tpu.pipeline_mode<synchronous>, transform_indices = @transform_2, window_bounds = array<i64: 1, 128>}, {transform_indices = @transform_3, window_bounds = array<i64: 256, 128>}]} {
    %c0_i32 = arith.constant 0 : i32
    %0 = arith.cmpi eq, %arg1, %c0_i32 : i32
    %1 = arith.extui %0 : i1 to i32
    %c0_i32_0 = arith.constant 0 : i32
    %2 = arith.cmpi ne, %1, %c0_i32_0 : i32
    scf.if %2 {
      %cst_10 = arith.constant 0.000000e+00 : f32
      %12 = vector.broadcast %cst_10 : f32 to vector<256x128xf32>
      %c0_11 = arith.constant 0 : index
      %c0_12 = arith.constant 0 : index
      %13 = vector.load %arg6[%c0_11, %c0_12] : memref<256x128xf32, #tpu.memory_space<vmem>>, vector<256x128xf32>
      tpu.vector_store %arg6[%c0_11, %c0_12], %12 {strides = array<i32>} : memref<256x128xf32, #tpu.memory_space<vmem>>, vector<256x128xf32>,
    } else {
    }
    %c0 = arith.constant 0 : index
    %c0_1 = arith.constant 0 : index
    %3 = vector.load %arg6[%c0, %c0_1] : memref<256x128xf32, #tpu.memory_space<vmem>>, vector<256x128xf32>
    %c0_2 = arith.constant 0 : index
    %c0_3 = arith.constant 0 : index
    %4 = vector.load %arg2[%c0_2, %c0_3] : memref<256x512xbf16, #tpu.memory_space<vmem>>, vector<256x512xbf16>
    %c0_4 = arith.constant 0 : index
    %c0_5 = arith.constant 0 : index
    %5 = vector.load %arg3[%c0_4, %c0_5] : memref<512x128xbf16, #tpu.memory_space<vmem>>, vector<512x128xbf16>
    %cst = arith.constant dense<0.000000e+00> : vector<256x128xf32>
    %6 = tpu.matmul %4, %5, %cst {dimension_numbers = #tpu.dot_dimension_numbers<[1], [0], [0], [1], [0, 0, 1, 1], [], []>} : vector<256x512xbf16>, vector<512x128xbf16>, vector<256x128xf32> -> vector<256x128xf32>
    %7 = arith.addf %3, %6 : vector<256x128xf32>
    %c0_6 = arith.constant 0 : index
    %c0_7 = arith.constant 0 : index
    %8 = vector.load %arg6[%c0_6, %c0_7] : memref<256x128xf32, #tpu.memory_space<vmem>>, vector<256x128xf32>
    tpu.vector_store %arg6[%c0_6, %c0_7], %7 {strides = array<i32>} : memref<256x128xf32, #tpu.memory_space<vmem>>, vector<256x128xf32>,
    %c0_i32_8 = arith.constant 0 : i32
    %9 = arith.cmpi eq, %arg1, %c0_i32_8 : i32
    %10 = arith.extui %9 : i1 to i32
    %c0_i32_9 = arith.constant 0 : i32
    %11 = arith.cmpi ne, %10, %c0_i32_9 : i32
    scf.if %11 {
      %c0_10 = arith.constant 0 : index
      %c0_11 = arith.constant 0 : index
      %12 = vector.load %arg6[%c0_10, %c0_11] : memref<256x128xf32, #tpu.memory_space<vmem>>, vector<256x128xf32>
      %c0_12 = arith.constant 0 : index
      %c0_13 = arith.constant 0 : index
      %13 = vector.load %arg4[%c0_12, %c0_13] : memref<1x128xf32, #tpu.memory_space<vmem>>, vector<1x128xf32>
      %14 = vector.broadcast %13 : vector<1x128xf32> to vector<256x128xf32>
      %15 = arith.addf %12, %14 : vector<256x128xf32>
      %c0_14 = arith.constant 0 : index
      %c0_15 = arith.constant 0 : index
      %16 = vector.load %arg5[%c0_14, %c0_15] : memref<256x128xf32, #tpu.memory_space<vmem>>, vector<256x128xf32>
      tpu.vector_store %arg5[%c0_14, %c0_15], %15 {strides = array<i32>} : memref<256x128xf32, #tpu.memory_space<vmem>>, vector<256x128xf32>,
    } else {
    }
    return
  }
  func.func @transform_0(%arg0: i32, %arg1: i32) -> (i32, i32) {
    %c0_i32 = arith.constant 0 : i32
    return %arg0, %arg1 : i32, i32
  }
  func.func @transform_1(%arg0: i32, %arg1: i32) -> (i32, i32) {
    %c0_i32 = arith.constant 0 : i32
    %c0_i32_0 = arith.constant 0 : i32
    return %arg1, %c0_i32 : i32, i32
  }
  func.func @transform_2(%arg0: i32, %arg1: i32) -> (i32, i32) {
    %c0_i32 = arith.constant 0 : i32
    %c0_i32_0 = arith.constant 0 : i32
    %c0_i32_1 = arith.constant 0 : i32
    return %c0_i32, %c0_i32_0 : i32, i32
  }
  func.func @transform_3(%arg0: i32, %arg1: i32) -> (i32, i32) {
    %c0_i32 = arith.constant 0 : i32
    %c0_i32_0 = arith.constant 0 : i32
    return %arg0, %c0_i32 : i32, i32
  }
}

</mosaic_0001>

<bundles_post_ra>
// kernel: gcn_weight_forward.3
= control target key start
LH: loop header
LB: loop body
LE: loop exit
PB: predicated region body
PF: predicated region fallthrough
CT: control target
= control target key end

     0   :  { %s2505_s18 = smov 0   ;;  %s2507_s19 = smov 0   ;;  %s2857_s0 = inlined_call_operand.vmem [shape: bf16[512,512], index: 0, kind: input, shape index: {}]   ;;  %s2858_s1 = inlined_call_operand.vmem [shape: bf16[512,128], index: 1, kind: input, shape index: {}]   ;;  %s2859_s2 = inlined_call_operand.vmem [shape: f32[1,128], index: 2, kind: input, shape index: {}]   ;;  %s2860_s3 = inlined_call_operand.vmem [shape: f32[512,1], index: 3, kind: input, shape index: {}]   ;;  %s2861_s4 = inlined_call_operand.vmem [shape: f32[512,128], index: 4, kind: input, shape index: {}]   ;;  %s2862_s5 = inlined_call_operand.vmem [shape: f32[512,128], index: 5, kind: output, shape index: {}]  }
   0x1   :  { %s2509_s20 = smov 0  }
   0x2 LB: > { %s27_s21 = sadd.s32 1, %s2468_s19  ;;  %p1961_p0 = scmp.ge.s32.totalorder %s2472_s20, 1  ;;  %s2472_s20 = sphi %s2509_s20, %s15_s20   ;;  %s2468_s19 = sphi %s2507_s19, %s2864_s19   ;;  %s2464_s18 = sphi %s2505_s18, %s2863_s18  }
   0x3   : > { %p29_p1 = scmp.ge.s32.totalorder %s27_s21, 2  ;;  %p241_p2 = scmp.lt.s32.totalorder %s2472_s20, 3 }
   0x5   : > { %s2866_s21 = smov (%p29_p1, %s27_s21), 0  ;;  %p242_p3 = pnand %p1961_p0, %p241_p2 }
   0x6   : > { %v2322_v0 = vld [vmem:[%s2858_s1 + $0x40] sm:$0xff] (!%p242_p3)   ;;  %v2474_v4 = vmov (!%p242_p3), 0   ;;  %v2326_v5 = vld [vmem:[%s2858_s1 + $0x48] sm:$0xff] (!%p242_p3)   ;;  %v2330_v9 = vld [vmem:[%s2858_s1 + $0x50] sm:$0xff] (!%p242_p3)   ;;  %s1962_s8 = sshll.u32 (!%p242_p3), %s2464_s18, 5 }
   0x7   : > { %245 = sbr.rel (%p242_p3) target bundleno = 389 (0x185), region = 40  ;;  %v2323_v1 = vld [vmem:[%s2858_s1 + $0xc0] sm:$0xff] (!%p242_p3)   ;;  %2071 = vmatprep.subr.bf16.mxu0 (!%p242_p3), %v2322_v0  ;;  %2320 = vset.pattern.permute.xlu0 (!%p242_p3), %v2474_v4  ;;  %v2327_v6 = vld [vmem:[%s2858_s1 + $0xc8] sm:$0xff] (!%p242_p3)   ;;  %v2331_v10 = vld [vmem:[%s2858_s1 + $0xd0] sm:$0xff] (!%p242_p3)   ;;  %p291_p4 = scmp.lt.s32.totalorder (!%p242_p3), %s1962_s8, 63 }
   0x8   : > { %v2324_v2 = vld [vmem:[%s2858_s1] sm:$0xff] (!%p242_p3)   ;;  %2183 = vmatprep.subr.bf16.mxu1 (!%p242_p3), %v2323_v1  ;;  %2321 = vset.pattern.permute.xlu1 (!%p242_p3), %v2474_v4  ;;  %v2328_v7 = vld [vmem:[%s2858_s1 + $0x8] sm:$0xff] (!%p242_p3)   ;;  %v2332_v11 = vld [vmem:[%s2858_s1 + $0x10] sm:$0xff] (!%p242_p3)  }
   0x9   : > { %v2325_v3 = vld [vmem:[%s2858_s1 + $0x80] sm:$0xff] (!%p242_p3)   ;;  %2072 = vmatpush3.bf16.msra.mxu0 (!%p242_p3), %v2324_v2  ;;  %v2329_v8 = vld [vmem:[%s2858_s1 + $0x88] sm:$0xff] (!%p242_p3)   ;;  %v2333_v12 = vld [vmem:[%s2858_s1 + $0x90] sm:$0xff] (!%p242_p3)  }
   0xa   : > { %2184 = vmatpush3.bf16.msra.mxu1 (!%p242_p3), %v2325_v3  ;;  %2073 = vmatprep.subr.bf16.mxu0 (!%p242_p3), %v2326_v5  ;;  %v2334_v13 = vld [vmem:[%s2858_s1 + $0x58] sm:$0xff] (!%p242_p3)   ;;  %v2338_v17 = vld [vmem:[%s2858_s1 + $0x60] sm:$0xff] (!%p242_p3)   ;;  %v2342_v21 = vld [vmem:[%s2858_s1 + $0x68] sm:$0xff] (!%p242_p3)  }
   0xb   : > { %2185 = vmatprep.subr.bf16.mxu1 (!%p242_p3), %v2327_v6  ;;  %v2335_v14 = vld [vmem:[%s2858_s1 + $0xd8] sm:$0xff] (!%p242_p3)   ;;  %v2339_v18 = vld [vmem:[%s2858_s1 + $0xe0] sm:$0xff] (!%p242_p3)   ;;  %v2343_v22 = vld [vmem:[%s2858_s1 + $0xe8] sm:$0xff] (!%p242_p3)  }
   0xc   : > { %v2336_v15 = vld [vmem:[%s2858_s1 + $0x18] sm:$0xff] (!%p242_p3)   ;;  %v2340_v19 = vld [vmem:[%s2858_s1 + $0x20] sm:$0xff] (!%p242_p3)   ;;  %v2344_v23 = vld [vmem:[%s2858_s1 + $0x28] sm:$0xff] (!%p242_p3)  }
   0xd   : > { %2074 = vmatpush3.bf16.msra.mxu0 (!%p242_p3), %v2328_v7  ;;  %v2337_v16 = vld [vmem:[%s2858_s1 + $0x98] sm:$0xff] (!%p242_p3)   ;;  %v2341_v20 = vld [vmem:[%s2858_s1 + $0xa0] sm:$0xff] (!%p242_p3)   ;;  %v2345_v24 = vld [vmem:[%s2858_s1 + $0xa8] sm:$0xff] (!%p242_p3)  }
   0xe   : > { %2186 = vmatpush3.bf16.msra.mxu1 %v2329_v8  ;;  %2075 = vmatprep.subr.bf16.mxu0 %v2330_v9  ;;  %s2868_s8 = smov (!%p291_p4, %s1962_s8), 63  ;;  %v2346_v25 = vld [vmem:[%s2858_s1 + $0x70] sm:$0xff]   ;;  %v2350_v29 = vld [vmem:[%s2858_s1 + $0x78] sm:$0xff]  }
   0xf   : > { %2187 = vmatprep.subr.bf16.mxu1 %v2331_v10  ;;  %v2347_v26 = vld [vmem:[%s2858_s1 + $0xf0] sm:$0xff]   ;;  %s2070_s10 = sshll.u32 %s2868_s8, 4  ;;  %v2351_v30 = vld [vmem:[%s2858_s1 + $0xf8] sm:$0xff]   ;;  %s2646_s27 = sshll.u32 %s2868_s8, 3 }
  0x10   : > { %v2348_v27 = vld [vmem:[%s2858_s1 + $0x30] sm:$0xff]   ;;  %s2622_s22 = scalar_lea.vmem %s2857_s0, %s2070_s10  ;;  %v2352_v31 = vld [vmem:[%s2858_s1 + $0x38] sm:$0xff]   ;;  %s2655_s30 = scalar_lea.vmem %s2860_s3, %s2646_s27 }
  0x11   : > { %2076 = vmatpush3.bf16.msra.mxu0 %v2332_v11  ;;  %v2349_v28 = vld [vmem:[%s2858_s1 + $0xb0] sm:$0xff]   ;;  %v2353_v32 = vld [vmem:[%s2858_s1 + $0xb8] sm:$0xff]   ;;  %v1455_v51 = vld [vmem:[%s2655_s30] sm:$0xff]  ;;  %s2739_s7 = scalar_lea.vmem %s2861_s4, %s2646_s27  ;;  %s2753_s13 = scalar_lea.vmem %s2862_s5, %s2646_s27 }
  0x12   : > { %2188 = vmatpush3.bf16.msra.mxu1 %v2333_v12  ;;  %2077 = vmatprep.subr.bf16.mxu0 %v2334_v13  ;;  %v2354_v33 = vld [vmem:[%s2622_s22] ss:$16 sps:$4 sm:$0xff]   ;;  %v2356_v34 = vld [vmem:[%s2622_s22 + $0x4] ss:$16 sps:$4 sm:$0xff]   ;;  %v2357_v35 = vld [vmem:[%s2622_s22 + $0x8] ss:$16 sps:$4 sm:$0xff]  }
  0x13   : > { %2189 = vmatprep.subr.bf16.mxu1 %v2335_v14  ;;  %v2359_v36 = vld [vmem:[%s2622_s22 + $0xc] ss:$16 sps:$4 sm:$0xff]   ;;  %1066 = vmatprep.mubr.bf16.mxu0 %v2356_v34  ;;  %v2360_v37 = vld [vmem:[%s2622_s22 + $0x24] ss:$16 sps:$4 sm:$0xff]   ;;  %v2364_v39 = vld [vmem:[%s2622_s22 + $0x20] ss:$16 sps:$4 sm:$0xff]  }
  0x14   : > { %1227 = vmatprep.mubr.bf16.mxu1 %v2359_v36  ;;  %v2362_v38 = vld [vmem:[%s2622_s22 + $0x2c] ss:$16 sps:$4 sm:$0xff]   ;;  %v2365_v40 = vld [vmem:[%s2622_s22 + $0x28] ss:$16 sps:$4 sm:$0xff]   ;;  %v2366_v41 = vld [vmem:[%s2622_s22 + $0x44] ss:$16 sps:$4 sm:$0xff]   ;;  %1489 = vperm.xlu0 %2320, %v1455_v51  }
  0x15   : > { %2078 = vmatpush3.bf16.msra.mxu0 %v2336_v15  ;;  %v2368_v42 = vld [vmem:[%s2622_s22 + $0x4c] ss:$16 sps:$4 sm:$0xff]   ;;  %v2370_v43 = vld [vmem:[%s2622_s22 + $0x40] ss:$16 sps:$4 sm:$0xff]   ;;  %v2371_v44 = vld [vmem:[%s2622_s22 + $0x48] ss:$16 sps:$4 sm:$0xff]  }
  0x16   : > { %2190 = vmatpush3.bf16.msra.mxu1 %v2337_v16  ;;  %2079 = vmatprep.subr.bf16.mxu0 %v2338_v17  ;;  %v2372_v45 = vld [vmem:[%s2622_s22 + $0x64] ss:$16 sps:$4 sm:$0xff]   ;;  %v2374_v46 = vld [vmem:[%s2622_s22 + $0x6c] ss:$16 sps:$4 sm:$0xff]   ;;  %v2376_v47 = vld [vmem:[%s2622_s22 + $0x60] ss:$16 sps:$4 sm:$0xff]  }
  0x17   : > { %2191 = vmatprep.subr.bf16.mxu1 %v2339_v18  ;;  %v2377_v48 = vld [vmem:[%s2622_s22 + $0x68] ss:$16 sps:$4 sm:$0xff]   ;;  %v2378_v49 = vld [vmem:[%s2622_s22 + $0x84] ss:$16 sps:$4 sm:$0xff]   ;;  %v2380_v50 = vld [vmem:[%s2622_s22 + $0x8c] ss:$16 sps:$4 sm:$0xff]  }
  0x18   : > { %v2382_v52 = vld [vmem:[%s2622_s22 + $0x80] ss:$16 sps:$4 sm:$0xff]   ;;  %v2383_v53 = vld [vmem:[%s2622_s22 + $0x88] ss:$16 sps:$4 sm:$0xff]   ;;  %v2384_v56 = vld [vmem:[%s2622_s22 + $0xa4] ss:$16 sps:$4 sm:$0xff]  }
  0x19   : > { %2080 = vmatpush3.bf16.msra.mxu0 %v2340_v19  ;;  %v1457_v54 = vld [vmem:[%s2655_s30 + $0x10] sm:$0xff]  ;;  %v1456_v55 = vld [vmem:[%s2655_s30 + $0x8] sm:$0xff]  ;;  %v1458_v58 = vld [vmem:[%s2655_s30 + $0x18] sm:$0xff] }
  0x1a   : > { %2192 = vmatpush3.bf16.msra.mxu1 %v2341_v20  ;;  %2081 = vmatprep.subr.bf16.mxu0 %v2342_v21  ;;  %v2386_v57 = vld [vmem:[%s2622_s22 + $0xac] ss:$16 sps:$4 sm:$0xff]   ;;  %v1459_v59 = vld [vmem:[%s2655_s30 + $0x20] sm:$0xff]  ;;  %v2389_v62 = vld [vmem:[%s2622_s22 + $0xa8] ss:$16 sps:$4 sm:$0xff]  }
  0x1b   : > { %2193 = vmatprep.subr.bf16.mxu1 %v2343_v22  ;;  %1499 = vperm.xlu1 %2321, %v1457_v54   ;;  %v1460_v60 = vld [vmem:[%s2655_s30 + $0x28] sm:$0xff]  ;;  %v2388_v61 = vld [vmem:[%s2622_s22 + $0xa0] ss:$16 sps:$4 sm:$0xff]   ;;  %v2390_v0 = vld [vmem:[%s2622_s22 + $0xc4] ss:$16 sps:$4 sm:$0xff]  }
  0x1c   : > { %1494 = vperm.xlu0 %2320, %v1456_v55   ;;  %v1461_v63 = vld [vmem:[%s2655_s30 + $0x30] sm:$0xff]  ;;  %v2392_v1 = vld [vmem:[%s2622_s22 + $0xcc] ss:$16 sps:$4 sm:$0xff]   ;;  %v1463_v3 = vld [vmem:[%s2655_s30 + $0x40] sm:$0xff] }
  0x1d   : > { %2082 = vmatpush3.bf16.msra.mxu0 %v2344_v23  ;;  %v1462_v2 = vld [vmem:[%s2655_s30 + $0x38] sm:$0xff]  ;;  %v1464_v4 = vld [vmem:[%s2655_s30 + $0x48] sm:$0xff]  ;;  %v2394_v5 = vld [vmem:[%s2622_s22 + $0xc0] ss:$16 sps:$4 sm:$0xff]  }
  0x1e   : > { %2194 = vmatpush3.bf16.msra.mxu1 %v2345_v24  ;;  %2083 = vmatprep.subr.bf16.mxu0 %v2346_v25  ;;  %v1465_v6 = vld [vmem:[%s2655_s30 + $0x50] sm:$0xff]  ;;  %v2395_v7 = vld [vmem:[%s2622_s22 + $0xc8] ss:$16 sps:$4 sm:$0xff]   ;;  %v2398_v9 = vld [vmem:[%s2622_s22 + $0xec] ss:$16 sps:$4 sm:$0xff]  }
  0x1f   : > { %2195 = vmatprep.subr.bf16.mxu1 %v2347_v26  ;;  %1504 = vperm.xlu1 %2321, %v1458_v58   ;;  %v2396_v8 = vld [vmem:[%s2622_s22 + $0xe4] ss:$16 sps:$4 sm:$0xff]   ;;  %v1466_v10 = vld [vmem:[%s2655_s30 + $0x58] sm:$0xff]  ;;  %v1468_v12 = vld [vmem:[%s2655_s30 + $0x68] sm:$0xff] }
  0x20   : > { %1509 = vperm.xlu0 %2320, %v1459_v59   ;;  %v1467_v11 = vld [vmem:[%s2655_s30 + $0x60] sm:$0xff]  ;;  %v1469_v14 = vld [vmem:[%s2655_s30 + $0x70] sm:$0xff]  ;;  %v2401_v15 = vld [vmem:[%s2622_s22 + $0xe8] ss:$16 sps:$4 sm:$0xff]  }
  0x21   : > { %2084 = vmatpush3.bf16.msra.mxu0 %v2348_v27  ;;  %v2400_v13 = vld [vmem:[%s2622_s22 + $0xe0] ss:$16 sps:$4 sm:$0xff]   ;;  %v2402_v16 = vld [vmem:[%s2622_s22 + $0x104] ss:$16 sps:$4 sm:$0xff]   ;;  %v2404_v17 = vld [vmem:[%s2622_s22 + $0x10c] ss:$16 sps:$4 sm:$0xff]  }
  0x22   : > { %2196 = vmatpush3.bf16.msra.mxu1 %v2349_v28  ;;  %2085 = vmatprep.subr.bf16.mxu0 %v2350_v29  ;;  %v1470_v18 = vld [vmem:[%s2655_s30 + $0x78] sm:$0xff]  ;;  %v1471_v19 = vld [vmem:[%s2655_s30 + $0x80] sm:$0xff]  ;;  %v1472_v20 = vld [vmem:[%s2655_s30 + $0x88] sm:$0xff] }
  0x23   : > { %2197 = vmatprep.subr.bf16.mxu1 %v2351_v30  ;;  %1514 = vperm.xlu1 %2321, %v1460_v60   ;;  %v2406_v21 = vld [vmem:[%s2622_s22 + $0x100] ss:$16 sps:$4 sm:$0xff]   ;;  %v2407_v23 = vld [vmem:[%s2622_s22 + $0x108] ss:$16 sps:$4 sm:$0xff]   ;;  %v2408_v24 = vld [vmem:[%s2622_s22 + $0x124] ss:$16 sps:$4 sm:$0xff]  }
  0x24   : > { %1519 = vperm.xlu0 %2320, %v1461_v63   ;;  %v1473_v22 = vld [vmem:[%s2655_s30 + $0x90] sm:$0xff]  ;;  %v2410_v25 = vld [vmem:[%s2622_s22 + $0x12c] ss:$16 sps:$4 sm:$0xff]   ;;  %v1475_v27 = vld [vmem:[%s2655_s30 + $0xa0] sm:$0xff] }
  0x25   : > { %2086 = vmatpush3.bf16.msra.mxu0 %v2352_v31  ;;  %v1474_v26 = vld [vmem:[%s2655_s30 + $0x98] sm:$0xff]  ;;  %v1476_v28 = vld [vmem:[%s2655_s30 + $0xa8] sm:$0xff]  ;;  %v2412_v29 = vld [vmem:[%s2622_s22 + $0x120] ss:$16 sps:$4 sm:$0xff]  }
  0x26   : > { %2198 = vmatpush3.bf16.msra.mxu1 %v2353_v32  ;;  %v1477_v30 = vld [vmem:[%s2655_s30 + $0xb0] sm:$0xff]  ;;  %v2413_v31 = vld [vmem:[%s2622_s22 + $0x128] ss:$16 sps:$4 sm:$0xff]   ;;  %v2434_v54 = vld [vmem:[%s2622_s22 + $0x1ac] ss:$16 sps:$4 sm:$0xff]  }
  0x27   : > { %1524 = vperm.xlu1 %2321, %v1462_v2   ;;  %v2414_v32 = vld [vmem:[%s2622_s22 + $0x144] ss:$16 sps:$4 sm:$0xff]   ;;  %v1478_v34 = vld [vmem:[%s2655_s30 + $0xb8] sm:$0xff]  ;;  %v1480_v36 = vld [vmem:[%s2655_s30 + $0xc8] sm:$0xff] }
  0x28   : > { %1067 = vmatmul.mubr.bf16.vlgmr.msra.gmra.mrb[0].mxu0 %v2354_v33  ;;  %1529 = vperm.xlu0 %2320, %v1463_v3   ;;  %v2416_v33 = vld [vmem:[%s2622_s22 + $0x14c] ss:$16 sps:$4 sm:$0xff]   ;;  %v2430_v51 = vld [vmem:[%s2622_s22 + $0x180] ss:$16 sps:$4 sm:$0xff]   ;;  %v2443_v60 = vld [vmem:[%s2622_s22 + $0x1c8] ss:$16 sps:$4 sm:$0xff]  }
  0x29   : > { %1228 = vmatmul.mubr.bf16.vlgmr.msra.gmra.mrb[0].mxu1 %v2357_v35  ;;  %1074 = vmatprep.mubr.bf16.mxu0 %v2360_v37  ;;  %v1479_v35 = vld [vmem:[%s2655_s30 + $0xc0] sm:$0xff]  ;;  %v2440_v58 = vld [vmem:[%s2622_s22 + $0x1cc] ss:$16 sps:$4 sm:$0xff]  }
  0x2a   : > { %1235 = vmatprep.mubr.bf16.mxu1 %v2362_v38  ;;  %v2418_v37 = vld [vmem:[%s2622_s22 + $0x140] ss:$16 sps:$4 sm:$0xff]  }
  0x2b   : > { %1534 = vperm.xlu1 %2321, %v1464_v4   ;;  %v1481_v38 = vld [vmem:[%s2655_s30 + $0xd0] sm:$0xff] }
  0x2c   : > { %1539 = vperm.xlu0 %2320, %v1465_v6   ;;  %v2436_v55 = vld [vmem:[%s2622_s22 + $0x1a0] ss:$16 sps:$4 sm:$0xff]  }
  0x2d   : > { %v2442_v59 = vld [vmem:[%s2622_s22 + $0x1c0] ss:$16 sps:$4 sm:$0xff]  }
  0x2e   : > { %v2448_v63 = vld [vmem:[%s2622_s22 + $0x1e0] ss:$16 sps:$4 sm:$0xff]  }
  0x2f   : > { %1544 = vperm.xlu1 %2321, %v1466_v10  }
  0x30   : > { %1075 = vmatmul.mubr.bf16.gmra.mrb[4].mxu0 %v2364_v39  ;;  %1549 = vperm.xlu0 %2320, %v1467_v11   ;;  %v2419_v39 = vld [vmem:[%s2622_s22 + $0x148] ss:$16 sps:$4 sm:$0xff]  }
  0x31   : > { %1236 = vmatmul.mubr.bf16.gmra.mrb[4].mxu1 %v2365_v40  ;;  %1082 = vmatprep.mubr.bf16.mxu0 %v2366_v41  ;;  %v2420_v40 = vld [vmem:[%s2622_s22 + $0x164] ss:$16 sps:$4 sm:$0xff]   ;;  %v2422_v41 = vld [vmem:[%s2622_s22 + $0x16c] ss:$16 sps:$4 sm:$0xff]  }
  0x32   : > { %1243 = vmatprep.mubr.bf16.mxu1 %v2368_v42  ;;  %v1482_v42 = vld [vmem:[%s2655_s30 + $0xd8] sm:$0xff] }
  0x33   : > { %1554 = vperm.xlu1 %2321, %v1468_v12  }
  0x34   : > { %1559 = vperm.xlu0 %2320, %v1469_v14  }
  0x37   : > { %1564 = vperm.xlu1 %2321, %v1470_v18  }
  0x38   : > { %1083 = vmatmul.mubr.bf16.gmra.mrb[8].mxu0 %v2370_v43  ;;  %1569 = vperm.xlu0 %2320, %v1471_v19   ;;  %v1483_v43 = vld [vmem:[%s2655_s30 + $0xe0] sm:$0xff] }
  0x39   : > { %1244 = vmatmul.mubr.bf16.gmra.mrb[8].mxu1 %v2371_v44  ;;  %1090 = vmatprep.mubr.bf16.mxu0 %v2372_v45  ;;  %v1484_v44 = vld [vmem:[%s2655_s30 + $0xe8] sm:$0xff]  ;;  %v2424_v45 = vld [vmem:[%s2622_s22 + $0x160] ss:$16 sps:$4 sm:$0xff]  }
  0x3a   : > { %1251 = vmatprep.mubr.bf16.mxu1 %v2374_v46  ;;  %v1485_v46 = vld [vmem:[%s2655_s30 + $0xf0] sm:$0xff]  ;;  %v2745_v19 = vld [vmem:[%s2859_s2] ss:$0 sm:$0xff] }
  0x3b   : > { %1574 = vperm.xlu1 %2321, %v1472_v20  }
  0x3c   : > { %1579 = vperm.xlu0 %2320, %v1473_v22  }
  0x3f   : > { %1584 = vperm.xlu1 %2321, %v1474_v26  }
  0x40   : > { %1091 = vmatmul.mubr.bf16.gmra.mrb[12].mxu0 %v2376_v47  ;;  %1589 = vperm.xlu0 %2320, %v1475_v27   ;;  %v2425_v47 = vld [vmem:[%s2622_s22 + $0x168] ss:$16 sps:$4 sm:$0xff]  }
  0x41   : > { %1252 = vmatmul.mubr.bf16.gmra.mrb[12].mxu1 %v2377_v48  ;;  %1098 = vmatprep.mubr.bf16.mxu0 %v2378_v49  ;;  %v2426_v48 = vld [vmem:[%s2622_s22 + $0x184] ss:$16 sps:$4 sm:$0xff]   ;;  %v2428_v49 = vld [vmem:[%s2622_s22 + $0x18c] ss:$16 sps:$4 sm:$0xff]  }
  0x42   : > { %1259 = vmatprep.mubr.bf16.mxu1 %v2380_v50  ;;  %v1486_v50 = vld [vmem:[%s2655_s30 + $0xf8] sm:$0xff] }
  0x43   : > { %1594 = vperm.xlu1 %2321, %v1476_v28  }
  0x44   : > { %1599 = vperm.xlu0 %2320, %v1477_v30  }
  0x47   : > { %1604 = vperm.xlu1 %2321, %v1478_v34  }
  0x48   : > { %1099 = vmatmul.mubr.bf16.gmra.mrb[16].mxu0 %v2382_v52  ;;  %1609 = vperm.xlu0 %2320, %v1479_v35   ;;  %v2431_v52 = vld [vmem:[%s2622_s22 + $0x188] ss:$16 sps:$4 sm:$0xff]  }
  0x49   : > { %1260 = vmatmul.mubr.bf16.gmra.mrb[16].mxu1 %v2383_v53  ;;  %1106 = vmatprep.mubr.bf16.mxu0 %v2384_v56  ;;  %v2432_v53 = vld [vmem:[%s2622_s22 + $0x1a4] ss:$16 sps:$4 sm:$0xff]   ;;  %v2437_v56 = vld [vmem:[%s2622_s22 + $0x1a8] ss:$16 sps:$4 sm:$0xff]  }
  0x4a   : > { %1267 = vmatprep.mubr.bf16.mxu1 %v2386_v57  ;;  %v2438_v57 = vld [vmem:[%s2622_s22 + $0x1c4] ss:$16 sps:$4 sm:$0xff]  }
  0x4b   : > { %1614 = vperm.xlu1 %2321, %v1480_v36  }
  0x4c   : > { %1619 = vperm.xlu0 %2320, %v1481_v38  }
  0x4f   : > { %1624 = vperm.xlu1 %2321, %v1482_v42  }
  0x50   : > { %1107 = vmatmul.mubr.bf16.gmra.mrb[20].mxu0 %v2388_v61  ;;  %1629 = vperm.xlu0 %2320, %v1483_v43   ;;  %v2444_v61 = vld [vmem:[%s2622_s22 + $0x1e4] ss:$16 sps:$4 sm:$0xff]  }
  0x51   : > { %1268 = vmatmul.mubr.bf16.gmra.mrb[20].mxu1 %v2389_v62  ;;  %1114 = vmatprep.mubr.bf16.mxu0 %v2390_v0  ;;  %v2446_v62 = vld [vmem:[%s2622_s22 + $0x1ec] ss:$16 sps:$4 sm:$0xff]   ;;  %v2449_v0 = vld [vmem:[%s2622_s22 + $0x1e8] ss:$16 sps:$4 sm:$0xff]  }
  0x52   : > { %1275 = vmatprep.mubr.bf16.mxu1 %v2392_v1 }
  0x53   : > { %1634 = vperm.xlu1 %2321, %v1484_v44  }
  0x54   : > { %1639 = vperm.xlu0 %2320, %v1485_v46   ;;  %v1682_v46 = vld [vmem:[%s2739_s7 + $0x18] sm:$0xff] }
  0x57   : > { %1644 = vperm.xlu1 %2321, %v1486_v50  }
  0x58   : > { %1115 = vmatmul.mubr.bf16.gmra.mrb[24].mxu0 %v2394_v5 }
  0x59   : > { %1276 = vmatmul.mubr.bf16.gmra.mrb[24].mxu1 %v2395_v7  ;;  %1122 = vmatprep.mubr.bf16.mxu0 %v2396_v8 }
  0x5a   : > { %1283 = vmatprep.mubr.bf16.mxu1 %v2398_v9 }
  0x60   : > { %1123 = vmatmul.mubr.bf16.gmra.mrb[28].mxu0 %v2400_v13 }
  0x61   : > { %1284 = vmatmul.mubr.bf16.gmra.mrb[28].mxu1 %v2401_v15  ;;  %1130 = vmatprep.mubr.bf16.mxu0 %v2402_v16  ;;  %v1679_v15 = vld [vmem:[%s2739_s7] sm:$0xff] }
  0x62   : > { %1291 = vmatprep.mubr.bf16.mxu1 %v2404_v17 }
  0x68   : > { %1131 = vmatmul.mubr.bf16.gmra.mrb[32].mxu0 %v2406_v21  ;;  %v1680_v21 = vld [vmem:[%s2739_s7 + $0x8] sm:$0xff] }
  0x69   : > { %1292 = vmatmul.mubr.bf16.gmra.mrb[32].mxu1 %v2407_v23  ;;  %1138 = vmatprep.mubr.bf16.mxu0 %v2408_v24 }
  0x6a   : > { %1299 = vmatprep.mubr.bf16.mxu1 %v2410_v25 }
  0x70   : > { %1139 = vmatmul.mubr.bf16.gmra.mrb[36].mxu0 %v2412_v29 }
  0x71   : > { %1300 = vmatmul.mubr.bf16.gmra.mrb[36].mxu1 %v2413_v31  ;;  %1146 = vmatprep.mubr.bf16.mxu0 %v2414_v32 }
  0x72   : > { %1307 = vmatprep.mubr.bf16.mxu1 %v2416_v33 }
  0x78   : > { %1147 = vmatmul.mubr.bf16.gmra.mrb[40].mxu0 %v2418_v37 }
  0x79   : > { %1308 = vmatmul.mubr.bf16.gmra.mrb[40].mxu1 %v2419_v39  ;;  %1154 = vmatprep.mubr.bf16.mxu0 %v2420_v40 }
  0x7a   : > { %1315 = vmatprep.mubr.bf16.mxu1 %v2422_v41  ;;  %v1681_v41 = vld [vmem:[%s2739_s7 + $0x10] sm:$0xff] }
  0x80   : > { %1155 = vmatmul.mubr.bf16.gmra.mrb[44].mxu0 %v2424_v45 }
  0x81   : > { %1316 = vmatmul.mubr.bf16.gmra.mrb[44].mxu1 %v2425_v47  ;;  %1162 = vmatprep.mubr.bf16.mxu0 %v2426_v48 }
  0x82   : > { %1323 = vmatprep.mubr.bf16.mxu1 %v2428_v49 }
  0x88   : > { %1163 = vmatmul.mubr.bf16.gmra.mrb[48].mxu0 %v2430_v51 }
  0x89   : > { %1324 = vmatmul.mubr.bf16.gmra.mrb[48].mxu1 %v2431_v52  ;;  %1170 = vmatprep.mubr.bf16.mxu0 %v2432_v53 }
  0x8a   : > { %1331 = vmatprep.mubr.bf16.mxu1 %v2434_v54 }
  0x90   : > { %1171 = vmatmul.mubr.bf16.gmra.mrb[52].mxu0 %v2436_v55 }
  0x91   : > { %1332 = vmatmul.mubr.bf16.gmra.mrb[52].mxu1 %v2437_v56  ;;  %1178 = vmatprep.mubr.bf16.mxu0 %v2438_v57 }
  0x92   : > { %1339 = vmatprep.mubr.bf16.mxu1 %v2440_v58 }
  0x93   : > { %v1490_v2 = vpop.permute.xlu0 %1489 }
  0x98   : > { %1179 = vmatmul.mubr.bf16.gmra.mrb[56].mxu0 %v2442_v59 }
  0x99   : > { %1340 = vmatmul.mubr.bf16.gmra.mrb[56].mxu1 %v2443_v60  ;;  %1186 = vmatprep.mubr.bf16.mxu0 %v2444_v61 }
  0x9a   : > { %1347 = vmatprep.mubr.bf16.mxu1 %v2446_v62  ;;  %v1500_v20 = vpop.permute.xlu1 %1499 }
  0x9b   : > { %v1495_v16 = vpop.permute.xlu0 %1494 }
  0x9e   : > { %v1505_v45 = vpop.permute.xlu1 %1504 }
  0xa0   : > { %1187 = vmatmul.mubr.bf16.gmra.mrb[60].mxu0 %v2448_v63 }
  0xa1   : > { %1348 = vmatmul.mubr.bf16.gmra.mrb[60].mxu1 %v2449_v0 }
  0xfb   : > { %v2087_v1 = vpop.f32.mrb[0].mxu0 }
  0xfc   : > { %v2199_v3 = vpop.f32.mrb[0].mxu1  ;;  %v2088_v4 = vpop.f32.mrb[1].mxu0 }
  0xfd   : > { %v2089_v5 = vadd.f32 %v2088_v4, %v2087_v1  ;;  %v2200_v6 = vpop.f32.mrb[1].mxu1  ;;  %v2090_v7 = vpop.f32.mrb[2].mxu0 }
  0xfe   : > { %v2201_v8 = vadd.f32 %v2200_v6, %v2199_v3  ;;  %v2202_v9 = vpop.f32.mrb[2].mxu1  ;;  %v2091_v10 = vpop.f32.mrb[3].mxu0  ;;  %v1683_v3 = vld [vmem:[%s2739_s7 + $0x20] sm:$0xff] }
  0xff   : > { %v2092_v11 = vadd.f32 %v2091_v10, %v2090_v7  ;;  %v2203_v12 = vpop.f32.mrb[3].mxu1  ;;  %v1515_v7 = vpop.permute.xlu1 %1514 }
 0x100   : > { %v1230_v13 = vadd.f32 %v2201_v8, %v2089_v5  ;;  %v2204_v14 = vadd.f32 %v2203_v12, %v2202_v9  ;;  %v1684_v8 = vld [vmem:[%s2739_s7 + $0x28] sm:$0xff] }
 0x102   : > { %v1647_v17 = vmul.f32 %v1490_v2, %v1230_v13  ;;  %v1233_v18 = vadd.f32 %v2204_v14, %v2092_v11  ;;  %v1510_v2 = vpop.permute.xlu0 %1509 }
 0x103   : > { %v2093_v22 = vpop.f32.mrb[4].mxu0 }
 0x104   : > { %v1711_v23 = vadd.f32 %v1679_v15, %v1647_v17  ;;  %v1648_v24 = vmul.f32 %v1495_v16, %v1233_v18  ;;  %v2205_v25 = vpop.f32.mrb[4].mxu1  ;;  %v2094_v26 = vpop.f32.mrb[5].mxu0 }
 0x105   : > { %v2095_v27 = vadd.f32 %v2094_v26, %v2093_v22  ;;  %v2206_v28 = vpop.f32.mrb[5].mxu1  ;;  %v2096_v29 = vpop.f32.mrb[6].mxu0 }
 0x106   : > { %v1750_v30 = vadd.f32 %v2745_v19, %v1711_v23  ;;  %v1712_v31 = vadd.f32 %v1680_v21, %v1648_v24  ;;  %v2207_v32 = vadd.f32 %v2206_v28, %v2205_v25  ;;  %v2208_v33 = vpop.f32.mrb[6].mxu1  ;;  %v2097_v34 = vpop.f32.mrb[7].mxu0 }
 0x107   : > { %v2098_v35 = vadd.f32 %v2097_v34, %v2096_v29  ;;  %v2209_v36 = vpop.f32.mrb[7].mxu1  ;;  %v1520_v29 = vpop.permute.xlu0 %1519 }
 0x108   : > { %v1782_v37 = vmax.f32 %v1750_v30, 0.0  ;;  %v1751_v38 = vadd.f32 %v2745_v19, %v1712_v31  ;;  %v1238_v39 = vadd.f32 %v2207_v32, %v2095_v27  ;;  %v2210_v40 = vadd.f32 %v2209_v36, %v2208_v33  ;;  %v1685_v30 = vld [vmem:[%s2739_s7 + $0x30] sm:$0xff]  ;;  %v1525_v34 = vpop.permute.xlu1 %1524 }
 0x10a   : > { %1814 = vst [vmem:[%s2753_s13] sm:$0xff] %v1782_v37  ;;  %v1783_v42 = vmax.f32 %v1751_v38, 0.0  ;;  %v1649_v43 = vmul.f32 %v1500_v20, %v1238_v39  ;;  %v1241_v44 = vadd.f32 %v2210_v40, %v2098_v35  ;;  %v1686_v35 = vld [vmem:[%s2739_s7 + $0x38] sm:$0xff] }
 0x10b   : > { %v2099_v47 = vpop.f32.mrb[8].mxu0 }
 0x10c   : > { %1815 = vst [vmem:[%s2753_s13 + $0x8] sm:$0xff] %v1783_v42  ;;  %v1713_v48 = vadd.f32 %v1681_v41, %v1649_v43  ;;  %v1650_v49 = vmul.f32 %v1505_v45, %v1241_v44  ;;  %v2211_v50 = vpop.f32.mrb[8].mxu1  ;;  %v2100_v51 = vpop.f32.mrb[9].mxu0 }
 0x10d   : > { %v2101_v52 = vadd.f32 %v2100_v51, %v2099_v47  ;;  %v2212_v53 = vpop.f32.mrb[9].mxu1  ;;  %v2102_v54 = vpop.f32.mrb[10].mxu0 }
 0x10e   : > { %v1752_v55 = vadd.f32 %v2745_v19, %v1713_v48  ;;  %v1714_v56 = vadd.f32 %v1682_v46, %v1650_v49  ;;  %v2213_v57 = vadd.f32 %v2212_v53, %v2211_v50  ;;  %v2214_v58 = vpop.f32.mrb[10].mxu1  ;;  %v2103_v59 = vpop.f32.mrb[11].mxu0 }
 0x10f   : > { %v2104_v60 = vadd.f32 %v2103_v59, %v2102_v54  ;;  %v2215_v61 = vpop.f32.mrb[11].mxu1 }
 0x110   : > { %v1784_v62 = vmax.f32 %v1752_v55, 0.0  ;;  %v1753_v63 = vadd.f32 %v2745_v19, %v1714_v56  ;;  %v1246_v0 = vadd.f32 %v2213_v57, %v2101_v52  ;;  %v2216_v1 = vadd.f32 %v2215_v61, %v2214_v58  ;;  %v1530_v55 = vpop.permute.xlu0 %1529  ;;  %v1687_v56 = vld [vmem:[%s2739_s7 + $0x40] sm:$0xff]  ;;  %v1688_v61 = vld [vmem:[%s2739_s7 + $0x48] sm:$0xff] }
 0x112   : > { %1816 = vst [vmem:[%s2753_s13 + $0x10] sm:$0xff] %v1784_v62  ;;  %v1785_v4 = vmax.f32 %v1753_v63, 0.0  ;;  %v1651_v5 = vmul.f32 %v1510_v2, %v1246_v0  ;;  %v1249_v6 = vadd.f32 %v2216_v1, %v2104_v60  ;;  %v1535_v60 = vpop.permute.xlu1 %1534 }
 0x113   : > { %v2105_v9 = vpop.f32.mrb[12].mxu0 }
 0x114   : > { %1817 = vst [vmem:[%s2753_s13 + $0x18] sm:$0xff] %v1785_v4  ;;  %v1715_v10 = vadd.f32 %v1683_v3, %v1651_v5  ;;  %v1652_v11 = vmul.f32 %v1515_v7, %v1249_v6  ;;  %v2217_v12 = vpop.f32.mrb[12].mxu1  ;;  %v2106_v13 = vpop.f32.mrb[13].mxu0 }
 0x115   : > { %v2107_v14 = vadd.f32 %v2106_v13, %v2105_v9  ;;  %v2218_v15 = vpop.f32.mrb[13].mxu1  ;;  %v2108_v16 = vpop.f32.mrb[14].mxu0 }
 0x116   : > { %v1754_v17 = vadd.f32 %v2745_v19, %v1715_v10  ;;  %v1716_v18 = vadd.f32 %v1684_v8, %v1652_v11  ;;  %v2219_v20 = vadd.f32 %v2218_v15, %v2217_v12  ;;  %v2220_v21 = vpop.f32.mrb[14].mxu1  ;;  %v2109_v22 = vpop.f32.mrb[15].mxu0 }
 0x117   : > { %v2110_v23 = vadd.f32 %v2109_v22, %v2108_v16  ;;  %v2221_v24 = vpop.f32.mrb[15].mxu1 }
 0x118   : > { %v1786_v25 = vmax.f32 %v1754_v17, 0.0  ;;  %v1755_v26 = vadd.f32 %v2745_v19, %v1716_v18  ;;  %v1254_v27 = vadd.f32 %v2219_v20, %v2107_v14  ;;  %v2222_v28 = vadd.f32 %v2221_v24, %v2220_v21  ;;  %v1540_v17 = vpop.permute.xlu0 %1539  ;;  %v1689_v18 = vld [vmem:[%s2739_s7 + $0x50] sm:$0xff]  ;;  %v1690_v24 = vld [vmem:[%s2739_s7 + $0x58] sm:$0xff] }
 0x11a   : > { %1818 = vst [vmem:[%s2753_s13 + $0x20] sm:$0xff] %v1786_v25  ;;  %v1787_v31 = vmax.f32 %v1755_v26, 0.0  ;;  %v1653_v32 = vmul.f32 %v1520_v29, %v1254_v27  ;;  %v1257_v33 = vadd.f32 %v2222_v28, %v2110_v23  ;;  %v1545_v23 = vpop.permute.xlu1 %1544 }
 0x11b   : > { %v2111_v36 = vpop.f32.mrb[16].mxu0 }
 0x11c   : > { %1819 = vst [vmem:[%s2753_s13 + $0x28] sm:$0xff] %v1787_v31  ;;  %v1717_v37 = vadd.f32 %v1685_v30, %v1653_v32  ;;  %v1654_v38 = vmul.f32 %v1525_v34, %v1257_v33  ;;  %v2223_v39 = vpop.f32.mrb[16].mxu1  ;;  %v2112_v40 = vpop.f32.mrb[17].mxu0 }
 0x11d   : > { %v2113_v41 = vadd.f32 %v2112_v40, %v2111_v36  ;;  %v2224_v42 = vpop.f32.mrb[17].mxu1  ;;  %v2114_v43 = vpop.f32.mrb[18].mxu0 }
 0x11e   : > { %v1756_v44 = vadd.f32 %v2745_v19, %v1717_v37  ;;  %v1718_v45 = vadd.f32 %v1686_v35, %v1654_v38  ;;  %v2225_v46 = vadd.f32 %v2224_v42, %v2223_v39  ;;  %v2226_v47 = vpop.f32.mrb[18].mxu1  ;;  %v2115_v48 = vpop.f32.mrb[19].mxu0 }
 0x11f   : > { %v2116_v49 = vadd.f32 %v2115_v48, %v2114_v43  ;;  %v2227_v50 = vpop.f32.mrb[19].mxu1 }
 0x120   : > { %v1788_v51 = vmax.f32 %v1756_v44, 0.0  ;;  %v1757_v52 = vadd.f32 %v2745_v19, %v1718_v45  ;;  %v1262_v53 = vadd.f32 %v2225_v46, %v2113_v41  ;;  %v2228_v54 = vadd.f32 %v2227_v50, %v2226_v47  ;;  %v1550_v44 = vpop.permute.xlu0 %1549  ;;  %v1691_v45 = vld [vmem:[%s2739_s7 + $0x60] sm:$0xff]  ;;  %v1692_v50 = vld [vmem:[%s2739_s7 + $0x68] sm:$0xff] }
 0x122   : > { %1820 = vst [vmem:[%s2753_s13 + $0x30] sm:$0xff] %v1788_v51  ;;  %v1789_v57 = vmax.f32 %v1757_v52, 0.0  ;;  %v1655_v58 = vmul.f32 %v1530_v55, %v1262_v53  ;;  %v1265_v59 = vadd.f32 %v2228_v54, %v2116_v49  ;;  %v1555_v49 = vpop.permute.xlu1 %1554 }
 0x123   : > { %v2117_v62 = vpop.f32.mrb[20].mxu0 }
 0x124   : > { %1821 = vst [vmem:[%s2753_s13 + $0x38] sm:$0xff] %v1789_v57  ;;  %v1719_v63 = vadd.f32 %v1687_v56, %v1655_v58  ;;  %v1656_v0 = vmul.f32 %v1535_v60, %v1265_v59  ;;  %v2229_v1 = vpop.f32.mrb[20].mxu1  ;;  %v2118_v2 = vpop.f32.mrb[21].mxu0 }
 0x125   : > { %v2119_v3 = vadd.f32 %v2118_v2, %v2117_v62  ;;  %v2230_v4 = vpop.f32.mrb[21].mxu1  ;;  %v2120_v5 = vpop.f32.mrb[22].mxu0 }
 0x126   : > { %v1758_v6 = vadd.f32 %v2745_v19, %v1719_v63  ;;  %v1720_v7 = vadd.f32 %v1688_v61, %v1656_v0  ;;  %v2231_v8 = vadd.f32 %v2230_v4, %v2229_v1  ;;  %v2232_v9 = vpop.f32.mrb[22].mxu1  ;;  %v2121_v10 = vpop.f32.mrb[23].mxu0 }
 0x127   : > { %v2122_v11 = vadd.f32 %v2121_v10, %v2120_v5  ;;  %v2233_v12 = vpop.f32.mrb[23].mxu1 }
 0x128   : > { %v1790_v13 = vmax.f32 %v1758_v6, 0.0  ;;  %v1759_v14 = vadd.f32 %v2745_v19, %v1720_v7  ;;  %v1270_v15 = vadd.f32 %v2231_v8, %v2119_v3  ;;  %v2234_v16 = vadd.f32 %v2233_v12, %v2232_v9  ;;  %v1560_v6 = vpop.permute.xlu0 %1559  ;;  %v1693_v7 = vld [vmem:[%s2739_s7 + $0x70] sm:$0xff]  ;;  %v1694_v12 = vld [vmem:[%s2739_s7 + $0x78] sm:$0xff] }
 0x12a   : > { %1822 = vst [vmem:[%s2753_s13 + $0x40] sm:$0xff] %v1790_v13  ;;  %v1791_v20 = vmax.f32 %v1759_v14, 0.0  ;;  %v1657_v21 = vmul.f32 %v1540_v17, %v1270_v15  ;;  %v1273_v22 = vadd.f32 %v2234_v16, %v2122_v11  ;;  %v1565_v11 = vpop.permute.xlu1 %1564 }
 0x12b   : > { %v2123_v25 = vpop.f32.mrb[24].mxu0 }
 0x12c   : > { %1823 = vst [vmem:[%s2753_s13 + $0x48] sm:$0xff] %v1791_v20  ;;  %v1721_v26 = vadd.f32 %v1689_v18, %v1657_v21  ;;  %v1658_v27 = vmul.f32 %v1545_v23, %v1273_v22  ;;  %v2235_v28 = vpop.f32.mrb[24].mxu1  ;;  %v2124_v29 = vpop.f32.mrb[25].mxu0 }
 0x12d   : > { %v2125_v30 = vadd.f32 %v2124_v29, %v2123_v25  ;;  %v2236_v31 = vpop.f32.mrb[25].mxu1  ;;  %v2126_v32 = vpop.f32.mrb[26].mxu0 }
 0x12e   : > { %v1760_v33 = vadd.f32 %v2745_v19, %v1721_v26  ;;  %v1722_v34 = vadd.f32 %v1690_v24, %v1658_v27  ;;  %v2237_v35 = vadd.f32 %v2236_v31, %v2235_v28  ;;  %v2238_v36 = vpop.f32.mrb[26].mxu1  ;;  %v2127_v37 = vpop.f32.mrb[27].mxu0 }
 0x12f   : > { %v2128_v38 = vadd.f32 %v2127_v37, %v2126_v32  ;;  %v2239_v39 = vpop.f32.mrb[27].mxu1 }
 0x130   : > { %v1792_v40 = vmax.f32 %v1760_v33, 0.0  ;;  %v1761_v41 = vadd.f32 %v2745_v19, %v1722_v34  ;;  %v1278_v42 = vadd.f32 %v2237_v35, %v2125_v30  ;;  %v2240_v43 = vadd.f32 %v2239_v39, %v2238_v36  ;;  %v1570_v33 = vpop.permute.xlu0 %1569  ;;  %v1695_v34 = vld [vmem:[%s2739_s7 + $0x80] sm:$0xff]  ;;  %v1696_v39 = vld [vmem:[%s2739_s7 + $0x88] sm:$0xff] }
 0x132   : > { %1824 = vst [vmem:[%s2753_s13 + $0x50] sm:$0xff] %v1792_v40  ;;  %v1793_v46 = vmax.f32 %v1761_v41, 0.0  ;;  %v1659_v47 = vmul.f32 %v1550_v44, %v1278_v42  ;;  %v1281_v48 = vadd.f32 %v2240_v43, %v2128_v38  ;;  %v1575_v38 = vpop.permute.xlu1 %1574 }
 0x133   : > { %v2129_v51 = vpop.f32.mrb[28].mxu0 }
 0x134   : > { %1825 = vst [vmem:[%s2753_s13 + $0x58] sm:$0xff] %v1793_v46  ;;  %v1723_v52 = vadd.f32 %v1691_v45, %v1659_v47  ;;  %v1660_v53 = vmul.f32 %v1555_v49, %v1281_v48  ;;  %v2241_v54 = vpop.f32.mrb[28].mxu1  ;;  %v2130_v55 = vpop.f32.mrb[29].mxu0 }
 0x135   : > { %v2131_v56 = vadd.f32 %v2130_v55, %v2129_v51  ;;  %v2242_v57 = vpop.f32.mrb[29].mxu1  ;;  %v2132_v58 = vpop.f32.mrb[30].mxu0 }
 0x136   : > { %v1762_v59 = vadd.f32 %v2745_v19, %v1723_v52  ;;  %v1724_v60 = vadd.f32 %v1692_v50, %v1660_v53  ;;  %v2243_v61 = vadd.f32 %v2242_v57, %v2241_v54  ;;  %v2244_v62 = vpop.f32.mrb[30].mxu1  ;;  %v2133_v63 = vpop.f32.mrb[31].mxu0 }
 0x137   : > { %v2134_v0 = vadd.f32 %v2133_v63, %v2132_v58  ;;  %v2245_v1 = vpop.f32.mrb[31].mxu1 }
 0x138   : > { %v1794_v2 = vmax.f32 %v1762_v59, 0.0  ;;  %v1763_v3 = vadd.f32 %v2745_v19, %v1724_v60  ;;  %v1286_v4 = vadd.f32 %v2243_v61, %v2131_v56  ;;  %v2246_v5 = vadd.f32 %v2245_v1, %v2244_v62  ;;  %v1580_v59 = vpop.permute.xlu0 %1579  ;;  %v1697_v60 = vld [vmem:[%s2739_s7 + $0x90] sm:$0xff]  ;;  %v1698_v1 = vld [vmem:[%s2739_s7 + $0x98] sm:$0xff] }
 0x13a   : > { %1826 = vst [vmem:[%s2753_s13 + $0x60] sm:$0xff] %v1794_v2  ;;  %v1795_v8 = vmax.f32 %v1763_v3, 0.0  ;;  %v1661_v9 = vmul.f32 %v1560_v6, %v1286_v4  ;;  %v1289_v10 = vadd.f32 %v2246_v5, %v2134_v0  ;;  %v1585_v0 = vpop.permute.xlu1 %1584 }
 0x13b   : > { %v2135_v13 = vpop.f32.mrb[32].mxu0 }
 0x13c   : > { %1827 = vst [vmem:[%s2753_s13 + $0x68] sm:$0xff] %v1795_v8  ;;  %v1725_v14 = vadd.f32 %v1693_v7, %v1661_v9  ;;  %v1662_v15 = vmul.f32 %v1565_v11, %v1289_v10  ;;  %v2247_v16 = vpop.f32.mrb[32].mxu1  ;;  %v2136_v17 = vpop.f32.mrb[33].mxu0 }
 0x13d   : > { %v2137_v18 = vadd.f32 %v2136_v17, %v2135_v13  ;;  %v2248_v20 = vpop.f32.mrb[33].mxu1  ;;  %v2138_v21 = vpop.f32.mrb[34].mxu0 }
 0x13e   : > { %v1764_v22 = vadd.f32 %v2745_v19, %v1725_v14  ;;  %v1726_v23 = vadd.f32 %v1694_v12, %v1662_v15  ;;  %v2249_v24 = vadd.f32 %v2248_v20, %v2247_v16  ;;  %v2250_v25 = vpop.f32.mrb[34].mxu1  ;;  %v2139_v26 = vpop.f32.mrb[35].mxu0 }
 0x13f   : > { %v2140_v27 = vadd.f32 %v2139_v26, %v2138_v21  ;;  %v2251_v28 = vpop.f32.mrb[35].mxu1 }
 0x140   : > { %v1796_v29 = vmax.f32 %v1764_v22, 0.0  ;;  %v1765_v30 = vadd.f32 %v2745_v19, %v1726_v23  ;;  %v1294_v31 = vadd.f32 %v2249_v24, %v2137_v18  ;;  %v2252_v32 = vadd.f32 %v2251_v28, %v2250_v25  ;;  %v1590_v22 = vpop.permute.xlu0 %1589  ;;  %v1699_v23 = vld [vmem:[%s2739_s7 + $0xa0] sm:$0xff]  ;;  %v1700_v28 = vld [vmem:[%s2739_s7 + $0xa8] sm:$0xff] }
 0x142   : > { %1828 = vst [vmem:[%s2753_s13 + $0x70] sm:$0xff] %v1796_v29  ;;  %v1797_v35 = vmax.f32 %v1765_v30, 0.0  ;;  %v1663_v36 = vmul.f32 %v1570_v33, %v1294_v31  ;;  %v1297_v37 = vadd.f32 %v2252_v32, %v2140_v27  ;;  %v1595_v27 = vpop.permute.xlu1 %1594 }
 0x143   : > { %v2141_v40 = vpop.f32.mrb[36].mxu0 }
 0x144   : > { %1829 = vst [vmem:[%s2753_s13 + $0x78] sm:$0xff] %v1797_v35  ;;  %v1727_v41 = vadd.f32 %v1695_v34, %v1663_v36  ;;  %v1664_v42 = vmul.f32 %v1575_v38, %v1297_v37  ;;  %v2253_v43 = vpop.f32.mrb[36].mxu1  ;;  %v2142_v44 = vpop.f32.mrb[37].mxu0 }
 0x145   : > { %v2143_v45 = vadd.f32 %v2142_v44, %v2141_v40  ;;  %v2254_v46 = vpop.f32.mrb[37].mxu1  ;;  %v2144_v47 = vpop.f32.mrb[38].mxu0 }
 0x146   : > { %v1766_v48 = vadd.f32 %v2745_v19, %v1727_v41  ;;  %v1728_v49 = vadd.f32 %v1696_v39, %v1664_v42  ;;  %v2255_v50 = vadd.f32 %v2254_v46, %v2253_v43  ;;  %v2256_v51 = vpop.f32.mrb[38].mxu1  ;;  %v2145_v52 = vpop.f32.mrb[39].mxu0 }
 0x147   : > { %v2146_v53 = vadd.f32 %v2145_v52, %v2144_v47  ;;  %v2257_v54 = vpop.f32.mrb[39].mxu1 }
 0x148   : > { %v1798_v55 = vmax.f32 %v1766_v48, 0.0  ;;  %v1767_v56 = vadd.f32 %v2745_v19, %v1728_v49  ;;  %v1302_v57 = vadd.f32 %v2255_v50, %v2143_v45  ;;  %v2258_v58 = vadd.f32 %v2257_v54, %v2256_v51  ;;  %v1600_v48 = vpop.permute.xlu0 %1599  ;;  %v1701_v49 = vld [vmem:[%s2739_s7 + $0xb0] sm:$0xff]  ;;  %v1702_v54 = vld [vmem:[%s2739_s7 + $0xb8] sm:$0xff] }
 0x14a   : > { %1830 = vst [vmem:[%s2753_s13 + $0x80] sm:$0xff] %v1798_v55  ;;  %v1799_v61 = vmax.f32 %v1767_v56, 0.0  ;;  %v1665_v62 = vmul.f32 %v1580_v59, %v1302_v57  ;;  %v1305_v63 = vadd.f32 %v2258_v58, %v2146_v53  ;;  %v1605_v53 = vpop.permute.xlu1 %1604 }
 0x14b   : > { %v2147_v2 = vpop.f32.mrb[40].mxu0 }
 0x14c   : > { %1831 = vst [vmem:[%s2753_s13 + $0x88] sm:$0xff] %v1799_v61  ;;  %v1729_v3 = vadd.f32 %v1697_v60, %v1665_v62  ;;  %v1666_v4 = vmul.f32 %v1585_v0, %v1305_v63  ;;  %v2259_v5 = vpop.f32.mrb[40].mxu1  ;;  %v2148_v6 = vpop.f32.mrb[41].mxu0 }
 0x14d   : > { %v2149_v7 = vadd.f32 %v2148_v6, %v2147_v2  ;;  %v2260_v8 = vpop.f32.mrb[41].mxu1  ;;  %v2150_v9 = vpop.f32.mrb[42].mxu0 }
 0x14e   : > { %v1768_v10 = vadd.f32 %v2745_v19, %v1729_v3  ;;  %v1730_v11 = vadd.f32 %v1698_v1, %v1666_v4  ;;  %v2261_v12 = vadd.f32 %v2260_v8, %v2259_v5  ;;  %v2262_v13 = vpop.f32.mrb[42].mxu1  ;;  %v2151_v14 = vpop.f32.mrb[43].mxu0 }
 0x14f   : > { %v2152_v15 = vadd.f32 %v2151_v14, %v2150_v9  ;;  %v2263_v16 = vpop.f32.mrb[43].mxu1 }
 0x150   : > { %v1800_v17 = vmax.f32 %v1768_v10, 0.0  ;;  %v1769_v18 = vadd.f32 %v2745_v19, %v1730_v11  ;;  %v1310_v20 = vadd.f32 %v2261_v12, %v2149_v7  ;;  %v2264_v21 = vadd.f32 %v2263_v16, %v2262_v13  ;;  %v1610_v10 = vpop.permute.xlu0 %1609  ;;  %v1703_v11 = vld [vmem:[%s2739_s7 + $0xc0] sm:$0xff]  ;;  %v1704_v16 = vld [vmem:[%s2739_s7 + $0xc8] sm:$0xff] }
 0x152   : > { %1832 = vst [vmem:[%s2753_s13 + $0x90] sm:$0xff] %v1800_v17  ;;  %v1801_v24 = vmax.f32 %v1769_v18, 0.0  ;;  %v1667_v25 = vmul.f32 %v1590_v22, %v1310_v20  ;;  %v1313_v26 = vadd.f32 %v2264_v21, %v2152_v15  ;;  %v1615_v15 = vpop.permute.xlu1 %1614 }
 0x153   : > { %v2153_v29 = vpop.f32.mrb[44].mxu0 }
 0x154   : > { %1833 = vst [vmem:[%s2753_s13 + $0x98] sm:$0xff] %v1801_v24  ;;  %v1731_v30 = vadd.f32 %v1699_v23, %v1667_v25  ;;  %v1668_v31 = vmul.f32 %v1595_v27, %v1313_v26  ;;  %v2265_v32 = vpop.f32.mrb[44].mxu1  ;;  %v2154_v33 = vpop.f32.mrb[45].mxu0 }
 0x155   : > { %v2155_v34 = vadd.f32 %v2154_v33, %v2153_v29  ;;  %v2266_v35 = vpop.f32.mrb[45].mxu1  ;;  %v2156_v36 = vpop.f32.mrb[46].mxu0 }
 0x156   : > { %v1770_v37 = vadd.f32 %v2745_v19, %v1731_v30  ;;  %v1732_v38 = vadd.f32 %v1700_v28, %v1668_v31  ;;  %v2267_v39 = vadd.f32 %v2266_v35, %v2265_v32  ;;  %v2268_v40 = vpop.f32.mrb[46].mxu1  ;;  %v2157_v41 = vpop.f32.mrb[47].mxu0 }
 0x157   : > { %v2158_v42 = vadd.f32 %v2157_v41, %v2156_v36  ;;  %v2269_v43 = vpop.f32.mrb[47].mxu1 }
 0x158   : > { %v1802_v44 = vmax.f32 %v1770_v37, 0.0  ;;  %v1771_v45 = vadd.f32 %v2745_v19, %v1732_v38  ;;  %v1318_v46 = vadd.f32 %v2267_v39, %v2155_v34  ;;  %v2270_v47 = vadd.f32 %v2269_v43, %v2268_v40  ;;  %v1620_v37 = vpop.permute.xlu0 %1619  ;;  %v1705_v38 = vld [vmem:[%s2739_s7 + $0xd0] sm:$0xff]  ;;  %v1706_v43 = vld [vmem:[%s2739_s7 + $0xd8] sm:$0xff] }
 0x15a   : > { %1834 = vst [vmem:[%s2753_s13 + $0xa0] sm:$0xff] %v1802_v44  ;;  %v1803_v50 = vmax.f32 %v1771_v45, 0.0  ;;  %v1669_v51 = vmul.f32 %v1600_v48, %v1318_v46  ;;  %v1321_v52 = vadd.f32 %v2270_v47, %v2158_v42  ;;  %v1625_v42 = vpop.permute.xlu1 %1624 }
 0x15b   : > { %v2159_v55 = vpop.f32.mrb[48].mxu0 }
 0x15c   : > { %1835 = vst [vmem:[%s2753_s13 + $0xa8] sm:$0xff] %v1803_v50  ;;  %v1733_v56 = vadd.f32 %v1701_v49, %v1669_v51  ;;  %v1670_v57 = vmul.f32 %v1605_v53, %v1321_v52  ;;  %v2271_v58 = vpop.f32.mrb[48].mxu1  ;;  %v2160_v59 = vpop.f32.mrb[49].mxu0 }
 0x15d   : > { %v2161_v60 = vadd.f32 %v2160_v59, %v2159_v55  ;;  %v2272_v61 = vpop.f32.mrb[49].mxu1  ;;  %v2162_v62 = vpop.f32.mrb[50].mxu0 }
 0x15e   : > { %v1772_v63 = vadd.f32 %v2745_v19, %v1733_v56  ;;  %v1734_v0 = vadd.f32 %v1702_v54, %v1670_v57  ;;  %v2273_v1 = vadd.f32 %v2272_v61, %v2271_v58  ;;  %v2274_v2 = vpop.f32.mrb[50].mxu1  ;;  %v2163_v3 = vpop.f32.mrb[51].mxu0 }
 0x15f   : > { %v2164_v4 = vadd.f32 %v2163_v3, %v2162_v62  ;;  %v2275_v5 = vpop.f32.mrb[51].mxu1 }
 0x160   : > { %v1804_v6 = vmax.f32 %v1772_v63, 0.0  ;;  %v1773_v7 = vadd.f32 %v2745_v19, %v1734_v0  ;;  %v1326_v8 = vadd.f32 %v2273_v1, %v2161_v60  ;;  %v2276_v9 = vadd.f32 %v2275_v5, %v2274_v2  ;;  %v1630_v63 = vpop.permute.xlu0 %1629  ;;  %v1707_v0 = vld [vmem:[%s2739_s7 + $0xe0] sm:$0xff]  ;;  %v1708_v5 = vld [vmem:[%s2739_s7 + $0xe8] sm:$0xff] }
 0x162   : > { %1836 = vst [vmem:[%s2753_s13 + $0xb0] sm:$0xff] %v1804_v6  ;;  %v1805_v12 = vmax.f32 %v1773_v7, 0.0  ;;  %v1671_v13 = vmul.f32 %v1610_v10, %v1326_v8  ;;  %v1329_v14 = vadd.f32 %v2276_v9, %v2164_v4  ;;  %v1635_v4 = vpop.permute.xlu1 %1634 }
 0x163   : > { %v2165_v17 = vpop.f32.mrb[52].mxu0 }
 0x164   : > { %1837 = vst [vmem:[%s2753_s13 + $0xb8] sm:$0xff] %v1805_v12  ;;  %v1735_v18 = vadd.f32 %v1703_v11, %v1671_v13  ;;  %v1672_v20 = vmul.f32 %v1615_v15, %v1329_v14  ;;  %v2277_v21 = vpop.f32.mrb[52].mxu1  ;;  %v2166_v22 = vpop.f32.mrb[53].mxu0 }
 0x165   : > { %v2167_v23 = vadd.f32 %v2166_v22, %v2165_v17  ;;  %v2278_v24 = vpop.f32.mrb[53].mxu1  ;;  %v2168_v25 = vpop.f32.mrb[54].mxu0 }
 0x166   : > { %v1774_v26 = vadd.f32 %v2745_v19, %v1735_v18  ;;  %v1736_v27 = vadd.f32 %v1704_v16, %v1672_v20  ;;  %v2279_v28 = vadd.f32 %v2278_v24, %v2277_v21  ;;  %v2280_v29 = vpop.f32.mrb[54].mxu1  ;;  %v2169_v30 = vpop.f32.mrb[55].mxu0 }
 0x167   : > { %v2170_v31 = vadd.f32 %v2169_v30, %v2168_v25  ;;  %v2281_v32 = vpop.f32.mrb[55].mxu1 }
 0x168   : > { %v1806_v33 = vmax.f32 %v1774_v26, 0.0  ;;  %v1775_v34 = vadd.f32 %v2745_v19, %v1736_v27  ;;  %v1334_v35 = vadd.f32 %v2279_v28, %v2167_v23  ;;  %v2282_v36 = vadd.f32 %v2281_v32, %v2280_v29  ;;  %v1640_v26 = vpop.permute.xlu0 %1639  ;;  %v1709_v27 = vld [vmem:[%s2739_s7 + $0xf0] sm:$0xff]  ;;  %v1710_v32 = vld [vmem:[%s2739_s7 + $0xf8] sm:$0xff] }
 0x16a   : > { %1838 = vst [vmem:[%s2753_s13 + $0xc0] sm:$0xff] %v1806_v33  ;;  %v1807_v39 = vmax.f32 %v1775_v34, 0.0  ;;  %v1673_v40 = vmul.f32 %v1620_v37, %v1334_v35  ;;  %v1337_v41 = vadd.f32 %v2282_v36, %v2170_v31  ;;  %v1645_v31 = vpop.permute.xlu1 %1644 }
 0x16b   : > { %v2171_v44 = vpop.f32.mrb[56].mxu0 }
 0x16c   : > { %1839 = vst [vmem:[%s2753_s13 + $0xc8] sm:$0xff] %v1807_v39  ;;  %v1737_v45 = vadd.f32 %v1705_v38, %v1673_v40  ;;  %v1674_v46 = vmul.f32 %v1625_v42, %v1337_v41  ;;  %v2283_v47 = vpop.f32.mrb[56].mxu1  ;;  %v2172_v48 = vpop.f32.mrb[57].mxu0 }
 0x16d   : > { %v2173_v49 = vadd.f32 %v2172_v48, %v2171_v44  ;;  %v2284_v50 = vpop.f32.mrb[57].mxu1  ;;  %v2174_v51 = vpop.f32.mrb[58].mxu0 }
 0x16e   : > { %v1776_v52 = vadd.f32 %v2745_v19, %v1737_v45  ;;  %v1738_v53 = vadd.f32 %v1706_v43, %v1674_v46  ;;  %v2285_v54 = vadd.f32 %v2284_v50, %v2283_v47  ;;  %v2286_v55 = vpop.f32.mrb[58].mxu1  ;;  %v2175_v56 = vpop.f32.mrb[59].mxu0 }
 0x16f   : > { %v2176_v57 = vadd.f32 %v2175_v56, %v2174_v51  ;;  %v2287_v58 = vpop.f32.mrb[59].mxu1 }
 0x170   : > { %v1808_v59 = vmax.f32 %v1776_v52, 0.0  ;;  %v1777_v60 = vadd.f32 %v2745_v19, %v1738_v53  ;;  %v1342_v61 = vadd.f32 %v2285_v54, %v2173_v49  ;;  %v2288_v62 = vadd.f32 %v2287_v58, %v2286_v55 }
 0x172   : > { %1840 = vst [vmem:[%s2753_s13 + $0xd0] sm:$0xff] %v1808_v59  ;;  %v1809_v1 = vmax.f32 %v1777_v60, 0.0  ;;  %v1675_v2 = vmul.f32 %v1630_v63, %v1342_v61  ;;  %v1345_v3 = vadd.f32 %v2288_v62, %v2176_v57 }
 0x173   : > { %v2177_v6 = vpop.f32.mrb[60].mxu0 }
 0x174   : > { %1841 = vst [vmem:[%s2753_s13 + $0xd8] sm:$0xff] %v1809_v1  ;;  %v1739_v7 = vadd.f32 %v1707_v0, %v1675_v2  ;;  %v1676_v8 = vmul.f32 %v1635_v4, %v1345_v3  ;;  %v2289_v9 = vpop.f32.mrb[60].mxu1  ;;  %v2178_v10 = vpop.f32.mrb[61].mxu0 }
 0x175   : > { %v2179_v11 = vadd.f32 %v2178_v10, %v2177_v6  ;;  %v2290_v12 = vpop.f32.mrb[61].mxu1  ;;  %v2180_v13 = vpop.f32.mrb[62].mxu0 }
 0x176   : > { %v1778_v14 = vadd.f32 %v2745_v19, %v1739_v7  ;;  %v1740_v15 = vadd.f32 %v1708_v5, %v1676_v8  ;;  %v2291_v16 = vadd.f32 %v2290_v12, %v2289_v9  ;;  %v2292_v17 = vpop.f32.mrb[62].mxu1  ;;  %v2181_v18 = vpop.f32.mrb[63].mxu0 }
 0x177   : > { %v2182_v20 = vadd.f32 %v2181_v18, %v2180_v13  ;;  %v2293_v21 = vpop.f32.mrb[63].mxu1 }
 0x178   : > { %v1810_v22 = vmax.f32 %v1778_v14, 0.0  ;;  %v1779_v23 = vadd.f32 %v2745_v19, %v1740_v15  ;;  %v1350_v24 = vadd.f32 %v2291_v16, %v2179_v11  ;;  %v2294_v25 = vadd.f32 %v2293_v21, %v2292_v17 }
 0x17a   : > { %1842 = vst [vmem:[%s2753_s13 + $0xe0] sm:$0xff] %v1810_v22  ;;  %v1811_v28 = vmax.f32 %v1779_v23, 0.0  ;;  %v1677_v29 = vmul.f32 %v1640_v26, %v1350_v24  ;;  %v1353_v30 = vadd.f32 %v2294_v25, %v2182_v20 }
 0x17c   : > { %1843 = vst [vmem:[%s2753_s13 + $0xe8] sm:$0xff] %v1811_v28  ;;  %v1741_v33 = vadd.f32 %v1709_v27, %v1677_v29  ;;  %v1678_v34 = vmul.f32 %v1645_v31, %v1353_v30 }
 0x17e   : > { %v1780_v35 = vadd.f32 %v2745_v19, %v1741_v33  ;;  %v1742_v36 = vadd.f32 %v1710_v32, %v1678_v34 }
 0x180   : > { %v1812_v37 = vmax.f32 %v1780_v35, 0.0  ;;  %v1781_v38 = vadd.f32 %v2745_v19, %v1742_v36 }
 0x182   : > { %1844 = vst [vmem:[%s2753_s13 + $0xf0] sm:$0xff] %v1812_v37  ;;  %v1813_v39 = vmax.f32 %v1781_v38, 0.0 }
 0x184   : > { %1845 = vst [vmem:[%s2753_s13 + $0xf8] sm:$0xff] %v1813_v39 }
 0x185 PF: > { %s15_s20 = sadd.s32 1, %s2472_s20   ;;  %s2863_s18 = smov %s2468_s19 }
 0x186   : > { %p12_p5 = scmp.ge.s32.totalorder %s15_s20, 4   ;;  %s2864_s19 = smov %s2866_s21 }
 0x188   :  { %14 = sbr.rel (!%p12_p5) target bundleno = 2 (0x2), region = 87 }

// kernel: gcn_weight_forward.4
= control target key start
LH: loop header
LB: loop body
LE: loop exit
PB: predicated region body
PF: predicated region fallthrough
CT: control target
= control target key end

     0   :  { %s2077_s12 = smov 0   ;;  %s2079_s13 = smov 0   ;;  %s2350_s0 = inlined_call_operand.vmem [shape: bf16[512,512], index: 0, kind: input, shape index: {}]   ;;  %s2351_s1 = inlined_call_operand.vmem [shape: bf16[512,128], index: 1, kind: input, shape index: {}]   ;;  %s2352_s2 = inlined_call_operand.vmem [shape: f32[1,128], index: 2, kind: input, shape index: {}]   ;;  %s2353_s3 = inlined_call_operand.vmem [shape: f32[512,128], index: 3, kind: output, shape index: {}]  }
   0x1   :  { %s2081_s14 = smov 0  }
   0x2 LB: > { %s25_s15 = sadd.s32 1, %s2051_s13  ;;  %p1551_p0 = scmp.ge.s32.totalorder %s2055_s14, 1  ;;  %s2055_s14 = sphi %s2081_s14, %s13_s14   ;;  %s2051_s13 = sphi %s2079_s13, %s2355_s13   ;;  %s2047_s12 = sphi %s2077_s12, %s2354_s12  }
   0x3   : > { %p27_p1 = scmp.ge.s32.totalorder %s25_s15, 2  ;;  %p169_p2 = scmp.lt.s32.totalorder %s2055_s14, 3 }
   0x5   : > { %s2357_s15 = smov (%p27_p1, %s25_s15), 0  ;;  %p170_p3 = pnand %p1551_p0, %p169_p2 }
   0x6   : > { %v1905_v0 = vld [vmem:[%s2351_s1 + $0x40] sm:$0xff] (!%p170_p3)   ;;  %v1909_v4 = vld [vmem:[%s2351_s1 + $0x48] sm:$0xff] (!%p170_p3)   ;;  %v1913_v8 = vld [vmem:[%s2351_s1 + $0x50] sm:$0xff] (!%p170_p3)   ;;  %s1552_s25 = sshll.u32 (!%p170_p3), %s2047_s12, 5 }
   0x7   : > { %173 = sbr.rel (%p170_p3) target bundleno = 385 (0x181), region = 32  ;;  %v1906_v1 = vld [vmem:[%s2351_s1 + $0xc0] sm:$0xff] (!%p170_p3)   ;;  %1657 = vmatprep.subr.bf16.mxu0 (!%p170_p3), %v1905_v0  ;;  %v1910_v5 = vld [vmem:[%s2351_s1 + $0xc8] sm:$0xff] (!%p170_p3)   ;;  %v1914_v9 = vld [vmem:[%s2351_s1 + $0xd0] sm:$0xff] (!%p170_p3)   ;;  %p205_p4 = scmp.lt.s32.totalorder (!%p170_p3), %s1552_s25, 63 }
   0x8   : > { %v1907_v2 = vld [vmem:[%s2351_s1] sm:$0xff] (!%p170_p3)   ;;  %1769 = vmatprep.subr.bf16.mxu1 (!%p170_p3), %v1906_v1  ;;  %v1911_v6 = vld [vmem:[%s2351_s1 + $0x8] sm:$0xff] (!%p170_p3)   ;;  %v1915_v10 = vld [vmem:[%s2351_s1 + $0x10] sm:$0xff] (!%p170_p3)  }
   0x9   : > { %v1908_v3 = vld [vmem:[%s2351_s1 + $0x80] sm:$0xff] (!%p170_p3)   ;;  %1658 = vmatpush3.bf16.msra.mxu0 (!%p170_p3), %v1907_v2  ;;  %v1912_v7 = vld [vmem:[%s2351_s1 + $0x88] sm:$0xff] (!%p170_p3)   ;;  %v1916_v11 = vld [vmem:[%s2351_s1 + $0x90] sm:$0xff] (!%p170_p3)  }
   0xa   : > { %1770 = vmatpush3.bf16.msra.mxu1 (!%p170_p3), %v1908_v3  ;;  %1659 = vmatprep.subr.bf16.mxu0 (!%p170_p3), %v1909_v4  ;;  %v1917_v12 = vld [vmem:[%s2351_s1 + $0x58] sm:$0xff] (!%p170_p3)   ;;  %v1921_v16 = vld [vmem:[%s2351_s1 + $0x60] sm:$0xff] (!%p170_p3)   ;;  %v1925_v20 = vld [vmem:[%s2351_s1 + $0x68] sm:$0xff] (!%p170_p3)  }
   0xb   : > { %1771 = vmatprep.subr.bf16.mxu1 (!%p170_p3), %v1910_v5  ;;  %v1918_v13 = vld [vmem:[%s2351_s1 + $0xd8] sm:$0xff] (!%p170_p3)   ;;  %v1922_v17 = vld [vmem:[%s2351_s1 + $0xe0] sm:$0xff] (!%p170_p3)   ;;  %v1926_v21 = vld [vmem:[%s2351_s1 + $0xe8] sm:$0xff] (!%p170_p3)  }
   0xc   : > { %v1919_v14 = vld [vmem:[%s2351_s1 + $0x18] sm:$0xff] (!%p170_p3)   ;;  %v1923_v18 = vld [vmem:[%s2351_s1 + $0x20] sm:$0xff] (!%p170_p3)   ;;  %v1927_v22 = vld [vmem:[%s2351_s1 + $0x28] sm:$0xff] (!%p170_p3)  }
   0xd   : > { %1660 = vmatpush3.bf16.msra.mxu0 (!%p170_p3), %v1911_v6  ;;  %v1920_v15 = vld [vmem:[%s2351_s1 + $0x98] sm:$0xff] (!%p170_p3)   ;;  %v1924_v19 = vld [vmem:[%s2351_s1 + $0xa0] sm:$0xff] (!%p170_p3)   ;;  %v1928_v23 = vld [vmem:[%s2351_s1 + $0xa8] sm:$0xff] (!%p170_p3)  }
   0xe   : > { %1772 = vmatpush3.bf16.msra.mxu1 %v1912_v7  ;;  %1661 = vmatprep.subr.bf16.mxu0 %v1913_v8  ;;  %s2359_s25 = smov (!%p205_p4, %s1552_s25), 63  ;;  %v1929_v24 = vld [vmem:[%s2351_s1 + $0x70] sm:$0xff]   ;;  %v1933_v28 = vld [vmem:[%s2351_s1 + $0x78] sm:$0xff]  }
   0xf   : > { %1773 = vmatprep.subr.bf16.mxu1 %v1914_v9  ;;  %v1930_v25 = vld [vmem:[%s2351_s1 + $0xf0] sm:$0xff]   ;;  %s1656_s24 = sshll.u32 %s2359_s25, 4  ;;  %v1934_v29 = vld [vmem:[%s2351_s1 + $0xf8] sm:$0xff]   ;;  %s1556_s17 = sshll.u32 %s2359_s25, 3 }
  0x10   : > { %v1931_v26 = vld [vmem:[%s2351_s1 + $0x30] sm:$0xff]   ;;  %s2194_s12 = scalar_lea.vmem %s2350_s0, %s1656_s24  ;;  %v1935_v30 = vld [vmem:[%s2351_s1 + $0x38] sm:$0xff]   ;;  %s2276_s20 = scalar_lea.vmem %s2353_s3, %s1556_s17 }
  0x11   : > { %1662 = vmatpush3.bf16.msra.mxu0 %v1915_v10  ;;  %v1932_v27 = vld [vmem:[%s2351_s1 + $0xb0] sm:$0xff]   ;;  %v1936_v31 = vld [vmem:[%s2351_s1 + $0xb8] sm:$0xff]  }
  0x12   : > { %1774 = vmatpush3.bf16.msra.mxu1 %v1916_v11  ;;  %1663 = vmatprep.subr.bf16.mxu0 %v1917_v12  ;;  %v1937_v32 = vld [vmem:[%s2194_s12] ss:$16 sps:$4 sm:$0xff]   ;;  %v1939_v33 = vld [vmem:[%s2194_s12 + $0x4] ss:$16 sps:$4 sm:$0xff]   ;;  %v1940_v34 = vld [vmem:[%s2194_s12 + $0x8] ss:$16 sps:$4 sm:$0xff]  }
  0x13   : > { %1775 = vmatprep.subr.bf16.mxu1 %v1918_v13  ;;  %v1942_v35 = vld [vmem:[%s2194_s12 + $0xc] ss:$16 sps:$4 sm:$0xff]   ;;  %968 = vmatprep.mubr.bf16.mxu0 %v1939_v33  ;;  %v1943_v36 = vld [vmem:[%s2194_s12 + $0x24] ss:$16 sps:$4 sm:$0xff]   ;;  %v1947_v38 = vld [vmem:[%s2194_s12 + $0x20] ss:$16 sps:$4 sm:$0xff]  }
  0x14   : > { %1129 = vmatprep.mubr.bf16.mxu1 %v1942_v35  ;;  %v1945_v37 = vld [vmem:[%s2194_s12 + $0x2c] ss:$16 sps:$4 sm:$0xff]   ;;  %v1948_v39 = vld [vmem:[%s2194_s12 + $0x28] ss:$16 sps:$4 sm:$0xff]   ;;  %v1949_v40 = vld [vmem:[%s2194_s12 + $0x44] ss:$16 sps:$4 sm:$0xff]  }
  0x15   : > { %1664 = vmatpush3.bf16.msra.mxu0 %v1919_v14  ;;  %v1951_v41 = vld [vmem:[%s2194_s12 + $0x4c] ss:$16 sps:$4 sm:$0xff]   ;;  %v1953_v42 = vld [vmem:[%s2194_s12 + $0x40] ss:$16 sps:$4 sm:$0xff]   ;;  %v1954_v43 = vld [vmem:[%s2194_s12 + $0x48] ss:$16 sps:$4 sm:$0xff]  }
  0x16   : > { %1776 = vmatpush3.bf16.msra.mxu1 %v1920_v15  ;;  %1665 = vmatprep.subr.bf16.mxu0 %v1921_v16  ;;  %v1955_v44 = vld [vmem:[%s2194_s12 + $0x64] ss:$16 sps:$4 sm:$0xff]   ;;  %v1957_v45 = vld [vmem:[%s2194_s12 + $0x6c] ss:$16 sps:$4 sm:$0xff]   ;;  %v1959_v46 = vld [vmem:[%s2194_s12 + $0x60] ss:$16 sps:$4 sm:$0xff]  }
  0x17   : > { %1777 = vmatprep.subr.bf16.mxu1 %v1922_v17  ;;  %v1960_v47 = vld [vmem:[%s2194_s12 + $0x68] ss:$16 sps:$4 sm:$0xff]   ;;  %v1961_v48 = vld [vmem:[%s2194_s12 + $0x84] ss:$16 sps:$4 sm:$0xff]   ;;  %v1963_v49 = vld [vmem:[%s2194_s12 + $0x8c] ss:$16 sps:$4 sm:$0xff]  }
  0x18   : > { %v1965_v50 = vld [vmem:[%s2194_s12 + $0x80] ss:$16 sps:$4 sm:$0xff]   ;;  %v1966_v51 = vld [vmem:[%s2194_s12 + $0x88] ss:$16 sps:$4 sm:$0xff]   ;;  %v1967_v52 = vld [vmem:[%s2194_s12 + $0xa4] ss:$16 sps:$4 sm:$0xff]  }
  0x19   : > { %1666 = vmatpush3.bf16.msra.mxu0 %v1923_v18  ;;  %v1969_v53 = vld [vmem:[%s2194_s12 + $0xac] ss:$16 sps:$4 sm:$0xff]   ;;  %v1971_v54 = vld [vmem:[%s2194_s12 + $0xa0] ss:$16 sps:$4 sm:$0xff]   ;;  %v1972_v55 = vld [vmem:[%s2194_s12 + $0xa8] ss:$16 sps:$4 sm:$0xff]  }
  0x1a   : > { %1778 = vmatpush3.bf16.msra.mxu1 %v1924_v19  ;;  %1667 = vmatprep.subr.bf16.mxu0 %v1925_v20  ;;  %v1973_v56 = vld [vmem:[%s2194_s12 + $0xc4] ss:$16 sps:$4 sm:$0xff]   ;;  %v1975_v57 = vld [vmem:[%s2194_s12 + $0xcc] ss:$16 sps:$4 sm:$0xff]   ;;  %v1977_v58 = vld [vmem:[%s2194_s12 + $0xc0] ss:$16 sps:$4 sm:$0xff]  }
  0x1b   : > { %1779 = vmatprep.subr.bf16.mxu1 %v1926_v21  ;;  %v1978_v59 = vld [vmem:[%s2194_s12 + $0xc8] ss:$16 sps:$4 sm:$0xff]   ;;  %v1979_v60 = vld [vmem:[%s2194_s12 + $0xe4] ss:$16 sps:$4 sm:$0xff]   ;;  %v1981_v61 = vld [vmem:[%s2194_s12 + $0xec] ss:$16 sps:$4 sm:$0xff]  }
  0x1c   : > { %v1983_v62 = vld [vmem:[%s2194_s12 + $0xe0] ss:$16 sps:$4 sm:$0xff]   ;;  %v1984_v63 = vld [vmem:[%s2194_s12 + $0xe8] ss:$16 sps:$4 sm:$0xff]   ;;  %v1985_v0 = vld [vmem:[%s2194_s12 + $0x104] ss:$16 sps:$4 sm:$0xff]  }
  0x1d   : > { %1668 = vmatpush3.bf16.msra.mxu0 %v1927_v22  ;;  %v1987_v1 = vld [vmem:[%s2194_s12 + $0x10c] ss:$16 sps:$4 sm:$0xff]   ;;  %v1989_v2 = vld [vmem:[%s2194_s12 + $0x100] ss:$16 sps:$4 sm:$0xff]   ;;  %v1990_v3 = vld [vmem:[%s2194_s12 + $0x108] ss:$16 sps:$4 sm:$0xff]  }
  0x1e   : > { %1780 = vmatpush3.bf16.msra.mxu1 %v1928_v23  ;;  %1669 = vmatprep.subr.bf16.mxu0 %v1929_v24  ;;  %v1991_v4 = vld [vmem:[%s2194_s12 + $0x124] ss:$16 sps:$4 sm:$0xff]   ;;  %v1993_v5 = vld [vmem:[%s2194_s12 + $0x12c] ss:$16 sps:$4 sm:$0xff]   ;;  %v1995_v6 = vld [vmem:[%s2194_s12 + $0x120] ss:$16 sps:$4 sm:$0xff]  }
  0x1f   : > { %1781 = vmatprep.subr.bf16.mxu1 %v1930_v25  ;;  %v1996_v7 = vld [vmem:[%s2194_s12 + $0x128] ss:$16 sps:$4 sm:$0xff]   ;;  %v1997_v8 = vld [vmem:[%s2194_s12 + $0x144] ss:$16 sps:$4 sm:$0xff]   ;;  %v1999_v9 = vld [vmem:[%s2194_s12 + $0x14c] ss:$16 sps:$4 sm:$0xff]  }
  0x20   : > { %v2001_v10 = vld [vmem:[%s2194_s12 + $0x140] ss:$16 sps:$4 sm:$0xff]   ;;  %v2002_v11 = vld [vmem:[%s2194_s12 + $0x148] ss:$16 sps:$4 sm:$0xff]   ;;  %v2003_v12 = vld [vmem:[%s2194_s12 + $0x164] ss:$16 sps:$4 sm:$0xff]  }
  0x21   : > { %1670 = vmatpush3.bf16.msra.mxu0 %v1931_v26  ;;  %v2005_v13 = vld [vmem:[%s2194_s12 + $0x16c] ss:$16 sps:$4 sm:$0xff]   ;;  %v2007_v14 = vld [vmem:[%s2194_s12 + $0x160] ss:$16 sps:$4 sm:$0xff]   ;;  %v2008_v15 = vld [vmem:[%s2194_s12 + $0x168] ss:$16 sps:$4 sm:$0xff]  }
  0x22   : > { %1782 = vmatpush3.bf16.msra.mxu1 %v1932_v27  ;;  %1671 = vmatprep.subr.bf16.mxu0 %v1933_v28  ;;  %v2009_v16 = vld [vmem:[%s2194_s12 + $0x184] ss:$16 sps:$4 sm:$0xff]   ;;  %v2011_v17 = vld [vmem:[%s2194_s12 + $0x18c] ss:$16 sps:$4 sm:$0xff]   ;;  %v2013_v18 = vld [vmem:[%s2194_s12 + $0x180] ss:$16 sps:$4 sm:$0xff]  }
  0x23   : > { %1783 = vmatprep.subr.bf16.mxu1 %v1934_v29  ;;  %v2014_v19 = vld [vmem:[%s2194_s12 + $0x188] ss:$16 sps:$4 sm:$0xff]   ;;  %v2015_v20 = vld [vmem:[%s2194_s12 + $0x1a4] ss:$16 sps:$4 sm:$0xff]   ;;  %v2017_v21 = vld [vmem:[%s2194_s12 + $0x1ac] ss:$16 sps:$4 sm:$0xff]  }
  0x24   : > { %v2019_v22 = vld [vmem:[%s2194_s12 + $0x1a0] ss:$16 sps:$4 sm:$0xff]   ;;  %v2020_v23 = vld [vmem:[%s2194_s12 + $0x1a8] ss:$16 sps:$4 sm:$0xff]   ;;  %v2021_v24 = vld [vmem:[%s2194_s12 + $0x1c4] ss:$16 sps:$4 sm:$0xff]  }
  0x25   : > { %1672 = vmatpush3.bf16.msra.mxu0 %v1935_v30  ;;  %v2023_v25 = vld [vmem:[%s2194_s12 + $0x1cc] ss:$16 sps:$4 sm:$0xff]   ;;  %v2025_v26 = vld [vmem:[%s2194_s12 + $0x1c0] ss:$16 sps:$4 sm:$0xff]   ;;  %v2026_v27 = vld [vmem:[%s2194_s12 + $0x1c8] ss:$16 sps:$4 sm:$0xff]  }
  0x26   : > { %1784 = vmatpush3.bf16.msra.mxu1 %v1936_v31  ;;  %v2027_v28 = vld [vmem:[%s2194_s12 + $0x1e4] ss:$16 sps:$4 sm:$0xff]   ;;  %v2029_v29 = vld [vmem:[%s2194_s12 + $0x1ec] ss:$16 sps:$4 sm:$0xff]   ;;  %v2031_v30 = vld [vmem:[%s2194_s12 + $0x1e0] ss:$16 sps:$4 sm:$0xff]  }
  0x27   : > { %v2032_v31 = vld [vmem:[%s2194_s12 + $0x1e8] ss:$16 sps:$4 sm:$0xff]  }
  0x28   : > { %969 = vmatmul.mubr.bf16.vlgmr.msra.gmra.mrb[0].mxu0 %v1937_v32 }
  0x29   : > { %1130 = vmatmul.mubr.bf16.vlgmr.msra.gmra.mrb[0].mxu1 %v1940_v34  ;;  %976 = vmatprep.mubr.bf16.mxu0 %v1943_v36 }
  0x2a   : > { %1137 = vmatprep.mubr.bf16.mxu1 %v1945_v37 }
  0x30   : > { %977 = vmatmul.mubr.bf16.gmra.mrb[4].mxu0 %v1947_v38 }
  0x31   : > { %1138 = vmatmul.mubr.bf16.gmra.mrb[4].mxu1 %v1948_v39  ;;  %984 = vmatprep.mubr.bf16.mxu0 %v1949_v40 }
  0x32   : > { %1145 = vmatprep.mubr.bf16.mxu1 %v1951_v41  ;;  %v2269_v41 = vld [vmem:[%s2352_s2] ss:$0 sm:$0xff] }
  0x38   : > { %985 = vmatmul.mubr.bf16.gmra.mrb[8].mxu0 %v1953_v42 }
  0x39   : > { %1146 = vmatmul.mubr.bf16.gmra.mrb[8].mxu1 %v1954_v43  ;;  %992 = vmatprep.mubr.bf16.mxu0 %v1955_v44 }
  0x3a   : > { %1153 = vmatprep.mubr.bf16.mxu1 %v1957_v45 }
  0x40   : > { %993 = vmatmul.mubr.bf16.gmra.mrb[12].mxu0 %v1959_v46 }
  0x41   : > { %1154 = vmatmul.mubr.bf16.gmra.mrb[12].mxu1 %v1960_v47  ;;  %1000 = vmatprep.mubr.bf16.mxu0 %v1961_v48 }
  0x42   : > { %1161 = vmatprep.mubr.bf16.mxu1 %v1963_v49 }
  0x48   : > { %1001 = vmatmul.mubr.bf16.gmra.mrb[16].mxu0 %v1965_v50 }
  0x49   : > { %1162 = vmatmul.mubr.bf16.gmra.mrb[16].mxu1 %v1966_v51  ;;  %1008 = vmatprep.mubr.bf16.mxu0 %v1967_v52 }
  0x4a   : > { %1169 = vmatprep.mubr.bf16.mxu1 %v1969_v53 }
  0x50   : > { %1009 = vmatmul.mubr.bf16.gmra.mrb[20].mxu0 %v1971_v54 }
  0x51   : > { %1170 = vmatmul.mubr.bf16.gmra.mrb[20].mxu1 %v1972_v55  ;;  %1016 = vmatprep.mubr.bf16.mxu0 %v1973_v56 }
  0x52   : > { %1177 = vmatprep.mubr.bf16.mxu1 %v1975_v57 }
  0x58   : > { %1017 = vmatmul.mubr.bf16.gmra.mrb[24].mxu0 %v1977_v58 }
  0x59   : > { %1178 = vmatmul.mubr.bf16.gmra.mrb[24].mxu1 %v1978_v59  ;;  %1024 = vmatprep.mubr.bf16.mxu0 %v1979_v60 }
  0x5a   : > { %1185 = vmatprep.mubr.bf16.mxu1 %v1981_v61 }
  0x60   : > { %1025 = vmatmul.mubr.bf16.gmra.mrb[28].mxu0 %v1983_v62 }
  0x61   : > { %1186 = vmatmul.mubr.bf16.gmra.mrb[28].mxu1 %v1984_v63  ;;  %1032 = vmatprep.mubr.bf16.mxu0 %v1985_v0 }
  0x62   : > { %1193 = vmatprep.mubr.bf16.mxu1 %v1987_v1 }
  0x68   : > { %1033 = vmatmul.mubr.bf16.gmra.mrb[32].mxu0 %v1989_v2 }
  0x69   : > { %1194 = vmatmul.mubr.bf16.gmra.mrb[32].mxu1 %v1990_v3  ;;  %1040 = vmatprep.mubr.bf16.mxu0 %v1991_v4 }
  0x6a   : > { %1201 = vmatprep.mubr.bf16.mxu1 %v1993_v5 }
  0x70   : > { %1041 = vmatmul.mubr.bf16.gmra.mrb[36].mxu0 %v1995_v6 }
  0x71   : > { %1202 = vmatmul.mubr.bf16.gmra.mrb[36].mxu1 %v1996_v7  ;;  %1048 = vmatprep.mubr.bf16.mxu0 %v1997_v8 }
  0x72   : > { %1209 = vmatprep.mubr.bf16.mxu1 %v1999_v9 }
  0x78   : > { %1049 = vmatmul.mubr.bf16.gmra.mrb[40].mxu0 %v2001_v10 }
  0x79   : > { %1210 = vmatmul.mubr.bf16.gmra.mrb[40].mxu1 %v2002_v11  ;;  %1056 = vmatprep.mubr.bf16.mxu0 %v2003_v12 }
  0x7a   : > { %1217 = vmatprep.mubr.bf16.mxu1 %v2005_v13 }
  0x80   : > { %1057 = vmatmul.mubr.bf16.gmra.mrb[44].mxu0 %v2007_v14 }
  0x81   : > { %1218 = vmatmul.mubr.bf16.gmra.mrb[44].mxu1 %v2008_v15  ;;  %1064 = vmatprep.mubr.bf16.mxu0 %v2009_v16 }
  0x82   : > { %1225 = vmatprep.mubr.bf16.mxu1 %v2011_v17 }
  0x88   : > { %1065 = vmatmul.mubr.bf16.gmra.mrb[48].mxu0 %v2013_v18 }
  0x89   : > { %1226 = vmatmul.mubr.bf16.gmra.mrb[48].mxu1 %v2014_v19  ;;  %1072 = vmatprep.mubr.bf16.mxu0 %v2015_v20 }
  0x8a   : > { %1233 = vmatprep.mubr.bf16.mxu1 %v2017_v21 }
  0x90   : > { %1073 = vmatmul.mubr.bf16.gmra.mrb[52].mxu0 %v2019_v22 }
  0x91   : > { %1234 = vmatmul.mubr.bf16.gmra.mrb[52].mxu1 %v2020_v23  ;;  %1080 = vmatprep.mubr.bf16.mxu0 %v2021_v24 }
  0x92   : > { %1241 = vmatprep.mubr.bf16.mxu1 %v2023_v25 }
  0x98   : > { %1081 = vmatmul.mubr.bf16.gmra.mrb[56].mxu0 %v2025_v26 }
  0x99   : > { %1242 = vmatmul.mubr.bf16.gmra.mrb[56].mxu1 %v2026_v27  ;;  %1088 = vmatprep.mubr.bf16.mxu0 %v2027_v28 }
  0x9a   : > { %1249 = vmatprep.mubr.bf16.mxu1 %v2029_v29 }
  0xa0   : > { %1089 = vmatmul.mubr.bf16.gmra.mrb[60].mxu0 %v2031_v30 }
  0xa1   : > { %1250 = vmatmul.mubr.bf16.gmra.mrb[60].mxu1 %v2032_v31 }
  0xfb   : > { %v1673_v32 = vpop.f32.mrb[0].mxu0 }
  0xfc   : > { %v1785_v33 = vpop.f32.mrb[0].mxu1  ;;  %v1674_v34 = vpop.f32.mrb[1].mxu0 }
  0xfd   : > { %v1675_v35 = vadd.f32 %v1674_v34, %v1673_v32  ;;  %v1786_v36 = vpop.f32.mrb[1].mxu1  ;;  %v1676_v37 = vpop.f32.mrb[2].mxu0 }
  0xfe   : > { %v1787_v38 = vadd.f32 %v1786_v36, %v1785_v33  ;;  %v1788_v39 = vpop.f32.mrb[2].mxu1  ;;  %v1677_v40 = vpop.f32.mrb[3].mxu0 }
  0xff   : > { %v1678_v42 = vadd.f32 %v1677_v40, %v1676_v37  ;;  %v1789_v43 = vpop.f32.mrb[3].mxu1 }
 0x100   : > { %v1132_v44 = vadd.f32 %v1787_v38, %v1675_v35  ;;  %v1790_v45 = vadd.f32 %v1789_v43, %v1788_v39 }
 0x102   : > { %v1364_v46 = vadd.f32 %v2269_v41, %v1132_v44  ;;  %v1135_v47 = vadd.f32 %v1790_v45, %v1678_v42 }
 0x103   : > { %v1679_v48 = vpop.f32.mrb[4].mxu0 }
 0x104   : > { %v1396_v49 = vmax.f32 %v1364_v46, 0.0  ;;  %v1365_v50 = vadd.f32 %v2269_v41, %v1135_v47  ;;  %v1791_v51 = vpop.f32.mrb[4].mxu1  ;;  %v1680_v52 = vpop.f32.mrb[5].mxu0 }
 0x105   : > { %v1681_v53 = vadd.f32 %v1680_v52, %v1679_v48  ;;  %v1792_v54 = vpop.f32.mrb[5].mxu1  ;;  %v1682_v55 = vpop.f32.mrb[6].mxu0 }
 0x106   : > { %1428 = vst [vmem:[%s2276_s20] sm:$0xff] %v1396_v49  ;;  %v1397_v56 = vmax.f32 %v1365_v50, 0.0  ;;  %v1793_v57 = vadd.f32 %v1792_v54, %v1791_v51  ;;  %v1794_v58 = vpop.f32.mrb[6].mxu1  ;;  %v1683_v59 = vpop.f32.mrb[7].mxu0 }
 0x107   : > { %v1684_v60 = vadd.f32 %v1683_v59, %v1682_v55  ;;  %v1795_v61 = vpop.f32.mrb[7].mxu1 }
 0x108   : > { %1429 = vst [vmem:[%s2276_s20 + $0x8] sm:$0xff] %v1397_v56  ;;  %v1140_v62 = vadd.f32 %v1793_v57, %v1681_v53  ;;  %v1796_v63 = vadd.f32 %v1795_v61, %v1794_v58 }
 0x10a   : > { %v1366_v0 = vadd.f32 %v2269_v41, %v1140_v62  ;;  %v1143_v1 = vadd.f32 %v1796_v63, %v1684_v60 }
 0x10b   : > { %v1685_v2 = vpop.f32.mrb[8].mxu0 }
 0x10c   : > { %v1398_v3 = vmax.f32 %v1366_v0, 0.0  ;;  %v1367_v4 = vadd.f32 %v2269_v41, %v1143_v1  ;;  %v1797_v5 = vpop.f32.mrb[8].mxu1  ;;  %v1686_v6 = vpop.f32.mrb[9].mxu0 }
 0x10d   : > { %v1687_v7 = vadd.f32 %v1686_v6, %v1685_v2  ;;  %v1798_v8 = vpop.f32.mrb[9].mxu1  ;;  %v1688_v9 = vpop.f32.mrb[10].mxu0 }
 0x10e   : > { %1430 = vst [vmem:[%s2276_s20 + $0x10] sm:$0xff] %v1398_v3  ;;  %v1399_v10 = vmax.f32 %v1367_v4, 0.0  ;;  %v1799_v11 = vadd.f32 %v1798_v8, %v1797_v5  ;;  %v1800_v12 = vpop.f32.mrb[10].mxu1  ;;  %v1689_v13 = vpop.f32.mrb[11].mxu0 }
 0x10f   : > { %v1690_v14 = vadd.f32 %v1689_v13, %v1688_v9  ;;  %v1801_v15 = vpop.f32.mrb[11].mxu1 }
 0x110   : > { %1431 = vst [vmem:[%s2276_s20 + $0x18] sm:$0xff] %v1399_v10  ;;  %v1148_v16 = vadd.f32 %v1799_v11, %v1687_v7  ;;  %v1802_v17 = vadd.f32 %v1801_v15, %v1800_v12 }
 0x112   : > { %v1368_v18 = vadd.f32 %v2269_v41, %v1148_v16  ;;  %v1151_v19 = vadd.f32 %v1802_v17, %v1690_v14 }
 0x113   : > { %v1691_v20 = vpop.f32.mrb[12].mxu0 }
 0x114   : > { %v1400_v21 = vmax.f32 %v1368_v18, 0.0  ;;  %v1369_v22 = vadd.f32 %v2269_v41, %v1151_v19  ;;  %v1803_v23 = vpop.f32.mrb[12].mxu1  ;;  %v1692_v24 = vpop.f32.mrb[13].mxu0 }
 0x115   : > { %v1693_v25 = vadd.f32 %v1692_v24, %v1691_v20  ;;  %v1804_v26 = vpop.f32.mrb[13].mxu1  ;;  %v1694_v27 = vpop.f32.mrb[14].mxu0 }
 0x116   : > { %1432 = vst [vmem:[%s2276_s20 + $0x20] sm:$0xff] %v1400_v21  ;;  %v1401_v28 = vmax.f32 %v1369_v22, 0.0  ;;  %v1805_v29 = vadd.f32 %v1804_v26, %v1803_v23  ;;  %v1806_v30 = vpop.f32.mrb[14].mxu1  ;;  %v1695_v31 = vpop.f32.mrb[15].mxu0 }
 0x117   : > { %v1696_v32 = vadd.f32 %v1695_v31, %v1694_v27  ;;  %v1807_v33 = vpop.f32.mrb[15].mxu1 }
 0x118   : > { %1433 = vst [vmem:[%s2276_s20 + $0x28] sm:$0xff] %v1401_v28  ;;  %v1156_v34 = vadd.f32 %v1805_v29, %v1693_v25  ;;  %v1808_v35 = vadd.f32 %v1807_v33, %v1806_v30 }
 0x11a   : > { %v1370_v36 = vadd.f32 %v2269_v41, %v1156_v34  ;;  %v1159_v37 = vadd.f32 %v1808_v35, %v1696_v32 }
 0x11b   : > { %v1697_v38 = vpop.f32.mrb[16].mxu0 }
 0x11c   : > { %v1402_v39 = vmax.f32 %v1370_v36, 0.0  ;;  %v1371_v40 = vadd.f32 %v2269_v41, %v1159_v37  ;;  %v1809_v42 = vpop.f32.mrb[16].mxu1  ;;  %v1698_v43 = vpop.f32.mrb[17].mxu0 }
 0x11d   : > { %v1699_v44 = vadd.f32 %v1698_v43, %v1697_v38  ;;  %v1810_v45 = vpop.f32.mrb[17].mxu1  ;;  %v1700_v46 = vpop.f32.mrb[18].mxu0 }
 0x11e   : > { %1434 = vst [vmem:[%s2276_s20 + $0x30] sm:$0xff] %v1402_v39  ;;  %v1403_v47 = vmax.f32 %v1371_v40, 0.0  ;;  %v1811_v48 = vadd.f32 %v1810_v45, %v1809_v42  ;;  %v1812_v49 = vpop.f32.mrb[18].mxu1  ;;  %v1701_v50 = vpop.f32.mrb[19].mxu0 }
 0x11f   : > { %v1702_v51 = vadd.f32 %v1701_v50, %v1700_v46  ;;  %v1813_v52 = vpop.f32.mrb[19].mxu1 }
 0x120   : > { %1435 = vst [vmem:[%s2276_s20 + $0x38] sm:$0xff] %v1403_v47  ;;  %v1164_v53 = vadd.f32 %v1811_v48, %v1699_v44  ;;  %v1814_v54 = vadd.f32 %v1813_v52, %v1812_v49 }
 0x122   : > { %v1372_v55 = vadd.f32 %v2269_v41, %v1164_v53  ;;  %v1167_v56 = vadd.f32 %v1814_v54, %v1702_v51 }
 0x123   : > { %v1703_v57 = vpop.f32.mrb[20].mxu0 }
 0x124   : > { %v1404_v58 = vmax.f32 %v1372_v55, 0.0  ;;  %v1373_v59 = vadd.f32 %v2269_v41, %v1167_v56  ;;  %v1815_v60 = vpop.f32.mrb[20].mxu1  ;;  %v1704_v61 = vpop.f32.mrb[21].mxu0 }
 0x125   : > { %v1705_v62 = vadd.f32 %v1704_v61, %v1703_v57  ;;  %v1816_v63 = vpop.f32.mrb[21].mxu1  ;;  %v1706_v0 = vpop.f32.mrb[22].mxu0 }
 0x126   : > { %1436 = vst [vmem:[%s2276_s20 + $0x40] sm:$0xff] %v1404_v58  ;;  %v1405_v1 = vmax.f32 %v1373_v59, 0.0  ;;  %v1817_v2 = vadd.f32 %v1816_v63, %v1815_v60  ;;  %v1818_v3 = vpop.f32.mrb[22].mxu1  ;;  %v1707_v4 = vpop.f32.mrb[23].mxu0 }
 0x127   : > { %v1708_v5 = vadd.f32 %v1707_v4, %v1706_v0  ;;  %v1819_v6 = vpop.f32.mrb[23].mxu1 }
 0x128   : > { %1437 = vst [vmem:[%s2276_s20 + $0x48] sm:$0xff] %v1405_v1  ;;  %v1172_v7 = vadd.f32 %v1817_v2, %v1705_v62  ;;  %v1820_v8 = vadd.f32 %v1819_v6, %v1818_v3 }
 0x12a   : > { %v1374_v9 = vadd.f32 %v2269_v41, %v1172_v7  ;;  %v1175_v10 = vadd.f32 %v1820_v8, %v1708_v5 }
 0x12b   : > { %v1709_v11 = vpop.f32.mrb[24].mxu0 }
 0x12c   : > { %v1406_v12 = vmax.f32 %v1374_v9, 0.0  ;;  %v1375_v13 = vadd.f32 %v2269_v41, %v1175_v10  ;;  %v1821_v14 = vpop.f32.mrb[24].mxu1  ;;  %v1710_v15 = vpop.f32.mrb[25].mxu0 }
 0x12d   : > { %v1711_v16 = vadd.f32 %v1710_v15, %v1709_v11  ;;  %v1822_v17 = vpop.f32.mrb[25].mxu1  ;;  %v1712_v18 = vpop.f32.mrb[26].mxu0 }
 0x12e   : > { %1438 = vst [vmem:[%s2276_s20 + $0x50] sm:$0xff] %v1406_v12  ;;  %v1407_v19 = vmax.f32 %v1375_v13, 0.0  ;;  %v1823_v20 = vadd.f32 %v1822_v17, %v1821_v14  ;;  %v1824_v21 = vpop.f32.mrb[26].mxu1  ;;  %v1713_v22 = vpop.f32.mrb[27].mxu0 }
 0x12f   : > { %v1714_v23 = vadd.f32 %v1713_v22, %v1712_v18  ;;  %v1825_v24 = vpop.f32.mrb[27].mxu1 }
 0x130   : > { %1439 = vst [vmem:[%s2276_s20 + $0x58] sm:$0xff] %v1407_v19  ;;  %v1180_v25 = vadd.f32 %v1823_v20, %v1711_v16  ;;  %v1826_v26 = vadd.f32 %v1825_v24, %v1824_v21 }
 0x132   : > { %v1376_v27 = vadd.f32 %v2269_v41, %v1180_v25  ;;  %v1183_v28 = vadd.f32 %v1826_v26, %v1714_v23 }
 0x133   : > { %v1715_v29 = vpop.f32.mrb[28].mxu0 }
 0x134   : > { %v1408_v30 = vmax.f32 %v1376_v27, 0.0  ;;  %v1377_v31 = vadd.f32 %v2269_v41, %v1183_v28  ;;  %v1827_v32 = vpop.f32.mrb[28].mxu1  ;;  %v1716_v33 = vpop.f32.mrb[29].mxu0 }
 0x135   : > { %v1717_v34 = vadd.f32 %v1716_v33, %v1715_v29  ;;  %v1828_v35 = vpop.f32.mrb[29].mxu1  ;;  %v1718_v36 = vpop.f32.mrb[30].mxu0 }
 0x136   : > { %1440 = vst [vmem:[%s2276_s20 + $0x60] sm:$0xff] %v1408_v30  ;;  %v1409_v37 = vmax.f32 %v1377_v31, 0.0  ;;  %v1829_v38 = vadd.f32 %v1828_v35, %v1827_v32  ;;  %v1830_v39 = vpop.f32.mrb[30].mxu1  ;;  %v1719_v40 = vpop.f32.mrb[31].mxu0 }
 0x137   : > { %v1720_v42 = vadd.f32 %v1719_v40, %v1718_v36  ;;  %v1831_v43 = vpop.f32.mrb[31].mxu1 }
 0x138   : > { %1441 = vst [vmem:[%s2276_s20 + $0x68] sm:$0xff] %v1409_v37  ;;  %v1188_v44 = vadd.f32 %v1829_v38, %v1717_v34  ;;  %v1832_v45 = vadd.f32 %v1831_v43, %v1830_v39 }
 0x13a   : > { %v1378_v46 = vadd.f32 %v2269_v41, %v1188_v44  ;;  %v1191_v47 = vadd.f32 %v1832_v45, %v1720_v42 }
 0x13b   : > { %v1721_v48 = vpop.f32.mrb[32].mxu0 }
 0x13c   : > { %v1410_v49 = vmax.f32 %v1378_v46, 0.0  ;;  %v1379_v50 = vadd.f32 %v2269_v41, %v1191_v47  ;;  %v1833_v51 = vpop.f32.mrb[32].mxu1  ;;  %v1722_v52 = vpop.f32.mrb[33].mxu0 }
 0x13d   : > { %v1723_v53 = vadd.f32 %v1722_v52, %v1721_v48  ;;  %v1834_v54 = vpop.f32.mrb[33].mxu1  ;;  %v1724_v55 = vpop.f32.mrb[34].mxu0 }
 0x13e   : > { %1442 = vst [vmem:[%s2276_s20 + $0x70] sm:$0xff] %v1410_v49  ;;  %v1411_v56 = vmax.f32 %v1379_v50, 0.0  ;;  %v1835_v57 = vadd.f32 %v1834_v54, %v1833_v51  ;;  %v1836_v58 = vpop.f32.mrb[34].mxu1  ;;  %v1725_v59 = vpop.f32.mrb[35].mxu0 }
 0x13f   : > { %v1726_v60 = vadd.f32 %v1725_v59, %v1724_v55  ;;  %v1837_v61 = vpop.f32.mrb[35].mxu1 }
 0x140   : > { %1443 = vst [vmem:[%s2276_s20 + $0x78] sm:$0xff] %v1411_v56  ;;  %v1196_v62 = vadd.f32 %v1835_v57, %v1723_v53  ;;  %v1838_v63 = vadd.f32 %v1837_v61, %v1836_v58 }
 0x142   : > { %v1380_v0 = vadd.f32 %v2269_v41, %v1196_v62  ;;  %v1199_v1 = vadd.f32 %v1838_v63, %v1726_v60 }
 0x143   : > { %v1727_v2 = vpop.f32.mrb[36].mxu0 }
 0x144   : > { %v1412_v3 = vmax.f32 %v1380_v0, 0.0  ;;  %v1381_v4 = vadd.f32 %v2269_v41, %v1199_v1  ;;  %v1839_v5 = vpop.f32.mrb[36].mxu1  ;;  %v1728_v6 = vpop.f32.mrb[37].mxu0 }
 0x145   : > { %v1729_v7 = vadd.f32 %v1728_v6, %v1727_v2  ;;  %v1840_v8 = vpop.f32.mrb[37].mxu1  ;;  %v1730_v9 = vpop.f32.mrb[38].mxu0 }
 0x146   : > { %1444 = vst [vmem:[%s2276_s20 + $0x80] sm:$0xff] %v1412_v3  ;;  %v1413_v10 = vmax.f32 %v1381_v4, 0.0  ;;  %v1841_v11 = vadd.f32 %v1840_v8, %v1839_v5  ;;  %v1842_v12 = vpop.f32.mrb[38].mxu1  ;;  %v1731_v13 = vpop.f32.mrb[39].mxu0 }
 0x147   : > { %v1732_v14 = vadd.f32 %v1731_v13, %v1730_v9  ;;  %v1843_v15 = vpop.f32.mrb[39].mxu1 }
 0x148   : > { %1445 = vst [vmem:[%s2276_s20 + $0x88] sm:$0xff] %v1413_v10  ;;  %v1204_v16 = vadd.f32 %v1841_v11, %v1729_v7  ;;  %v1844_v17 = vadd.f32 %v1843_v15, %v1842_v12 }
 0x14a   : > { %v1382_v18 = vadd.f32 %v2269_v41, %v1204_v16  ;;  %v1207_v19 = vadd.f32 %v1844_v17, %v1732_v14 }
 0x14b   : > { %v1733_v20 = vpop.f32.mrb[40].mxu0 }
 0x14c   : > { %v1414_v21 = vmax.f32 %v1382_v18, 0.0  ;;  %v1383_v22 = vadd.f32 %v2269_v41, %v1207_v19  ;;  %v1845_v23 = vpop.f32.mrb[40].mxu1  ;;  %v1734_v24 = vpop.f32.mrb[41].mxu0 }
 0x14d   : > { %v1735_v25 = vadd.f32 %v1734_v24, %v1733_v20  ;;  %v1846_v26 = vpop.f32.mrb[41].mxu1  ;;  %v1736_v27 = vpop.f32.mrb[42].mxu0 }
 0x14e   : > { %1446 = vst [vmem:[%s2276_s20 + $0x90] sm:$0xff] %v1414_v21  ;;  %v1415_v28 = vmax.f32 %v1383_v22, 0.0  ;;  %v1847_v29 = vadd.f32 %v1846_v26, %v1845_v23  ;;  %v1848_v30 = vpop.f32.mrb[42].mxu1  ;;  %v1737_v31 = vpop.f32.mrb[43].mxu0 }
 0x14f   : > { %v1738_v32 = vadd.f32 %v1737_v31, %v1736_v27  ;;  %v1849_v33 = vpop.f32.mrb[43].mxu1 }
 0x150   : > { %1447 = vst [vmem:[%s2276_s20 + $0x98] sm:$0xff] %v1415_v28  ;;  %v1212_v34 = vadd.f32 %v1847_v29, %v1735_v25  ;;  %v1850_v35 = vadd.f32 %v1849_v33, %v1848_v30 }
 0x152   : > { %v1384_v36 = vadd.f32 %v2269_v41, %v1212_v34  ;;  %v1215_v37 = vadd.f32 %v1850_v35, %v1738_v32 }
 0x153   : > { %v1739_v38 = vpop.f32.mrb[44].mxu0 }
 0x154   : > { %v1416_v39 = vmax.f32 %v1384_v36, 0.0  ;;  %v1385_v40 = vadd.f32 %v2269_v41, %v1215_v37  ;;  %v1851_v42 = vpop.f32.mrb[44].mxu1  ;;  %v1740_v43 = vpop.f32.mrb[45].mxu0 }
 0x155   : > { %v1741_v44 = vadd.f32 %v1740_v43, %v1739_v38  ;;  %v1852_v45 = vpop.f32.mrb[45].mxu1  ;;  %v1742_v46 = vpop.f32.mrb[46].mxu0 }
 0x156   : > { %1448 = vst [vmem:[%s2276_s20 + $0xa0] sm:$0xff] %v1416_v39  ;;  %v1417_v47 = vmax.f32 %v1385_v40, 0.0  ;;  %v1853_v48 = vadd.f32 %v1852_v45, %v1851_v42  ;;  %v1854_v49 = vpop.f32.mrb[46].mxu1  ;;  %v1743_v50 = vpop.f32.mrb[47].mxu0 }
 0x157   : > { %v1744_v51 = vadd.f32 %v1743_v50, %v1742_v46  ;;  %v1855_v52 = vpop.f32.mrb[47].mxu1 }
 0x158   : > { %1449 = vst [vmem:[%s2276_s20 + $0xa8] sm:$0xff] %v1417_v47  ;;  %v1220_v53 = vadd.f32 %v1853_v48, %v1741_v44  ;;  %v1856_v54 = vadd.f32 %v1855_v52, %v1854_v49 }
 0x15a   : > { %v1386_v55 = vadd.f32 %v2269_v41, %v1220_v53  ;;  %v1223_v56 = vadd.f32 %v1856_v54, %v1744_v51 }
 0x15b   : > { %v1745_v57 = vpop.f32.mrb[48].mxu0 }
 0x15c   : > { %v1418_v58 = vmax.f32 %v1386_v55, 0.0  ;;  %v1387_v59 = vadd.f32 %v2269_v41, %v1223_v56  ;;  %v1857_v60 = vpop.f32.mrb[48].mxu1  ;;  %v1746_v61 = vpop.f32.mrb[49].mxu0 }
 0x15d   : > { %v1747_v62 = vadd.f32 %v1746_v61, %v1745_v57  ;;  %v1858_v63 = vpop.f32.mrb[49].mxu1  ;;  %v1748_v0 = vpop.f32.mrb[50].mxu0 }
 0x15e   : > { %1450 = vst [vmem:[%s2276_s20 + $0xb0] sm:$0xff] %v1418_v58  ;;  %v1419_v1 = vmax.f32 %v1387_v59, 0.0  ;;  %v1859_v2 = vadd.f32 %v1858_v63, %v1857_v60  ;;  %v1860_v3 = vpop.f32.mrb[50].mxu1  ;;  %v1749_v4 = vpop.f32.mrb[51].mxu0 }
 0x15f   : > { %v1750_v5 = vadd.f32 %v1749_v4, %v1748_v0  ;;  %v1861_v6 = vpop.f32.mrb[51].mxu1 }
 0x160   : > { %1451 = vst [vmem:[%s2276_s20 + $0xb8] sm:$0xff] %v1419_v1  ;;  %v1228_v7 = vadd.f32 %v1859_v2, %v1747_v62  ;;  %v1862_v8 = vadd.f32 %v1861_v6, %v1860_v3 }
 0x162   : > { %v1388_v9 = vadd.f32 %v2269_v41, %v1228_v7  ;;  %v1231_v10 = vadd.f32 %v1862_v8, %v1750_v5 }
 0x163   : > { %v1751_v11 = vpop.f32.mrb[52].mxu0 }
 0x164   : > { %v1420_v12 = vmax.f32 %v1388_v9, 0.0  ;;  %v1389_v13 = vadd.f32 %v2269_v41, %v1231_v10  ;;  %v1863_v14 = vpop.f32.mrb[52].mxu1  ;;  %v1752_v15 = vpop.f32.mrb[53].mxu0 }
 0x165   : > { %v1753_v16 = vadd.f32 %v1752_v15, %v1751_v11  ;;  %v1864_v17 = vpop.f32.mrb[53].mxu1  ;;  %v1754_v18 = vpop.f32.mrb[54].mxu0 }
 0x166   : > { %1452 = vst [vmem:[%s2276_s20 + $0xc0] sm:$0xff] %v1420_v12  ;;  %v1421_v19 = vmax.f32 %v1389_v13, 0.0  ;;  %v1865_v20 = vadd.f32 %v1864_v17, %v1863_v14  ;;  %v1866_v21 = vpop.f32.mrb[54].mxu1  ;;  %v1755_v22 = vpop.f32.mrb[55].mxu0 }
 0x167   : > { %v1756_v23 = vadd.f32 %v1755_v22, %v1754_v18  ;;  %v1867_v24 = vpop.f32.mrb[55].mxu1 }
 0x168   : > { %1453 = vst [vmem:[%s2276_s20 + $0xc8] sm:$0xff] %v1421_v19  ;;  %v1236_v25 = vadd.f32 %v1865_v20, %v1753_v16  ;;  %v1868_v26 = vadd.f32 %v1867_v24, %v1866_v21 }
 0x16a   : > { %v1390_v27 = vadd.f32 %v2269_v41, %v1236_v25  ;;  %v1239_v28 = vadd.f32 %v1868_v26, %v1756_v23 }
 0x16b   : > { %v1757_v29 = vpop.f32.mrb[56].mxu0 }
 0x16c   : > { %v1422_v30 = vmax.f32 %v1390_v27, 0.0  ;;  %v1391_v31 = vadd.f32 %v2269_v41, %v1239_v28  ;;  %v1869_v32 = vpop.f32.mrb[56].mxu1  ;;  %v1758_v33 = vpop.f32.mrb[57].mxu0 }
 0x16d   : > { %v1759_v34 = vadd.f32 %v1758_v33, %v1757_v29  ;;  %v1870_v35 = vpop.f32.mrb[57].mxu1  ;;  %v1760_v36 = vpop.f32.mrb[58].mxu0 }
 0x16e   : > { %1454 = vst [vmem:[%s2276_s20 + $0xd0] sm:$0xff] %v1422_v30  ;;  %v1423_v37 = vmax.f32 %v1391_v31, 0.0  ;;  %v1871_v38 = vadd.f32 %v1870_v35, %v1869_v32  ;;  %v1872_v39 = vpop.f32.mrb[58].mxu1  ;;  %v1761_v40 = vpop.f32.mrb[59].mxu0 }
 0x16f   : > { %v1762_v42 = vadd.f32 %v1761_v40, %v1760_v36  ;;  %v1873_v43 = vpop.f32.mrb[59].mxu1 }
 0x170   : > { %1455 = vst [vmem:[%s2276_s20 + $0xd8] sm:$0xff] %v1423_v37  ;;  %v1244_v44 = vadd.f32 %v1871_v38, %v1759_v34  ;;  %v1874_v45 = vadd.f32 %v1873_v43, %v1872_v39 }
 0x172   : > { %v1392_v46 = vadd.f32 %v2269_v41, %v1244_v44  ;;  %v1247_v47 = vadd.f32 %v1874_v45, %v1762_v42 }
 0x173   : > { %v1763_v48 = vpop.f32.mrb[60].mxu0 }
 0x174   : > { %v1424_v49 = vmax.f32 %v1392_v46, 0.0  ;;  %v1393_v50 = vadd.f32 %v2269_v41, %v1247_v47  ;;  %v1875_v51 = vpop.f32.mrb[60].mxu1  ;;  %v1764_v52 = vpop.f32.mrb[61].mxu0 }
 0x175   : > { %v1765_v53 = vadd.f32 %v1764_v52, %v1763_v48  ;;  %v1876_v54 = vpop.f32.mrb[61].mxu1  ;;  %v1766_v55 = vpop.f32.mrb[62].mxu0 }
 0x176   : > { %1456 = vst [vmem:[%s2276_s20 + $0xe0] sm:$0xff] %v1424_v49  ;;  %v1425_v56 = vmax.f32 %v1393_v50, 0.0  ;;  %v1877_v57 = vadd.f32 %v1876_v54, %v1875_v51  ;;  %v1878_v58 = vpop.f32.mrb[62].mxu1  ;;  %v1767_v59 = vpop.f32.mrb[63].mxu0 }
 0x177   : > { %v1768_v60 = vadd.f32 %v1767_v59, %v1766_v55  ;;  %v1879_v61 = vpop.f32.mrb[63].mxu1 }
 0x178   : > { %1457 = vst [vmem:[%s2276_s20 + $0xe8] sm:$0xff] %v1425_v56  ;;  %v1252_v62 = vadd.f32 %v1877_v57, %v1765_v53  ;;  %v1880_v63 = vadd.f32 %v1879_v61, %v1878_v58 }
 0x17a   : > { %v1394_v0 = vadd.f32 %v2269_v41, %v1252_v62  ;;  %v1255_v1 = vadd.f32 %v1880_v63, %v1768_v60 }
 0x17c   : > { %v1426_v2 = vmax.f32 %v1394_v0, 0.0  ;;  %v1395_v3 = vadd.f32 %v2269_v41, %v1255_v1 }
 0x17e   : > { %1458 = vst [vmem:[%s2276_s20 + $0xf0] sm:$0xff] %v1426_v2  ;;  %v1427_v4 = vmax.f32 %v1395_v3, 0.0 }
 0x180   : > { %1459 = vst [vmem:[%s2276_s20 + $0xf8] sm:$0xff] %v1427_v4 }
 0x181 PF: > { %s13_s14 = sadd.s32 1, %s2055_s14   ;;  %s2354_s12 = smov %s2051_s13 }
 0x182   : > { %p10_p5 = scmp.ge.s32.totalorder %s13_s14, 4   ;;  %s2355_s13 = smov %s2357_s15 }
 0x184   :  { %12 = sbr.rel (!%p10_p5) target bundleno = 2 (0x2), region = 73 }

// kernel: gcn_weight_forward.5
= control target key start
LH: loop header
LB: loop body
LE: loop exit
PB: predicated region body
PF: predicated region fallthrough
CT: control target
= control target key end

     0   :  { %s2045_s12 = smov 0   ;;  %s2047_s13 = smov 0   ;;  %s2318_s0 = inlined_call_operand.vmem [shape: bf16[512,512], index: 0, kind: input, shape index: {}]   ;;  %s2319_s1 = inlined_call_operand.vmem [shape: bf16[512,128], index: 1, kind: input, shape index: {}]   ;;  %s2320_s2 = inlined_call_operand.vmem [shape: f32[1,128], index: 2, kind: input, shape index: {}]   ;;  %s2321_s3 = inlined_call_operand.vmem [shape: f32[512,128], index: 3, kind: output, shape index: {}]  }
   0x1   :  { %s2049_s14 = smov 0  }
   0x2 LB: > { %s25_s15 = sadd.s32 1, %s2019_s13  ;;  %p1519_p0 = scmp.ge.s32.totalorder %s2023_s14, 1  ;;  %s2023_s14 = sphi %s2049_s14, %s13_s14   ;;  %s2019_s13 = sphi %s2047_s13, %s2323_s13   ;;  %s2015_s12 = sphi %s2045_s12, %s2322_s12  }
   0x3   : > { %p27_p1 = scmp.ge.s32.totalorder %s25_s15, 2  ;;  %p169_p2 = scmp.lt.s32.totalorder %s2023_s14, 3 }
   0x5   : > { %s2325_s15 = smov (%p27_p1, %s25_s15), 0  ;;  %p170_p3 = pnand %p1519_p0, %p169_p2 }
   0x6   : > { %v1873_v0 = vld [vmem:[%s2319_s1 + $0x40] sm:$0xff] (!%p170_p3)   ;;  %v1877_v4 = vld [vmem:[%s2319_s1 + $0x48] sm:$0xff] (!%p170_p3)   ;;  %v1881_v8 = vld [vmem:[%s2319_s1 + $0x50] sm:$0xff] (!%p170_p3)   ;;  %s1520_s25 = sshll.u32 (!%p170_p3), %s2015_s12, 5 }
   0x7   : > { %173 = sbr.rel (%p170_p3) target bundleno = 383 (0x17f), region = 32  ;;  %v1874_v1 = vld [vmem:[%s2319_s1 + $0xc0] sm:$0xff] (!%p170_p3)   ;;  %1625 = vmatprep.subr.bf16.mxu0 (!%p170_p3), %v1873_v0  ;;  %v1878_v5 = vld [vmem:[%s2319_s1 + $0xc8] sm:$0xff] (!%p170_p3)   ;;  %v1882_v9 = vld [vmem:[%s2319_s1 + $0xd0] sm:$0xff] (!%p170_p3)   ;;  %p205_p4 = scmp.lt.s32.totalorder (!%p170_p3), %s1520_s25, 63 }
   0x8   : > { %v1875_v2 = vld [vmem:[%s2319_s1] sm:$0xff] (!%p170_p3)   ;;  %1737 = vmatprep.subr.bf16.mxu1 (!%p170_p3), %v1874_v1  ;;  %v1879_v6 = vld [vmem:[%s2319_s1 + $0x8] sm:$0xff] (!%p170_p3)   ;;  %v1883_v10 = vld [vmem:[%s2319_s1 + $0x10] sm:$0xff] (!%p170_p3)  }
   0x9   : > { %v1876_v3 = vld [vmem:[%s2319_s1 + $0x80] sm:$0xff] (!%p170_p3)   ;;  %1626 = vmatpush3.bf16.msra.mxu0 (!%p170_p3), %v1875_v2  ;;  %v1880_v7 = vld [vmem:[%s2319_s1 + $0x88] sm:$0xff] (!%p170_p3)   ;;  %v1884_v11 = vld [vmem:[%s2319_s1 + $0x90] sm:$0xff] (!%p170_p3)  }
   0xa   : > { %1738 = vmatpush3.bf16.msra.mxu1 (!%p170_p3), %v1876_v3  ;;  %1627 = vmatprep.subr.bf16.mxu0 (!%p170_p3), %v1877_v4  ;;  %v1885_v12 = vld [vmem:[%s2319_s1 + $0x58] sm:$0xff] (!%p170_p3)   ;;  %v1889_v16 = vld [vmem:[%s2319_s1 + $0x60] sm:$0xff] (!%p170_p3)   ;;  %v1893_v20 = vld [vmem:[%s2319_s1 + $0x68] sm:$0xff] (!%p170_p3)  }
   0xb   : > { %1739 = vmatprep.subr.bf16.mxu1 (!%p170_p3), %v1878_v5  ;;  %v1886_v13 = vld [vmem:[%s2319_s1 + $0xd8] sm:$0xff] (!%p170_p3)   ;;  %v1890_v17 = vld [vmem:[%s2319_s1 + $0xe0] sm:$0xff] (!%p170_p3)   ;;  %v1894_v21 = vld [vmem:[%s2319_s1 + $0xe8] sm:$0xff] (!%p170_p3)  }
   0xc   : > { %v1887_v14 = vld [vmem:[%s2319_s1 + $0x18] sm:$0xff] (!%p170_p3)   ;;  %v1891_v18 = vld [vmem:[%s2319_s1 + $0x20] sm:$0xff] (!%p170_p3)   ;;  %v1895_v22 = vld [vmem:[%s2319_s1 + $0x28] sm:$0xff] (!%p170_p3)  }
   0xd   : > { %1628 = vmatpush3.bf16.msra.mxu0 (!%p170_p3), %v1879_v6  ;;  %v1888_v15 = vld [vmem:[%s2319_s1 + $0x98] sm:$0xff] (!%p170_p3)   ;;  %v1892_v19 = vld [vmem:[%s2319_s1 + $0xa0] sm:$0xff] (!%p170_p3)   ;;  %v1896_v23 = vld [vmem:[%s2319_s1 + $0xa8] sm:$0xff] (!%p170_p3)  }
   0xe   : > { %1740 = vmatpush3.bf16.msra.mxu1 %v1880_v7  ;;  %1629 = vmatprep.subr.bf16.mxu0 %v1881_v8  ;;  %s2327_s25 = smov (!%p205_p4, %s1520_s25), 63  ;;  %v1897_v24 = vld [vmem:[%s2319_s1 + $0x70] sm:$0xff]   ;;  %v1901_v28 = vld [vmem:[%s2319_s1 + $0x78] sm:$0xff]  }
   0xf   : > { %1741 = vmatprep.subr.bf16.mxu1 %v1882_v9  ;;  %v1898_v25 = vld [vmem:[%s2319_s1 + $0xf0] sm:$0xff]   ;;  %s1624_s24 = sshll.u32 %s2327_s25, 4  ;;  %v1902_v29 = vld [vmem:[%s2319_s1 + $0xf8] sm:$0xff]   ;;  %s1524_s11 = sshll.u32 %s2327_s25, 3 }
  0x10   : > { %v1899_v26 = vld [vmem:[%s2319_s1 + $0x30] sm:$0xff]   ;;  %s2162_s12 = scalar_lea.vmem %s2318_s0, %s1624_s24  ;;  %v1903_v30 = vld [vmem:[%s2319_s1 + $0x38] sm:$0xff]   ;;  %s2243_s20 = scalar_lea.vmem %s2321_s3, %s1524_s11 }
  0x11   : > { %1630 = vmatpush3.bf16.msra.mxu0 %v1883_v10  ;;  %v1900_v27 = vld [vmem:[%s2319_s1 + $0xb0] sm:$0xff]   ;;  %v1904_v31 = vld [vmem:[%s2319_s1 + $0xb8] sm:$0xff]  }
  0x12   : > { %1742 = vmatpush3.bf16.msra.mxu1 %v1884_v11  ;;  %1631 = vmatprep.subr.bf16.mxu0 %v1885_v12  ;;  %v1905_v32 = vld [vmem:[%s2162_s12] ss:$16 sps:$4 sm:$0xff]   ;;  %v1907_v33 = vld [vmem:[%s2162_s12 + $0x4] ss:$16 sps:$4 sm:$0xff]   ;;  %v1908_v34 = vld [vmem:[%s2162_s12 + $0x8] ss:$16 sps:$4 sm:$0xff]  }
  0x13   : > { %1743 = vmatprep.subr.bf16.mxu1 %v1886_v13  ;;  %v1910_v35 = vld [vmem:[%s2162_s12 + $0xc] ss:$16 sps:$4 sm:$0xff]   ;;  %968 = vmatprep.mubr.bf16.mxu0 %v1907_v33  ;;  %v1911_v36 = vld [vmem:[%s2162_s12 + $0x24] ss:$16 sps:$4 sm:$0xff]   ;;  %v1915_v38 = vld [vmem:[%s2162_s12 + $0x20] ss:$16 sps:$4 sm:$0xff]  }
  0x14   : > { %1129 = vmatprep.mubr.bf16.mxu1 %v1910_v35  ;;  %v1913_v37 = vld [vmem:[%s2162_s12 + $0x2c] ss:$16 sps:$4 sm:$0xff]   ;;  %v1916_v39 = vld [vmem:[%s2162_s12 + $0x28] ss:$16 sps:$4 sm:$0xff]   ;;  %v1917_v40 = vld [vmem:[%s2162_s12 + $0x44] ss:$16 sps:$4 sm:$0xff]  }
  0x15   : > { %1632 = vmatpush3.bf16.msra.mxu0 %v1887_v14  ;;  %v1919_v41 = vld [vmem:[%s2162_s12 + $0x4c] ss:$16 sps:$4 sm:$0xff]   ;;  %v1921_v42 = vld [vmem:[%s2162_s12 + $0x40] ss:$16 sps:$4 sm:$0xff]   ;;  %v1922_v43 = vld [vmem:[%s2162_s12 + $0x48] ss:$16 sps:$4 sm:$0xff]  }
  0x16   : > { %1744 = vmatpush3.bf16.msra.mxu1 %v1888_v15  ;;  %1633 = vmatprep.subr.bf16.mxu0 %v1889_v16  ;;  %v1923_v44 = vld [vmem:[%s2162_s12 + $0x64] ss:$16 sps:$4 sm:$0xff]   ;;  %v1925_v45 = vld [vmem:[%s2162_s12 + $0x6c] ss:$16 sps:$4 sm:$0xff]   ;;  %v1927_v46 = vld [vmem:[%s2162_s12 + $0x60] ss:$16 sps:$4 sm:$0xff]  }
  0x17   : > { %1745 = vmatprep.subr.bf16.mxu1 %v1890_v17  ;;  %v1928_v47 = vld [vmem:[%s2162_s12 + $0x68] ss:$16 sps:$4 sm:$0xff]   ;;  %v1929_v48 = vld [vmem:[%s2162_s12 + $0x84] ss:$16 sps:$4 sm:$0xff]   ;;  %v1931_v49 = vld [vmem:[%s2162_s12 + $0x8c] ss:$16 sps:$4 sm:$0xff]  }
  0x18   : > { %v1933_v50 = vld [vmem:[%s2162_s12 + $0x80] ss:$16 sps:$4 sm:$0xff]   ;;  %v1934_v51 = vld [vmem:[%s2162_s12 + $0x88] ss:$16 sps:$4 sm:$0xff]   ;;  %v1935_v52 = vld [vmem:[%s2162_s12 + $0xa4] ss:$16 sps:$4 sm:$0xff]  }
  0x19   : > { %1634 = vmatpush3.bf16.msra.mxu0 %v1891_v18  ;;  %v1937_v53 = vld [vmem:[%s2162_s12 + $0xac] ss:$16 sps:$4 sm:$0xff]   ;;  %v1939_v54 = vld [vmem:[%s2162_s12 + $0xa0] ss:$16 sps:$4 sm:$0xff]   ;;  %v1940_v55 = vld [vmem:[%s2162_s12 + $0xa8] ss:$16 sps:$4 sm:$0xff]  }
  0x1a   : > { %1746 = vmatpush3.bf16.msra.mxu1 %v1892_v19  ;;  %1635 = vmatprep.subr.bf16.mxu0 %v1893_v20  ;;  %v1941_v56 = vld [vmem:[%s2162_s12 + $0xc4] ss:$16 sps:$4 sm:$0xff]   ;;  %v1943_v57 = vld [vmem:[%s2162_s12 + $0xcc] ss:$16 sps:$4 sm:$0xff]   ;;  %v1945_v58 = vld [vmem:[%s2162_s12 + $0xc0] ss:$16 sps:$4 sm:$0xff]  }
  0x1b   : > { %1747 = vmatprep.subr.bf16.mxu1 %v1894_v21  ;;  %v1946_v59 = vld [vmem:[%s2162_s12 + $0xc8] ss:$16 sps:$4 sm:$0xff]   ;;  %v1947_v60 = vld [vmem:[%s2162_s12 + $0xe4] ss:$16 sps:$4 sm:$0xff]   ;;  %v1949_v61 = vld [vmem:[%s2162_s12 + $0xec] ss:$16 sps:$4 sm:$0xff]  }
  0x1c   : > { %v1951_v62 = vld [vmem:[%s2162_s12 + $0xe0] ss:$16 sps:$4 sm:$0xff]   ;;  %v1952_v63 = vld [vmem:[%s2162_s12 + $0xe8] ss:$16 sps:$4 sm:$0xff]   ;;  %v1953_v0 = vld [vmem:[%s2162_s12 + $0x104] ss:$16 sps:$4 sm:$0xff]  }
  0x1d   : > { %1636 = vmatpush3.bf16.msra.mxu0 %v1895_v22  ;;  %v1955_v1 = vld [vmem:[%s2162_s12 + $0x10c] ss:$16 sps:$4 sm:$0xff]   ;;  %v1957_v2 = vld [vmem:[%s2162_s12 + $0x100] ss:$16 sps:$4 sm:$0xff]   ;;  %v1958_v3 = vld [vmem:[%s2162_s12 + $0x108] ss:$16 sps:$4 sm:$0xff]  }
  0x1e   : > { %1748 = vmatpush3.bf16.msra.mxu1 %v1896_v23  ;;  %1637 = vmatprep.subr.bf16.mxu0 %v1897_v24  ;;  %v1959_v4 = vld [vmem:[%s2162_s12 + $0x124] ss:$16 sps:$4 sm:$0xff]   ;;  %v1961_v5 = vld [vmem:[%s2162_s12 + $0x12c] ss:$16 sps:$4 sm:$0xff]   ;;  %v1963_v6 = vld [vmem:[%s2162_s12 + $0x120] ss:$16 sps:$4 sm:$0xff]  }
  0x1f   : > { %1749 = vmatprep.subr.bf16.mxu1 %v1898_v25  ;;  %v1964_v7 = vld [vmem:[%s2162_s12 + $0x128] ss:$16 sps:$4 sm:$0xff]   ;;  %v1965_v8 = vld [vmem:[%s2162_s12 + $0x144] ss:$16 sps:$4 sm:$0xff]   ;;  %v1967_v9 = vld [vmem:[%s2162_s12 + $0x14c] ss:$16 sps:$4 sm:$0xff]  }
  0x20   : > { %v1969_v10 = vld [vmem:[%s2162_s12 + $0x140] ss:$16 sps:$4 sm:$0xff]   ;;  %v1970_v11 = vld [vmem:[%s2162_s12 + $0x148] ss:$16 sps:$4 sm:$0xff]   ;;  %v1971_v12 = vld [vmem:[%s2162_s12 + $0x164] ss:$16 sps:$4 sm:$0xff]  }
  0x21   : > { %1638 = vmatpush3.bf16.msra.mxu0 %v1899_v26  ;;  %v1973_v13 = vld [vmem:[%s2162_s12 + $0x16c] ss:$16 sps:$4 sm:$0xff]   ;;  %v1975_v14 = vld [vmem:[%s2162_s12 + $0x160] ss:$16 sps:$4 sm:$0xff]   ;;  %v1976_v15 = vld [vmem:[%s2162_s12 + $0x168] ss:$16 sps:$4 sm:$0xff]  }
  0x22   : > { %1750 = vmatpush3.bf16.msra.mxu1 %v1900_v27  ;;  %1639 = vmatprep.subr.bf16.mxu0 %v1901_v28  ;;  %v1977_v16 = vld [vmem:[%s2162_s12 + $0x184] ss:$16 sps:$4 sm:$0xff]   ;;  %v1979_v17 = vld [vmem:[%s2162_s12 + $0x18c] ss:$16 sps:$4 sm:$0xff]   ;;  %v1981_v18 = vld [vmem:[%s2162_s12 + $0x180] ss:$16 sps:$4 sm:$0xff]  }
  0x23   : > { %1751 = vmatprep.subr.bf16.mxu1 %v1902_v29  ;;  %v1982_v19 = vld [vmem:[%s2162_s12 + $0x188] ss:$16 sps:$4 sm:$0xff]   ;;  %v1983_v20 = vld [vmem:[%s2162_s12 + $0x1a4] ss:$16 sps:$4 sm:$0xff]   ;;  %v1985_v21 = vld [vmem:[%s2162_s12 + $0x1ac] ss:$16 sps:$4 sm:$0xff]  }
  0x24   : > { %v1987_v22 = vld [vmem:[%s2162_s12 + $0x1a0] ss:$16 sps:$4 sm:$0xff]   ;;  %v1988_v23 = vld [vmem:[%s2162_s12 + $0x1a8] ss:$16 sps:$4 sm:$0xff]   ;;  %v1989_v24 = vld [vmem:[%s2162_s12 + $0x1c4] ss:$16 sps:$4 sm:$0xff]  }
  0x25   : > { %1640 = vmatpush3.bf16.msra.mxu0 %v1903_v30  ;;  %v1991_v25 = vld [vmem:[%s2162_s12 + $0x1cc] ss:$16 sps:$4 sm:$0xff]   ;;  %v1993_v26 = vld [vmem:[%s2162_s12 + $0x1c0] ss:$16 sps:$4 sm:$0xff]   ;;  %v1994_v27 = vld [vmem:[%s2162_s12 + $0x1c8] ss:$16 sps:$4 sm:$0xff]  }
  0x26   : > { %1752 = vmatpush3.bf16.msra.mxu1 %v1904_v31  ;;  %v1995_v28 = vld [vmem:[%s2162_s12 + $0x1e4] ss:$16 sps:$4 sm:$0xff]   ;;  %v1997_v29 = vld [vmem:[%s2162_s12 + $0x1ec] ss:$16 sps:$4 sm:$0xff]   ;;  %v1999_v30 = vld [vmem:[%s2162_s12 + $0x1e0] ss:$16 sps:$4 sm:$0xff]  }
  0x27   : > { %v2000_v31 = vld [vmem:[%s2162_s12 + $0x1e8] ss:$16 sps:$4 sm:$0xff]  }
  0x28   : > { %969 = vmatmul.mubr.bf16.vlgmr.msra.gmra.mrb[0].mxu0 %v1905_v32 }
  0x29   : > { %1130 = vmatmul.mubr.bf16.vlgmr.msra.gmra.mrb[0].mxu1 %v1908_v34  ;;  %976 = vmatprep.mubr.bf16.mxu0 %v1911_v36 }
  0x2a   : > { %1137 = vmatprep.mubr.bf16.mxu1 %v1913_v37 }
  0x30   : > { %977 = vmatmul.mubr.bf16.gmra.mrb[4].mxu0 %v1915_v38 }
  0x31   : > { %1138 = vmatmul.mubr.bf16.gmra.mrb[4].mxu1 %v1916_v39  ;;  %984 = vmatprep.mubr.bf16.mxu0 %v1917_v40 }
  0x32   : > { %1145 = vmatprep.mubr.bf16.mxu1 %v1919_v41  ;;  %v2238_v41 = vld [vmem:[%s2320_s2] ss:$0 sm:$0xff] }
  0x38   : > { %985 = vmatmul.mubr.bf16.gmra.mrb[8].mxu0 %v1921_v42 }
  0x39   : > { %1146 = vmatmul.mubr.bf16.gmra.mrb[8].mxu1 %v1922_v43  ;;  %992 = vmatprep.mubr.bf16.mxu0 %v1923_v44 }
  0x3a   : > { %1153 = vmatprep.mubr.bf16.mxu1 %v1925_v45 }
  0x40   : > { %993 = vmatmul.mubr.bf16.gmra.mrb[12].mxu0 %v1927_v46 }
  0x41   : > { %1154 = vmatmul.mubr.bf16.gmra.mrb[12].mxu1 %v1928_v47  ;;  %1000 = vmatprep.mubr.bf16.mxu0 %v1929_v48 }
  0x42   : > { %1161 = vmatprep.mubr.bf16.mxu1 %v1931_v49 }
  0x48   : > { %1001 = vmatmul.mubr.bf16.gmra.mrb[16].mxu0 %v1933_v50 }
  0x49   : > { %1162 = vmatmul.mubr.bf16.gmra.mrb[16].mxu1 %v1934_v51  ;;  %1008 = vmatprep.mubr.bf16.mxu0 %v1935_v52 }
  0x4a   : > { %1169 = vmatprep.mubr.bf16.mxu1 %v1937_v53 }
  0x50   : > { %1009 = vmatmul.mubr.bf16.gmra.mrb[20].mxu0 %v1939_v54 }
  0x51   : > { %1170 = vmatmul.mubr.bf16.gmra.mrb[20].mxu1 %v1940_v55  ;;  %1016 = vmatprep.mubr.bf16.mxu0 %v1941_v56 }
  0x52   : > { %1177 = vmatprep.mubr.bf16.mxu1 %v1943_v57 }
  0x58   : > { %1017 = vmatmul.mubr.bf16.gmra.mrb[24].mxu0 %v1945_v58 }
  0x59   : > { %1178 = vmatmul.mubr.bf16.gmra.mrb[24].mxu1 %v1946_v59  ;;  %1024 = vmatprep.mubr.bf16.mxu0 %v1947_v60 }
  0x5a   : > { %1185 = vmatprep.mubr.bf16.mxu1 %v1949_v61 }
  0x60   : > { %1025 = vmatmul.mubr.bf16.gmra.mrb[28].mxu0 %v1951_v62 }
  0x61   : > { %1186 = vmatmul.mubr.bf16.gmra.mrb[28].mxu1 %v1952_v63  ;;  %1032 = vmatprep.mubr.bf16.mxu0 %v1953_v0 }
  0x62   : > { %1193 = vmatprep.mubr.bf16.mxu1 %v1955_v1 }
  0x68   : > { %1033 = vmatmul.mubr.bf16.gmra.mrb[32].mxu0 %v1957_v2 }
  0x69   : > { %1194 = vmatmul.mubr.bf16.gmra.mrb[32].mxu1 %v1958_v3  ;;  %1040 = vmatprep.mubr.bf16.mxu0 %v1959_v4 }
  0x6a   : > { %1201 = vmatprep.mubr.bf16.mxu1 %v1961_v5 }
  0x70   : > { %1041 = vmatmul.mubr.bf16.gmra.mrb[36].mxu0 %v1963_v6 }
  0x71   : > { %1202 = vmatmul.mubr.bf16.gmra.mrb[36].mxu1 %v1964_v7  ;;  %1048 = vmatprep.mubr.bf16.mxu0 %v1965_v8 }
  0x72   : > { %1209 = vmatprep.mubr.bf16.mxu1 %v1967_v9 }
  0x78   : > { %1049 = vmatmul.mubr.bf16.gmra.mrb[40].mxu0 %v1969_v10 }
  0x79   : > { %1210 = vmatmul.mubr.bf16.gmra.mrb[40].mxu1 %v1970_v11  ;;  %1056 = vmatprep.mubr.bf16.mxu0 %v1971_v12 }
  0x7a   : > { %1217 = vmatprep.mubr.bf16.mxu1 %v1973_v13 }
  0x80   : > { %1057 = vmatmul.mubr.bf16.gmra.mrb[44].mxu0 %v1975_v14 }
  0x81   : > { %1218 = vmatmul.mubr.bf16.gmra.mrb[44].mxu1 %v1976_v15  ;;  %1064 = vmatprep.mubr.bf16.mxu0 %v1977_v16 }
  0x82   : > { %1225 = vmatprep.mubr.bf16.mxu1 %v1979_v17 }
  0x88   : > { %1065 = vmatmul.mubr.bf16.gmra.mrb[48].mxu0 %v1981_v18 }
  0x89   : > { %1226 = vmatmul.mubr.bf16.gmra.mrb[48].mxu1 %v1982_v19  ;;  %1072 = vmatprep.mubr.bf16.mxu0 %v1983_v20 }
  0x8a   : > { %1233 = vmatprep.mubr.bf16.mxu1 %v1985_v21 }
  0x90   : > { %1073 = vmatmul.mubr.bf16.gmra.mrb[52].mxu0 %v1987_v22 }
  0x91   : > { %1234 = vmatmul.mubr.bf16.gmra.mrb[52].mxu1 %v1988_v23  ;;  %1080 = vmatprep.mubr.bf16.mxu0 %v1989_v24 }
  0x92   : > { %1241 = vmatprep.mubr.bf16.mxu1 %v1991_v25 }
  0x98   : > { %1081 = vmatmul.mubr.bf16.gmra.mrb[56].mxu0 %v1993_v26 }
  0x99   : > { %1242 = vmatmul.mubr.bf16.gmra.mrb[56].mxu1 %v1994_v27  ;;  %1088 = vmatprep.mubr.bf16.mxu0 %v1995_v28 }
  0x9a   : > { %1249 = vmatprep.mubr.bf16.mxu1 %v1997_v29 }
  0xa0   : > { %1089 = vmatmul.mubr.bf16.gmra.mrb[60].mxu0 %v1999_v30 }
  0xa1   : > { %1250 = vmatmul.mubr.bf16.gmra.mrb[60].mxu1 %v2000_v31 }
  0xfb   : > { %v1641_v32 = vpop.f32.mrb[0].mxu0 }
  0xfc   : > { %v1753_v33 = vpop.f32.mrb[0].mxu1  ;;  %v1642_v34 = vpop.f32.mrb[1].mxu0 }
  0xfd   : > { %v1643_v35 = vadd.f32 %v1642_v34, %v1641_v32  ;;  %v1754_v36 = vpop.f32.mrb[1].mxu1  ;;  %v1644_v37 = vpop.f32.mrb[2].mxu0 }
  0xfe   : > { %v1755_v38 = vadd.f32 %v1754_v36, %v1753_v33  ;;  %v1756_v39 = vpop.f32.mrb[2].mxu1  ;;  %v1645_v40 = vpop.f32.mrb[3].mxu0 }
  0xff   : > { %v1646_v42 = vadd.f32 %v1645_v40, %v1644_v37  ;;  %v1757_v43 = vpop.f32.mrb[3].mxu1 }
 0x100   : > { %v1132_v44 = vadd.f32 %v1755_v38, %v1643_v35  ;;  %v1758_v45 = vadd.f32 %v1757_v43, %v1756_v39 }
 0x102   : > { %v1364_v46 = vadd.f32 %v2238_v41, %v1132_v44  ;;  %v1135_v47 = vadd.f32 %v1758_v45, %v1646_v42 }
 0x103   : > { %v1647_v48 = vpop.f32.mrb[4].mxu0 }
 0x104   : > { %1396 = vst [vmem:[%s2243_s20] sm:$0xff] %v1364_v46  ;;  %v1365_v49 = vadd.f32 %v2238_v41, %v1135_v47  ;;  %v1759_v50 = vpop.f32.mrb[4].mxu1  ;;  %v1648_v51 = vpop.f32.mrb[5].mxu0 }
 0x105   : > { %v1649_v52 = vadd.f32 %v1648_v51, %v1647_v48  ;;  %v1760_v53 = vpop.f32.mrb[5].mxu1  ;;  %v1650_v54 = vpop.f32.mrb[6].mxu0 }
 0x106   : > { %1397 = vst [vmem:[%s2243_s20 + $0x8] sm:$0xff] %v1365_v49  ;;  %v1761_v55 = vadd.f32 %v1760_v53, %v1759_v50  ;;  %v1762_v56 = vpop.f32.mrb[6].mxu1  ;;  %v1651_v57 = vpop.f32.mrb[7].mxu0 }
 0x107   : > { %v1652_v58 = vadd.f32 %v1651_v57, %v1650_v54  ;;  %v1763_v59 = vpop.f32.mrb[7].mxu1 }
 0x108   : > { %v1140_v60 = vadd.f32 %v1761_v55, %v1649_v52  ;;  %v1764_v61 = vadd.f32 %v1763_v59, %v1762_v56 }
 0x10a   : > { %v1366_v62 = vadd.f32 %v2238_v41, %v1140_v60  ;;  %v1143_v63 = vadd.f32 %v1764_v61, %v1652_v58 }
 0x10b   : > { %v1653_v0 = vpop.f32.mrb[8].mxu0 }
 0x10c   : > { %1398 = vst [vmem:[%s2243_s20 + $0x10] sm:$0xff] %v1366_v62  ;;  %v1367_v1 = vadd.f32 %v2238_v41, %v1143_v63  ;;  %v1765_v2 = vpop.f32.mrb[8].mxu1  ;;  %v1654_v3 = vpop.f32.mrb[9].mxu0 }
 0x10d   : > { %v1655_v4 = vadd.f32 %v1654_v3, %v1653_v0  ;;  %v1766_v5 = vpop.f32.mrb[9].mxu1  ;;  %v1656_v6 = vpop.f32.mrb[10].mxu0 }
 0x10e   : > { %1399 = vst [vmem:[%s2243_s20 + $0x18] sm:$0xff] %v1367_v1  ;;  %v1767_v7 = vadd.f32 %v1766_v5, %v1765_v2  ;;  %v1768_v8 = vpop.f32.mrb[10].mxu1  ;;  %v1657_v9 = vpop.f32.mrb[11].mxu0 }
 0x10f   : > { %v1658_v10 = vadd.f32 %v1657_v9, %v1656_v6  ;;  %v1769_v11 = vpop.f32.mrb[11].mxu1 }
 0x110   : > { %v1148_v12 = vadd.f32 %v1767_v7, %v1655_v4  ;;  %v1770_v13 = vadd.f32 %v1769_v11, %v1768_v8 }
 0x112   : > { %v1368_v14 = vadd.f32 %v2238_v41, %v1148_v12  ;;  %v1151_v15 = vadd.f32 %v1770_v13, %v1658_v10 }
 0x113   : > { %v1659_v16 = vpop.f32.mrb[12].mxu0 }
 0x114   : > { %1400 = vst [vmem:[%s2243_s20 + $0x20] sm:$0xff] %v1368_v14  ;;  %v1369_v17 = vadd.f32 %v2238_v41, %v1151_v15  ;;  %v1771_v18 = vpop.f32.mrb[12].mxu1  ;;  %v1660_v19 = vpop.f32.mrb[13].mxu0 }
 0x115   : > { %v1661_v20 = vadd.f32 %v1660_v19, %v1659_v16  ;;  %v1772_v21 = vpop.f32.mrb[13].mxu1  ;;  %v1662_v22 = vpop.f32.mrb[14].mxu0 }
 0x116   : > { %1401 = vst [vmem:[%s2243_s20 + $0x28] sm:$0xff] %v1369_v17  ;;  %v1773_v23 = vadd.f32 %v1772_v21, %v1771_v18  ;;  %v1774_v24 = vpop.f32.mrb[14].mxu1  ;;  %v1663_v25 = vpop.f32.mrb[15].mxu0 }
 0x117   : > { %v1664_v26 = vadd.f32 %v1663_v25, %v1662_v22  ;;  %v1775_v27 = vpop.f32.mrb[15].mxu1 }
 0x118   : > { %v1156_v28 = vadd.f32 %v1773_v23, %v1661_v20  ;;  %v1776_v29 = vadd.f32 %v1775_v27, %v1774_v24 }
 0x11a   : > { %v1370_v30 = vadd.f32 %v2238_v41, %v1156_v28  ;;  %v1159_v31 = vadd.f32 %v1776_v29, %v1664_v26 }
 0x11b   : > { %v1665_v32 = vpop.f32.mrb[16].mxu0 }
 0x11c   : > { %1402 = vst [vmem:[%s2243_s20 + $0x30] sm:$0xff] %v1370_v30  ;;  %v1371_v33 = vadd.f32 %v2238_v41, %v1159_v31  ;;  %v1777_v34 = vpop.f32.mrb[16].mxu1  ;;  %v1666_v35 = vpop.f32.mrb[17].mxu0 }
 0x11d   : > { %v1667_v36 = vadd.f32 %v1666_v35, %v1665_v32  ;;  %v1778_v37 = vpop.f32.mrb[17].mxu1  ;;  %v1668_v38 = vpop.f32.mrb[18].mxu0 }
 0x11e   : > { %1403 = vst [vmem:[%s2243_s20 + $0x38] sm:$0xff] %v1371_v33  ;;  %v1779_v39 = vadd.f32 %v1778_v37, %v1777_v34  ;;  %v1780_v40 = vpop.f32.mrb[18].mxu1  ;;  %v1669_v42 = vpop.f32.mrb[19].mxu0 }
 0x11f   : > { %v1670_v43 = vadd.f32 %v1669_v42, %v1668_v38  ;;  %v1781_v44 = vpop.f32.mrb[19].mxu1 }
 0x120   : > { %v1164_v45 = vadd.f32 %v1779_v39, %v1667_v36  ;;  %v1782_v46 = vadd.f32 %v1781_v44, %v1780_v40 }
 0x122   : > { %v1372_v47 = vadd.f32 %v2238_v41, %v1164_v45  ;;  %v1167_v48 = vadd.f32 %v1782_v46, %v1670_v43 }
 0x123   : > { %v1671_v49 = vpop.f32.mrb[20].mxu0 }
 0x124   : > { %1404 = vst [vmem:[%s2243_s20 + $0x40] sm:$0xff] %v1372_v47  ;;  %v1373_v50 = vadd.f32 %v2238_v41, %v1167_v48  ;;  %v1783_v51 = vpop.f32.mrb[20].mxu1  ;;  %v1672_v52 = vpop.f32.mrb[21].mxu0 }
 0x125   : > { %v1673_v53 = vadd.f32 %v1672_v52, %v1671_v49  ;;  %v1784_v54 = vpop.f32.mrb[21].mxu1  ;;  %v1674_v55 = vpop.f32.mrb[22].mxu0 }
 0x126   : > { %1405 = vst [vmem:[%s2243_s20 + $0x48] sm:$0xff] %v1373_v50  ;;  %v1785_v56 = vadd.f32 %v1784_v54, %v1783_v51  ;;  %v1786_v57 = vpop.f32.mrb[22].mxu1  ;;  %v1675_v58 = vpop.f32.mrb[23].mxu0 }
 0x127   : > { %v1676_v59 = vadd.f32 %v1675_v58, %v1674_v55  ;;  %v1787_v60 = vpop.f32.mrb[23].mxu1 }
 0x128   : > { %v1172_v61 = vadd.f32 %v1785_v56, %v1673_v53  ;;  %v1788_v62 = vadd.f32 %v1787_v60, %v1786_v57 }
 0x12a   : > { %v1374_v63 = vadd.f32 %v2238_v41, %v1172_v61  ;;  %v1175_v0 = vadd.f32 %v1788_v62, %v1676_v59 }
 0x12b   : > { %v1677_v1 = vpop.f32.mrb[24].mxu0 }
 0x12c   : > { %1406 = vst [vmem:[%s2243_s20 + $0x50] sm:$0xff] %v1374_v63  ;;  %v1375_v2 = vadd.f32 %v2238_v41, %v1175_v0  ;;  %v1789_v3 = vpop.f32.mrb[24].mxu1  ;;  %v1678_v4 = vpop.f32.mrb[25].mxu0 }
 0x12d   : > { %v1679_v5 = vadd.f32 %v1678_v4, %v1677_v1  ;;  %v1790_v6 = vpop.f32.mrb[25].mxu1  ;;  %v1680_v7 = vpop.f32.mrb[26].mxu0 }
 0x12e   : > { %1407 = vst [vmem:[%s2243_s20 + $0x58] sm:$0xff] %v1375_v2  ;;  %v1791_v8 = vadd.f32 %v1790_v6, %v1789_v3  ;;  %v1792_v9 = vpop.f32.mrb[26].mxu1  ;;  %v1681_v10 = vpop.f32.mrb[27].mxu0 }
 0x12f   : > { %v1682_v11 = vadd.f32 %v1681_v10, %v1680_v7  ;;  %v1793_v12 = vpop.f32.mrb[27].mxu1 }
 0x130   : > { %v1180_v13 = vadd.f32 %v1791_v8, %v1679_v5  ;;  %v1794_v14 = vadd.f32 %v1793_v12, %v1792_v9 }
 0x132   : > { %v1376_v15 = vadd.f32 %v2238_v41, %v1180_v13  ;;  %v1183_v16 = vadd.f32 %v1794_v14, %v1682_v11 }
 0x133   : > { %v1683_v17 = vpop.f32.mrb[28].mxu0 }
 0x134   : > { %1408 = vst [vmem:[%s2243_s20 + $0x60] sm:$0xff] %v1376_v15  ;;  %v1377_v18 = vadd.f32 %v2238_v41, %v1183_v16  ;;  %v1795_v19 = vpop.f32.mrb[28].mxu1  ;;  %v1684_v20 = vpop.f32.mrb[29].mxu0 }
 0x135   : > { %v1685_v21 = vadd.f32 %v1684_v20, %v1683_v17  ;;  %v1796_v22 = vpop.f32.mrb[29].mxu1  ;;  %v1686_v23 = vpop.f32.mrb[30].mxu0 }
 0x136   : > { %1409 = vst [vmem:[%s2243_s20 + $0x68] sm:$0xff] %v1377_v18  ;;  %v1797_v24 = vadd.f32 %v1796_v22, %v1795_v19  ;;  %v1798_v25 = vpop.f32.mrb[30].mxu1  ;;  %v1687_v26 = vpop.f32.mrb[31].mxu0 }
 0x137   : > { %v1688_v27 = vadd.f32 %v1687_v26, %v1686_v23  ;;  %v1799_v28 = vpop.f32.mrb[31].mxu1 }
 0x138   : > { %v1188_v29 = vadd.f32 %v1797_v24, %v1685_v21  ;;  %v1800_v30 = vadd.f32 %v1799_v28, %v1798_v25 }
 0x13a   : > { %v1378_v31 = vadd.f32 %v2238_v41, %v1188_v29  ;;  %v1191_v32 = vadd.f32 %v1800_v30, %v1688_v27 }
 0x13b   : > { %v1689_v33 = vpop.f32.mrb[32].mxu0 }
 0x13c   : > { %1410 = vst [vmem:[%s2243_s20 + $0x70] sm:$0xff] %v1378_v31  ;;  %v1379_v34 = vadd.f32 %v2238_v41, %v1191_v32  ;;  %v1801_v35 = vpop.f32.mrb[32].mxu1  ;;  %v1690_v36 = vpop.f32.mrb[33].mxu0 }
 0x13d   : > { %v1691_v37 = vadd.f32 %v1690_v36, %v1689_v33  ;;  %v1802_v38 = vpop.f32.mrb[33].mxu1  ;;  %v1692_v39 = vpop.f32.mrb[34].mxu0 }
 0x13e   : > { %1411 = vst [vmem:[%s2243_s20 + $0x78] sm:$0xff] %v1379_v34  ;;  %v1803_v40 = vadd.f32 %v1802_v38, %v1801_v35  ;;  %v1804_v42 = vpop.f32.mrb[34].mxu1  ;;  %v1693_v43 = vpop.f32.mrb[35].mxu0 }
 0x13f   : > { %v1694_v44 = vadd.f32 %v1693_v43, %v1692_v39  ;;  %v1805_v45 = vpop.f32.mrb[35].mxu1 }
 0x140   : > { %v1196_v46 = vadd.f32 %v1803_v40, %v1691_v37  ;;  %v1806_v47 = vadd.f32 %v1805_v45, %v1804_v42 }
 0x142   : > { %v1380_v48 = vadd.f32 %v2238_v41, %v1196_v46  ;;  %v1199_v49 = vadd.f32 %v1806_v47, %v1694_v44 }
 0x143   : > { %v1695_v50 = vpop.f32.mrb[36].mxu0 }
 0x144   : > { %1412 = vst [vmem:[%s2243_s20 + $0x80] sm:$0xff] %v1380_v48  ;;  %v1381_v51 = vadd.f32 %v2238_v41, %v1199_v49  ;;  %v1807_v52 = vpop.f32.mrb[36].mxu1  ;;  %v1696_v53 = vpop.f32.mrb[37].mxu0 }
 0x145   : > { %v1697_v54 = vadd.f32 %v1696_v53, %v1695_v50  ;;  %v1808_v55 = vpop.f32.mrb[37].mxu1  ;;  %v1698_v56 = vpop.f32.mrb[38].mxu0 }
 0x146   : > { %1413 = vst [vmem:[%s2243_s20 + $0x88] sm:$0xff] %v1381_v51  ;;  %v1809_v57 = vadd.f32 %v1808_v55, %v1807_v52  ;;  %v1810_v58 = vpop.f32.mrb[38].mxu1  ;;  %v1699_v59 = vpop.f32.mrb[39].mxu0 }
 0x147   : > { %v1700_v60 = vadd.f32 %v1699_v59, %v1698_v56  ;;  %v1811_v61 = vpop.f32.mrb[39].mxu1 }
 0x148   : > { %v1204_v62 = vadd.f32 %v1809_v57, %v1697_v54  ;;  %v1812_v63 = vadd.f32 %v1811_v61, %v1810_v58 }
 0x14a   : > { %v1382_v0 = vadd.f32 %v2238_v41, %v1204_v62  ;;  %v1207_v1 = vadd.f32 %v1812_v63, %v1700_v60 }
 0x14b   : > { %v1701_v2 = vpop.f32.mrb[40].mxu0 }
 0x14c   : > { %1414 = vst [vmem:[%s2243_s20 + $0x90] sm:$0xff] %v1382_v0  ;;  %v1383_v3 = vadd.f32 %v2238_v41, %v1207_v1  ;;  %v1813_v4 = vpop.f32.mrb[40].mxu1  ;;  %v1702_v5 = vpop.f32.mrb[41].mxu0 }
 0x14d   : > { %v1703_v6 = vadd.f32 %v1702_v5, %v1701_v2  ;;  %v1814_v7 = vpop.f32.mrb[41].mxu1  ;;  %v1704_v8 = vpop.f32.mrb[42].mxu0 }
 0x14e   : > { %1415 = vst [vmem:[%s2243_s20 + $0x98] sm:$0xff] %v1383_v3  ;;  %v1815_v9 = vadd.f32 %v1814_v7, %v1813_v4  ;;  %v1816_v10 = vpop.f32.mrb[42].mxu1  ;;  %v1705_v11 = vpop.f32.mrb[43].mxu0 }
 0x14f   : > { %v1706_v12 = vadd.f32 %v1705_v11, %v1704_v8  ;;  %v1817_v13 = vpop.f32.mrb[43].mxu1 }
 0x150   : > { %v1212_v14 = vadd.f32 %v1815_v9, %v1703_v6  ;;  %v1818_v15 = vadd.f32 %v1817_v13, %v1816_v10 }
 0x152   : > { %v1384_v16 = vadd.f32 %v2238_v41, %v1212_v14  ;;  %v1215_v17 = vadd.f32 %v1818_v15, %v1706_v12 }
 0x153   : > { %v1707_v18 = vpop.f32.mrb[44].mxu0 }
 0x154   : > { %1416 = vst [vmem:[%s2243_s20 + $0xa0] sm:$0xff] %v1384_v16  ;;  %v1385_v19 = vadd.f32 %v2238_v41, %v1215_v17  ;;  %v1819_v20 = vpop.f32.mrb[44].mxu1  ;;  %v1708_v21 = vpop.f32.mrb[45].mxu0 }
 0x155   : > { %v1709_v22 = vadd.f32 %v1708_v21, %v1707_v18  ;;  %v1820_v23 = vpop.f32.mrb[45].mxu1  ;;  %v1710_v24 = vpop.f32.mrb[46].mxu0 }
 0x156   : > { %1417 = vst [vmem:[%s2243_s20 + $0xa8] sm:$0xff] %v1385_v19  ;;  %v1821_v25 = vadd.f32 %v1820_v23, %v1819_v20  ;;  %v1822_v26 = vpop.f32.mrb[46].mxu1  ;;  %v1711_v27 = vpop.f32.mrb[47].mxu0 }
 0x157   : > { %v1712_v28 = vadd.f32 %v1711_v27, %v1710_v24  ;;  %v1823_v29 = vpop.f32.mrb[47].mxu1 }
 0x158   : > { %v1220_v30 = vadd.f32 %v1821_v25, %v1709_v22  ;;  %v1824_v31 = vadd.f32 %v1823_v29, %v1822_v26 }
 0x15a   : > { %v1386_v32 = vadd.f32 %v2238_v41, %v1220_v30  ;;  %v1223_v33 = vadd.f32 %v1824_v31, %v1712_v28 }
 0x15b   : > { %v1713_v34 = vpop.f32.mrb[48].mxu0 }
 0x15c   : > { %1418 = vst [vmem:[%s2243_s20 + $0xb0] sm:$0xff] %v1386_v32  ;;  %v1387_v35 = vadd.f32 %v2238_v41, %v1223_v33  ;;  %v1825_v36 = vpop.f32.mrb[48].mxu1  ;;  %v1714_v37 = vpop.f32.mrb[49].mxu0 }
 0x15d   : > { %v1715_v38 = vadd.f32 %v1714_v37, %v1713_v34  ;;  %v1826_v39 = vpop.f32.mrb[49].mxu1  ;;  %v1716_v40 = vpop.f32.mrb[50].mxu0 }
 0x15e   : > { %1419 = vst [vmem:[%s2243_s20 + $0xb8] sm:$0xff] %v1387_v35  ;;  %v1827_v42 = vadd.f32 %v1826_v39, %v1825_v36  ;;  %v1828_v43 = vpop.f32.mrb[50].mxu1  ;;  %v1717_v44 = vpop.f32.mrb[51].mxu0 }
 0x15f   : > { %v1718_v45 = vadd.f32 %v1717_v44, %v1716_v40  ;;  %v1829_v46 = vpop.f32.mrb[51].mxu1 }
 0x160   : > { %v1228_v47 = vadd.f32 %v1827_v42, %v1715_v38  ;;  %v1830_v48 = vadd.f32 %v1829_v46, %v1828_v43 }
 0x162   : > { %v1388_v49 = vadd.f32 %v2238_v41, %v1228_v47  ;;  %v1231_v50 = vadd.f32 %v1830_v48, %v1718_v45 }
 0x163   : > { %v1719_v51 = vpop.f32.mrb[52].mxu0 }
 0x164   : > { %1420 = vst [vmem:[%s2243_s20 + $0xc0] sm:$0xff] %v1388_v49  ;;  %v1389_v52 = vadd.f32 %v2238_v41, %v1231_v50  ;;  %v1831_v53 = vpop.f32.mrb[52].mxu1  ;;  %v1720_v54 = vpop.f32.mrb[53].mxu0 }
 0x165   : > { %v1721_v55 = vadd.f32 %v1720_v54, %v1719_v51  ;;  %v1832_v56 = vpop.f32.mrb[53].mxu1  ;;  %v1722_v57 = vpop.f32.mrb[54].mxu0 }
 0x166   : > { %1421 = vst [vmem:[%s2243_s20 + $0xc8] sm:$0xff] %v1389_v52  ;;  %v1833_v58 = vadd.f32 %v1832_v56, %v1831_v53  ;;  %v1834_v59 = vpop.f32.mrb[54].mxu1  ;;  %v1723_v60 = vpop.f32.mrb[55].mxu0 }
 0x167   : > { %v1724_v61 = vadd.f32 %v1723_v60, %v1722_v57  ;;  %v1835_v62 = vpop.f32.mrb[55].mxu1 }
 0x168   : > { %v1236_v63 = vadd.f32 %v1833_v58, %v1721_v55  ;;  %v1836_v0 = vadd.f32 %v1835_v62, %v1834_v59 }
 0x16a   : > { %v1390_v1 = vadd.f32 %v2238_v41, %v1236_v63  ;;  %v1239_v2 = vadd.f32 %v1836_v0, %v1724_v61 }
 0x16b   : > { %v1725_v3 = vpop.f32.mrb[56].mxu0 }
 0x16c   : > { %1422 = vst [vmem:[%s2243_s20 + $0xd0] sm:$0xff] %v1390_v1  ;;  %v1391_v4 = vadd.f32 %v2238_v41, %v1239_v2  ;;  %v1837_v5 = vpop.f32.mrb[56].mxu1  ;;  %v1726_v6 = vpop.f32.mrb[57].mxu0 }
 0x16d   : > { %v1727_v7 = vadd.f32 %v1726_v6, %v1725_v3  ;;  %v1838_v8 = vpop.f32.mrb[57].mxu1  ;;  %v1728_v9 = vpop.f32.mrb[58].mxu0 }
 0x16e   : > { %1423 = vst [vmem:[%s2243_s20 + $0xd8] sm:$0xff] %v1391_v4  ;;  %v1839_v10 = vadd.f32 %v1838_v8, %v1837_v5  ;;  %v1840_v11 = vpop.f32.mrb[58].mxu1  ;;  %v1729_v12 = vpop.f32.mrb[59].mxu0 }
 0x16f   : > { %v1730_v13 = vadd.f32 %v1729_v12, %v1728_v9  ;;  %v1841_v14 = vpop.f32.mrb[59].mxu1 }
 0x170   : > { %v1244_v15 = vadd.f32 %v1839_v10, %v1727_v7  ;;  %v1842_v16 = vadd.f32 %v1841_v14, %v1840_v11 }
 0x172   : > { %v1392_v17 = vadd.f32 %v2238_v41, %v1244_v15  ;;  %v1247_v18 = vadd.f32 %v1842_v16, %v1730_v13 }
 0x173   : > { %v1731_v19 = vpop.f32.mrb[60].mxu0 }
 0x174   : > { %1424 = vst [vmem:[%s2243_s20 + $0xe0] sm:$0xff] %v1392_v17  ;;  %v1393_v20 = vadd.f32 %v2238_v41, %v1247_v18  ;;  %v1843_v21 = vpop.f32.mrb[60].mxu1  ;;  %v1732_v22 = vpop.f32.mrb[61].mxu0 }
 0x175   : > { %v1733_v23 = vadd.f32 %v1732_v22, %v1731_v19  ;;  %v1844_v24 = vpop.f32.mrb[61].mxu1  ;;  %v1734_v25 = vpop.f32.mrb[62].mxu0 }
 0x176   : > { %1425 = vst [vmem:[%s2243_s20 + $0xe8] sm:$0xff] %v1393_v20  ;;  %v1845_v26 = vadd.f32 %v1844_v24, %v1843_v21  ;;  %v1846_v27 = vpop.f32.mrb[62].mxu1  ;;  %v1735_v28 = vpop.f32.mrb[63].mxu0 }
 0x177   : > { %v1736_v29 = vadd.f32 %v1735_v28, %v1734_v25  ;;  %v1847_v30 = vpop.f32.mrb[63].mxu1 }
 0x178   : > { %v1252_v31 = vadd.f32 %v1845_v26, %v1733_v23  ;;  %v1848_v32 = vadd.f32 %v1847_v30, %v1846_v27 }
 0x17a   : > { %v1394_v33 = vadd.f32 %v2238_v41, %v1252_v31  ;;  %v1255_v34 = vadd.f32 %v1848_v32, %v1736_v29 }
 0x17c   : > { %1426 = vst [vmem:[%s2243_s20 + $0xf0] sm:$0xff] %v1394_v33  ;;  %v1395_v35 = vadd.f32 %v2238_v41, %v1255_v34 }
 0x17e   : > { %1427 = vst [vmem:[%s2243_s20 + $0xf8] sm:$0xff] %v1395_v35 }
 0x17f PF: > { %s13_s14 = sadd.s32 1, %s2023_s14   ;;  %s2322_s12 = smov %s2019_s13 }
 0x180   : > { %p10_p5 = scmp.ge.s32.totalorder %s13_s14, 4   ;;  %s2323_s13 = smov %s2325_s15 }
 0x182   :  { %12 = sbr.rel (!%p10_p5) target bundleno = 2 (0x2), region = 73 }

</bundles_post_ra>
